<compile_context>
chip_gen: v7x
topology: tpu7x:2x2x1
jax: 0.10.0
libtpu: 0.0.40
codegen_flags: <defaults>
</compile_context>

<pallas_src>
import jax
import jax.numpy as jnp
from jax.experimental import pallas as pl
from jax.experimental.pallas import tpu as pltpu


# ---------------------------------------------------------------------------
# Kernel
# ---------------------------------------------------------------------------
def bottleneck_kernel(x_hbm, w1_ref, w2_ref, w3_ref, b1_ref, b2_ref, b3_ref,
                      o_ref, xbuf, h1buf, sem_x, sem_h):
    """One (batch n, length-tile t) grid step.

    x_hbm : (N, L, Cin) ref left in HBM (memory_space=pl.ANY).
    xbuf  : (2, TL+2, Cin) VMEM double buffer; core rows at [1, TL+1),
            left/right halo rows at 0 / TL+1.
    h1buf : (TL+2, P) bf16 VMEM scratch holding conv2's (halo'd) input.
    sem_x : DMA semaphores (2,)   -- core TL-row copy, one per slot.
    sem_h : DMA semaphores (2, 2) -- [left/right halo row, slot].
    """
    n = pl.program_id(0)
    t = pl.program_id(1)
    num_t = pl.num_programs(1)
    tl = o_ref.shape[1]
    slot = t % 2

    def issue_fetch(tt, s):
        # Fetch rows [tt*tl - 1, tt*tl + tl + 1) of x into xbuf[s].  Halo rows
        # outside [0, L) are simply not fetched; the matching h1 halo rows are
        # zeroed below, which reproduces conv2's zero padding exactly.
        row = pl.multiple_of(tt * tl, 8)
        pltpu.make_async_copy(x_hbm.at[n, pl.ds(row, tl), :],
                              xbuf.at[s, pl.ds(1, tl), :],
                              sem_x.at[s]).start()

        @pl.when(tt > 0)
        def _():
            pltpu.make_async_copy(x_hbm.at[n, pl.ds(row - 1, 1), :],
                                  xbuf.at[s, pl.ds(0, 1), :],
                                  sem_h.at[0, s]).start()

        @pl.when(tt < num_t - 1)
        def _():
            pltpu.make_async_copy(x_hbm.at[n, pl.ds(row + tl, 1), :],
                                  xbuf.at[s, pl.ds(tl + 1, 1), :],
                                  sem_h.at[1, s]).start()

    # Prime the pipeline at the first tile of each batch row, then start the
    # next tile's fetch *before* blocking on the current one so the HBM copy
    # overlaps this step's matmuls.
    @pl.when(t == 0)
    def _():
        issue_fetch(t, slot)

    @pl.when(t + 1 < num_t)
    def _():
        issue_fetch(t + 1, 1 - slot)

    # Wait for the current slot's copies (issued at step t-1, or just above
    # for the first tile of this batch row).
    pltpu.make_async_copy(x_hbm.at[n, pl.ds(0, tl), :],
                          xbuf.at[slot, pl.ds(1, tl), :],
                          sem_x.at[slot]).wait()

    @pl.when(t > 0)
    def _():
        pltpu.make_async_copy(x_hbm.at[n, pl.ds(0, 1), :],
                              xbuf.at[slot, pl.ds(0, 1), :],
                              sem_h.at[0, slot]).wait()

    @pl.when(t < num_t - 1)
    def _():
        pltpu.make_async_copy(x_hbm.at[n, pl.ds(0, 1), :],
                              xbuf.at[slot, pl.ds(tl + 1, 1), :],
                              sem_h.at[1, slot]).wait()

    xw = xbuf[slot]                                     # (TL+2, Cin) f32

    # ---- conv1 (1x1, bn1 scale folded) + shift + relu -> bf16 scratch
    h1 = jnp.dot(xw.astype(jnp.bfloat16), w1_ref[...],
                 preferred_element_type=jnp.float32)
    h1buf[...] = jnp.maximum(h1 + b1_ref[...], 0.0).astype(jnp.bfloat16)

    # conv2's zero padding: halo rows outside [0, L) must be zero.  (At the
    # edges the un-fetched xbuf halo row holds stale data; it is harmless
    # because the corresponding h1 row is overwritten with zeros here.)
    @pl.when(t == 0)
    def _():
        h1buf[0:1, :] = jnp.zeros((1, h1buf.shape[1]), jnp.bfloat16)

    @pl.when(t == num_t - 1)
    def _():
        h1buf[tl + 1:tl + 2, :] = jnp.zeros((1, h1buf.shape[1]), jnp.bfloat16)

    # ---- conv2 (k=3, stride=1, pad=1) as a single K=3P matmul + shift + relu
    # TODO(synk): if profiles show ld/st (not MXU) binding, split into three
    # per-tap jnp.dot calls summed in f32 to avoid the (TL, 3P) concat temp.
    h1m = h1buf[...]                                    # (TL+2, P) bf16
    stack = jnp.concatenate(
        [h1m[0:tl, :], h1m[1:tl + 1, :], h1m[2:tl + 2, :]], axis=-1)  # (TL,3P)
    h2 = jnp.dot(stack, w2_ref[...], preferred_element_type=jnp.float32)
    h2 = jnp.maximum(h2 + b2_ref[...], 0.0)

    # ---- conv3 (1x1) + shift + residual + relu (f32 math, cast on store)
    h3 = jnp.dot(h2.astype(jnp.bfloat16), w3_ref[...],
                 preferred_element_type=jnp.float32)
    res = xw[1:tl + 1, :]                               # interior x rows (f32)
    o_ref[0] = jnp.maximum(h3 + b3_ref[...] + res, 0.0).astype(o_ref.dtype)


# ---------------------------------------------------------------------------
# Host-side wrapper: VMEM-aware tile selection + pallas_call
# ---------------------------------------------------------------------------
def _vmem_capacity_bytes():
    try:
        return int(pltpu.get_tpu_info().vmem_capacity_bytes)
    except Exception:
        return 64 * 1024 * 1024        # conservative fallback (v7x per-TC)


def _vmem_estimate_bytes(tl, cin, p, cout, out_bytes):
    xbuf = 2 * (tl + 2) * cin * 4                      # double-buffered x halo
    h1buf = (tl + 2) * p * 2                           # bf16 conv2 input
    out = 2 * tl * cout * out_bytes                    # double-buffered output
    weights = 2 * ((cin * p + 3 * p * p + p * cout) * 2 + (2 * p + cout) * 4)
    temps = tl * (3 * p * 2 + p * 4 + 2 * cout * 4)    # stack + h2 + h3 temps
    return xbuf + h1buf + out + weights + temps


def _auto_tile(L, cin, p, cout, out_bytes, budget):
    cands = {c for c in (1024, 768, 512, 384, 256, 192, 128, 96, 64, 32, 16, 8)
             if c <= L and L % c == 0}
    if L % 8 == 0 and L <= 2048:
        cands.add(L)
    for tl in sorted(cands, reverse=True):
        if _vmem_estimate_bytes(tl, cin, p, cout, out_bytes) <= budget:
            return tl
    raise ValueError("no length tile fits the VMEM budget")


def bottleneck_pallas_nlc(x_nlc, w1, w2f, w3, b1, b2, b3, *, tl=None,
                          out_dtype=jnp.bfloat16):
    """Bottleneck forward in NLC layout (eval-mode BN, stride=1, no downsample).

    x_nlc: (N, L, Cin), Cin == Cout == 4*planes (identity residual)
    w1:  (Cin, P)  bf16  conv1 weight, bn1 scale folded, P = planes padded /128
    w2f: (3P, P)   bf16  conv2 weight flattened over (k, cin), bn2 folded
    w3:  (P, Cout) bf16  conv3 weight, bn3 folded
    b1/b2/b3: (1, P)/(1, P)/(1, Cout) f32 folded BN shifts
    """
    N, L, Cin = x_nlc.shape
    P = w1.shape[1]
    Cout = w3.shape[1]
    assert Cin == Cout, "residual path requires Cin == planes * expansion"
    assert w2f.shape == (3 * P, P)

    out_bytes = jnp.dtype(out_dtype).itemsize
    cap = _vmem_capacity_bytes()
    vmem_limit = int(cap * 0.75)       # ~48 MiB on v7x, ~96 MiB on v5e/v6e
    if tl is None:
        tl = _auto_tile(L, Cin, P, Cout, out_bytes, int(vmem_limit * 0.8))
    assert L % tl == 0 and tl % 8 == 0, "L tile must divide L, multiple of 8"
    T = L // tl

    flops = 2 * N * L * (Cin * P + 3 * P * P + P * Cout)
    bytes_accessed = (N * L * Cin * x_nlc.dtype.itemsize
                      + N * L * Cout * out_bytes
                      + (w1.size + w2f.size + w3.size) * 2
                      + (b1.size + b2.size + b3.size) * 4)

    return pl.pallas_call(
        bottleneck_kernel,
        out_shape=jax.ShapeDtypeStruct((N, L, Cout), out_dtype),
        grid_spec=pltpu.PrefetchScalarGridSpec(
            num_scalar_prefetch=0,
            grid=(N, T),
            in_specs=[
                pl.BlockSpec(memory_space=pl.ANY),          # x stays in HBM
                pl.BlockSpec((Cin, P), lambda n, t: (0, 0)),
                pl.BlockSpec((3 * P, P), lambda n, t: (0, 0)),
                pl.BlockSpec((P, Cout), lambda n, t: (0, 0)),
                pl.BlockSpec((1, P), lambda n, t: (0, 0)),
                pl.BlockSpec((1, P), lambda n, t: (0, 0)),
                pl.BlockSpec((1, Cout), lambda n, t: (0, 0)),
            ],
            out_specs=pl.BlockSpec((1, tl, Cout), lambda n, t: (n, t, 0)),
            scratch_shapes=[
                pltpu.VMEM((2, tl + 2, Cin), x_nlc.dtype),  # x halo, 2 slots
                pltpu.VMEM((tl + 2, P), jnp.bfloat16),      # h1 (conv2 input)
                pltpu.SemaphoreType.DMA((2,)),              # core copy sems
                pltpu.SemaphoreType.DMA((2, 2)),            # halo row sems
            ]),
        compiler_params=pltpu.CompilerParams(
            # T must stay sequential for the cross-step halo prefetch; the
            # batch axis stays parallel for v7x's two TensorCores.
            dimension_semantics=("parallel", "arbitrary"),
            vmem_limit_bytes=vmem_limit),
        cost_estimate=pl.CostEstimate(flops=flops, transcendentals=0,
                                      bytes_accessed=bytes_accessed),
    )(x_nlc, w1, w2f, w3, b1, b2, b3)


# ---------------------------------------------------------------------------
# Parameter preparation (BN folding, layout, lane padding)
# ---------------------------------------------------------------------------
def fold_bn(gamma, beta, mean, var, eps=1e-5):
    scale = gamma / jnp.sqrt(var + eps)
    shift = beta - mean * scale
    return scale, shift


def prep_params(w1_pt, w2_pt, w3_pt, bn1, bn2, bn3, lane=128):
    """PyTorch conv weights (Cout, Cin, K) + eval-mode BN params -> kernel
    layouts: BN scale folded into the weights, internal planes dim zero-padded
    to a full 128-lane multiple (zero weights/shifts contribute nothing)."""
    s1, b1 = fold_bn(*bn1)
    s2, b2 = fold_bn(*bn2)
    s3, b3 = fold_bn(*bn3)
    P = w1_pt.shape[0]
    Pp = -(-P // lane) * lane
    w1 = jnp.transpose(w1_pt[:, :, 0], (1, 0)) * s1[None, :]        # (Cin, P)
    w2 = jnp.transpose(w2_pt, (2, 1, 0)) * s2[None, None, :]        # (3, P, P)
    w3 = jnp.transpose(w3_pt[:, :, 0], (1, 0)) * s3[None, :]        # (P, Cout)
    w1 = jnp.pad(w1, ((0, 0), (0, Pp - P)))
    w2 = jnp.pad(w2, ((0, 0), (0, Pp - P), (0, Pp - P)))
    w3 = jnp.pad(w3, ((0, Pp - P), (0, 0)))
    b1 = jnp.pad(b1, (0, Pp - P))
    b2 = jnp.pad(b2, (0, Pp - P))
    w2f = w2.reshape(3 * Pp, Pp)                                    # (3P, P)
    to_bf = lambda w: w.astype(jnp.bfloat16)
    return (to_bf(w1), to_bf(w2f), to_bf(w3),
            b1[None, :], b2[None, :], b3[None, :])


# ---------------------------------------------------------------------------
# Pure-JAX reference (mirrors kernel numerics: bf16 matmul operands, f32
# accumulation + elementwise, bf16 h1 / output)
# ---------------------------------------------------------------------------
def reference_nlc(x, w1, w2f, w3, b1, b2, b3, out_dtype):
    def mm(a, w):
        return jnp.einsum('nlk,kp->nlp',
                          a.astype(jnp.bfloat16).astype(jnp.float32),
                          w.astype(jnp.float32))
    _, L, _ = x.shape
    h1 = jnp.maximum(mm(x, w1) + b1, 0.0).astype(jnp.bfloat16)
    h1p = jnp.pad(h1, ((0, 0), (1, 1), (0, 0)))
    stack = jnp.concatenate([h1p[:, 0:L], h1p[:, 1:L + 1], h1p[:, 2:L + 2]],
                            axis=-1)
    h2 = jnp.maximum(mm(stack, w2f) + b2, 0.0)
    h3 = mm(h2, w3) + b3
    return jnp.maximum(h3 + x, 0.0).astype(out_dtype)


if __name__ == "__main__":
    # planes=32, expansion=4 -> inplanes = Cout = 128: full 128-lane channel
    # dims so output stores are unmasked and the MXU lanes are dense (the
    # internal planes dim 32 is zero-padded to 128 inside prep_params).
    N, planes, expansion, L = 2, 32, 4, 512
    inplanes = planes * expansion
    Cout = planes * expansion

    key = jax.random.PRNGKey(0)
    k_x, k1, k2, k3 = jax.random.split(key, 4)

    x_ncl = jax.random.normal(k_x, (N, inplanes, L), dtype=jnp.float32)

    # Conv weights (PyTorch shapes: (Cout, Cin, K)).
    w1_pt = 0.1 * jax.random.normal(k1, (planes, inplanes, 1), jnp.float32)
    w2_pt = 0.1 * jax.random.normal(k2, (planes, planes, 3), jnp.float32)
    w3_pt = 0.1 * jax.random.normal(k3, (Cout, planes, 1), jnp.float32)

    # Deterministic eval-mode BatchNorm parameters.
    def bn_params(C, off):
        gamma = 1.0 + 0.01 * (jnp.arange(C, dtype=jnp.float32) + off)
        beta = 0.01 * (jnp.arange(C, dtype=jnp.float32) - off)
        mean = 0.02 * jnp.arange(C, dtype=jnp.float32)
        var = 1.0 + 0.03 * jnp.arange(C, dtype=jnp.float32)
        return gamma, beta, mean, var

    w1, w2f, w3, b1, b2, b3 = prep_params(
        w1_pt, w2_pt, w3_pt,
        bn_params(planes, 0.0), bn_params(planes, 1.0), bn_params(Cout, 2.0))

    # One NCL <-> NLC transpose at the demo boundary only.
    x_nlc = jnp.transpose(x_ncl, (0, 2, 1))

    ref = reference_nlc(x_nlc, w1, w2f, w3, b1, b2, b3, jnp.bfloat16)

    # Auto-sized tile (largest that fits this generation's VMEM budget).
    out_auto = bottleneck_pallas_nlc(x_nlc, w1, w2f, w3, b1, b2, b3)
    # Forced multi-tile run to exercise the halo DMA + double-buffer path.
    out_tiled = bottleneck_pallas_nlc(x_nlc, w1, w2f, w3, b1, b2, b3, tl=128)
    out_auto, out_tiled = jax.block_until_ready((out_auto, out_tiled))

    for out in (out_auto, out_tiled):
        assert out.shape == (N, L, Cout)
        err = float(jnp.max(jnp.abs(out.astype(jnp.float32)
                                    - ref.astype(jnp.float32))))
        assert jnp.allclose(out.astype(jnp.float32), ref.astype(jnp.float32),
                            atol=2e-2, rtol=2e-2), err

    out_ncl = jnp.transpose(out_tiled, (0, 2, 1))   # back to PyTorch NCL
    assert out_ncl.shape == (N, Cout, L)
    print("KERNEL_OK")
</pallas_src>

<mosaic_0001>
module attributes {stable_mosaic.version = 11 : i64} {
  func.func @bottleneck_kernel(%arg0: i32, %arg1: i32, %arg2: memref<2x512x128xf32, #tpu.memory_space<any>>, %arg3: memref<128x128xbf16, #tpu.memory_space<vmem>>, %arg4: memref<384x128xbf16, #tpu.memory_space<vmem>>, %arg5: memref<128x128xbf16, #tpu.memory_space<vmem>>, %arg6: memref<1x128xf32, #tpu.memory_space<vmem>>, %arg7: memref<1x128xf32, #tpu.memory_space<vmem>>, %arg8: memref<1x128xf32, #tpu.memory_space<vmem>>, %arg9: memref<1x512x128xbf16, #tpu.memory_space<vmem>>, %arg10: memref<2x514x128xf32, #tpu.memory_space<vmem>>, %arg11: memref<514x128xbf16, #tpu.memory_space<vmem>>, %arg12: memref<2x!tpu.dma_semaphore, #tpu.memory_space<semaphore_mem>>, %arg13: memref<2x2x!tpu.dma_semaphore, #tpu.memory_space<semaphore_mem>>) attributes {dimension_semantics = [#tpu.dimension_semantics<parallel>, #tpu.dimension_semantics<arbitrary>], iteration_bounds = array<i64: 2, 1>, scalar_prefetch = 0 : i64, scratch_operands = 4 : i64, tpu.core_type = #tpu.core_type<tc>, window_params = [{}, {pipeline_mode = #tpu.pipeline_mode<synchronous>, transform_indices = @transform_1, window_bounds = array<i64: 128, 128>}, {pipeline_mode = #tpu.pipeline_mode<synchronous>, transform_indices = @transform_2, window_bounds = array<i64: 384, 128>}, {pipeline_mode = #tpu.pipeline_mode<synchronous>, transform_indices = @transform_3, window_bounds = array<i64: 128, 128>}, {pipeline_mode = #tpu.pipeline_mode<synchronous>, transform_indices = @transform_4, window_bounds = array<i64: 1, 128>}, {pipeline_mode = #tpu.pipeline_mode<synchronous>, transform_indices = @transform_5, window_bounds = array<i64: 1, 128>}, {pipeline_mode = #tpu.pipeline_mode<synchronous>, transform_indices = @transform_6, window_bounds = array<i64: 1, 128>}, {transform_indices = @transform_7, window_bounds = array<i64: 1, 512, 128>}]} {
    %c2_i32 = arith.constant 2 : i32
    %c0_i32 = arith.constant 0 : i32
    %0 = arith.cmpi eq, %c2_i32, %c0_i32 : i32
    %c1_i32 = arith.constant 1 : i32
    %1 = arith.select %0, %c1_i32, %c2_i32 : i32
    %2 = arith.remsi %arg1, %1 : i32
    %c0_i32_0 = arith.constant 0 : i32
    %3 = arith.cmpi ne, %2, %c0_i32_0 : i32
    %c0_i32_1 = arith.constant 0 : i32
    %4 = arith.cmpi slt, %2, %c0_i32_1 : i32
    %c0_i32_2 = arith.constant 0 : i32
    %5 = arith.cmpi slt, %1, %c0_i32_2 : i32
    %6 = arith.xori %4, %5 : i1
    %7 = arith.andi %6, %3 : i1
    %8 = arith.addi %2, %1 : i32
    %9 = arith.select %7, %8, %2 : i32
    %c0_i32_3 = arith.constant 0 : i32
    %10 = arith.cmpi eq, %arg1, %c0_i32_3 : i32
    %11 = arith.extui %10 : i1 to i32
    %c0_i32_4 = arith.constant 0 : i32
    %12 = arith.cmpi ne, %11, %c0_i32_4 : i32
    scf.if %12 {
      %c512_i32 = arith.constant 512 : i32
      %74 = arith.muli %arg1, %c512_i32 : i32
      %75 = tpu.assume_multiple %74, 8 : i32
      %c0_i32_45 = arith.constant 0 : i32
      %76 = tpu.memref_slice %arg2[%arg0, %75, %c0_i32_45] : memref<2x512x128xf32, #tpu.memory_space<any>> -> memref<1x512x128xf32, #tpu.memory_space<any>>
      %77 = tpu.memref_squeeze %76 : memref<1x512x128xf32, #tpu.memory_space<any>> -> memref<512x128xf32, #tpu.memory_space<any>>
      %c1_i32_46 = arith.constant 1 : i32
      %c0_i32_47 = arith.constant 0 : i32
      %78 = tpu.memref_slice %arg10[%9, %c1_i32_46, %c0_i32_47] : memref<2x514x128xf32, #tpu.memory_space<vmem>> -> memref<1x512x128xf32, #tpu.memory_space<vmem>>
      %79 = tpu.memref_squeeze %78 : memref<1x512x128xf32, #tpu.memory_space<vmem>> -> memref<512x128xf32, #tpu.memory_space<vmem>>
      %80 = tpu.memref_slice %arg12[%9] : memref<2x!tpu.dma_semaphore, #tpu.memory_space<semaphore_mem>> -> memref<1x!tpu.dma_semaphore, #tpu.memory_space<semaphore_mem>>
      %81 = tpu.memref_squeeze %80 : memref<1x!tpu.dma_semaphore, #tpu.memory_space<semaphore_mem>> -> memref<!tpu.dma_semaphore, #tpu.memory_space<semaphore_mem>>
      tpu.enqueue_dma source(%77 : memref<512x128xf32, #tpu.memory_space<any>>) target(%79 : memref<512x128xf32, #tpu.memory_space<vmem>>) target_semaphore(%81 : memref<!tpu.dma_semaphore, #tpu.memory_space<semaphore_mem>>)
      %c0_i32_48 = arith.constant 0 : i32
      %82 = arith.cmpi sgt, %arg1, %c0_i32_48 : i32
      %83 = arith.extui %82 : i1 to i32
      %c0_i32_49 = arith.constant 0 : i32
      %84 = arith.cmpi ne, %83, %c0_i32_49 : i32
      scf.if %84 {
        %c1_i32_52 = arith.constant 1 : i32
        %88 = arith.subi %75, %c1_i32_52 : i32
        %c0_i32_53 = arith.constant 0 : i32
        %c0_i32_54 = arith.constant 0 : i32
        %89 = tpu.memref_slice %arg2[%arg0, %88, %c0_i32_54] : memref<2x512x128xf32, #tpu.memory_space<any>> -> memref<1x1x128xf32, #tpu.memory_space<any>>
        %90 = tpu.memref_squeeze %89 : memref<1x1x128xf32, #tpu.memory_space<any>> -> memref<1x128xf32, #tpu.memory_space<any>>
        %c0_i32_55 = arith.constant 0 : i32
        %c0_i32_56 = arith.constant 0 : i32
        %91 = tpu.memref_slice %arg10[%9, %c0_i32_55, %c0_i32_56] : memref<2x514x128xf32, #tpu.memory_space<vmem>> -> memref<1x1x128xf32, #tpu.memory_space<vmem>>
        %92 = tpu.memref_squeeze %91 : memref<1x1x128xf32, #tpu.memory_space<vmem>> -> memref<1x128xf32, #tpu.memory_space<vmem>>
        %93 = tpu.memref_slice %arg13[%c0_i32_53, %9] : memref<2x2x!tpu.dma_semaphore, #tpu.memory_space<semaphore_mem>> -> memref<1x1x!tpu.dma_semaphore, #tpu.memory_space<semaphore_mem>>
        %94 = tpu.memref_squeeze %93 : memref<1x1x!tpu.dma_semaphore, #tpu.memory_space<semaphore_mem>> -> memref<!tpu.dma_semaphore, #tpu.memory_space<semaphore_mem>>
        tpu.enqueue_dma source(%90 : memref<1x128xf32, #tpu.memory_space<any>>) target(%92 : memref<1x128xf32, #tpu.memory_space<vmem>>) target_semaphore(%94 : memref<!tpu.dma_semaphore, #tpu.memory_space<semaphore_mem>>)
      } else {
      }
      %c0_i32_50 = arith.constant 0 : i32
      %85 = arith.cmpi slt, %arg1, %c0_i32_50 : i32
      %86 = arith.extui %85 : i1 to i32
      %c0_i32_51 = arith.constant 0 : i32
      %87 = arith.cmpi ne, %86, %c0_i32_51 : i32
      scf.if %87 {
        %c512_i32_52 = arith.constant 512 : i32
        %88 = arith.addi %75, %c512_i32_52 : i32
        %c1_i32_53 = arith.constant 1 : i32
        %c0_i32_54 = arith.constant 0 : i32
        %89 = tpu.memref_slice %arg2[%arg0, %88, %c0_i32_54] : memref<2x512x128xf32, #tpu.memory_space<any>> -> memref<1x1x128xf32, #tpu.memory_space<any>>
        %90 = tpu.memref_squeeze %89 : memref<1x1x128xf32, #tpu.memory_space<any>> -> memref<1x128xf32, #tpu.memory_space<any>>
        %c513_i32 = arith.constant 513 : i32
        %c0_i32_55 = arith.constant 0 : i32
        %91 = tpu.memref_slice %arg10[%9, %c513_i32, %c0_i32_55] : memref<2x514x128xf32, #tpu.memory_space<vmem>> -> memref<1x1x128xf32, #tpu.memory_space<vmem>>
        %92 = tpu.memref_squeeze %91 : memref<1x1x128xf32, #tpu.memory_space<vmem>> -> memref<1x128xf32, #tpu.memory_space<vmem>>
        %93 = tpu.memref_slice %arg13[%c1_i32_53, %9] : memref<2x2x!tpu.dma_semaphore, #tpu.memory_space<semaphore_mem>> -> memref<1x1x!tpu.dma_semaphore, #tpu.memory_space<semaphore_mem>>
        %94 = tpu.memref_squeeze %93 : memref<1x1x!tpu.dma_semaphore, #tpu.memory_space<semaphore_mem>> -> memref<!tpu.dma_semaphore, #tpu.memory_space<semaphore_mem>>
        tpu.enqueue_dma source(%90 : memref<1x128xf32, #tpu.memory_space<any>>) target(%92 : memref<1x128xf32, #tpu.memory_space<vmem>>) target_semaphore(%94 : memref<!tpu.dma_semaphore, #tpu.memory_space<semaphore_mem>>)
      } else {
      }
    } else {
    }
    %c1_i32_5 = arith.constant 1 : i32
    %13 = arith.addi %arg1, %c1_i32_5 : i32
    %c1_i32_6 = arith.constant 1 : i32
    %14 = arith.cmpi slt, %13, %c1_i32_6 : i32
    %15 = arith.extui %14 : i1 to i32
    %c0_i32_7 = arith.constant 0 : i32
    %16 = arith.cmpi ne, %15, %c0_i32_7 : i32
    scf.if %16 {
      %c1_i32_45 = arith.constant 1 : i32
      %74 = arith.addi %arg1, %c1_i32_45 : i32
      %c1_i32_46 = arith.constant 1 : i32
      %75 = arith.subi %c1_i32_46, %9 : i32
      %c512_i32 = arith.constant 512 : i32
      %76 = arith.muli %74, %c512_i32 : i32
      %77 = tpu.assume_multiple %76, 8 : i32
      %c0_i32_47 = arith.constant 0 : i32
      %78 = tpu.memref_slice %arg2[%arg0, %77, %c0_i32_47] : memref<2x512x128xf32, #tpu.memory_space<any>> -> memref<1x512x128xf32, #tpu.memory_space<any>>
      %79 = tpu.memref_squeeze %78 : memref<1x512x128xf32, #tpu.memory_space<any>> -> memref<512x128xf32, #tpu.memory_space<any>>
      %c1_i32_48 = arith.constant 1 : i32
      %c0_i32_49 = arith.constant 0 : i32
      %80 = tpu.memref_slice %arg10[%75, %c1_i32_48, %c0_i32_49] : memref<2x514x128xf32, #tpu.memory_space<vmem>> -> memref<1x512x128xf32, #tpu.memory_space<vmem>>
      %81 = tpu.memref_squeeze %80 : memref<1x512x128xf32, #tpu.memory_space<vmem>> -> memref<512x128xf32, #tpu.memory_space<vmem>>
      %82 = tpu.memref_slice %arg12[%75] : memref<2x!tpu.dma_semaphore, #tpu.memory_space<semaphore_mem>> -> memref<1x!tpu.dma_semaphore, #tpu.memory_space<semaphore_mem>>
      %83 = tpu.memref_squeeze %82 : memref<1x!tpu.dma_semaphore, #tpu.memory_space<semaphore_mem>> -> memref<!tpu.dma_semaphore, #tpu.memory_space<semaphore_mem>>
      tpu.enqueue_dma source(%79 : memref<512x128xf32, #tpu.memory_space<any>>) target(%81 : memref<512x128xf32, #tpu.memory_space<vmem>>) target_semaphore(%83 : memref<!tpu.dma_semaphore, #tpu.memory_space<semaphore_mem>>)
      %c0_i32_50 = arith.constant 0 : i32
      %84 = arith.cmpi sgt, %74, %c0_i32_50 : i32
      %85 = arith.extui %84 : i1 to i32
      %c0_i32_51 = arith.constant 0 : i32
      %86 = arith.cmpi ne, %85, %c0_i32_51 : i32
      scf.if %86 {
        %c1_i32_54 = arith.constant 1 : i32
        %90 = arith.subi %77, %c1_i32_54 : i32
        %c0_i32_55 = arith.constant 0 : i32
        %c0_i32_56 = arith.constant 0 : i32
        %91 = tpu.memref_slice %arg2[%arg0, %90, %c0_i32_56] : memref<2x512x128xf32, #tpu.memory_space<any>> -> memref<1x1x128xf32, #tpu.memory_space<any>>
        %92 = tpu.memref_squeeze %91 : memref<1x1x128xf32, #tpu.memory_space<any>> -> memref<1x128xf32, #tpu.memory_space<any>>
        %c0_i32_57 = arith.constant 0 : i32
        %c0_i32_58 = arith.constant 0 : i32
        %93 = tpu.memref_slice %arg10[%75, %c0_i32_57, %c0_i32_58] : memref<2x514x128xf32, #tpu.memory_space<vmem>> -> memref<1x1x128xf32, #tpu.memory_space<vmem>>
        %94 = tpu.memref_squeeze %93 : memref<1x1x128xf32, #tpu.memory_space<vmem>> -> memref<1x128xf32, #tpu.memory_space<vmem>>
        %95 = tpu.memref_slice %arg13[%c0_i32_55, %75] : memref<2x2x!tpu.dma_semaphore, #tpu.memory_space<semaphore_mem>> -> memref<1x1x!tpu.dma_semaphore, #tpu.memory_space<semaphore_mem>>
        %96 = tpu.memref_squeeze %95 : memref<1x1x!tpu.dma_semaphore, #tpu.memory_space<semaphore_mem>> -> memref<!tpu.dma_semaphore, #tpu.memory_space<semaphore_mem>>
        tpu.enqueue_dma source(%92 : memref<1x128xf32, #tpu.memory_space<any>>) target(%94 : memref<1x128xf32, #tpu.memory_space<vmem>>) target_semaphore(%96 : memref<!tpu.dma_semaphore, #tpu.memory_space<semaphore_mem>>)
      } else {
      }
      %c0_i32_52 = arith.constant 0 : i32
      %87 = arith.cmpi slt, %74, %c0_i32_52 : i32
      %88 = arith.extui %87 : i1 to i32
      %c0_i32_53 = arith.constant 0 : i32
      %89 = arith.cmpi ne, %88, %c0_i32_53 : i32
      scf.if %89 {
        %c512_i32_54 = arith.constant 512 : i32
        %90 = arith.addi %77, %c512_i32_54 : i32
        %c1_i32_55 = arith.constant 1 : i32
        %c0_i32_56 = arith.constant 0 : i32
        %91 = tpu.memref_slice %arg2[%arg0, %90, %c0_i32_56] : memref<2x512x128xf32, #tpu.memory_space<any>> -> memref<1x1x128xf32, #tpu.memory_space<any>>
        %92 = tpu.memref_squeeze %91 : memref<1x1x128xf32, #tpu.memory_space<any>> -> memref<1x128xf32, #tpu.memory_space<any>>
        %c513_i32 = arith.constant 513 : i32
        %c0_i32_57 = arith.constant 0 : i32
        %93 = tpu.memref_slice %arg10[%75, %c513_i32, %c0_i32_57] : memref<2x514x128xf32, #tpu.memory_space<vmem>> -> memref<1x1x128xf32, #tpu.memory_space<vmem>>
        %94 = tpu.memref_squeeze %93 : memref<1x1x128xf32, #tpu.memory_space<vmem>> -> memref<1x128xf32, #tpu.memory_space<vmem>>
        %95 = tpu.memref_slice %arg13[%c1_i32_55, %75] : memref<2x2x!tpu.dma_semaphore, #tpu.memory_space<semaphore_mem>> -> memref<1x1x!tpu.dma_semaphore, #tpu.memory_space<semaphore_mem>>
        %96 = tpu.memref_squeeze %95 : memref<1x1x!tpu.dma_semaphore, #tpu.memory_space<semaphore_mem>> -> memref<!tpu.dma_semaphore, #tpu.memory_space<semaphore_mem>>
        tpu.enqueue_dma source(%92 : memref<1x128xf32, #tpu.memory_space<any>>) target(%94 : memref<1x128xf32, #tpu.memory_space<vmem>>) target_semaphore(%96 : memref<!tpu.dma_semaphore, #tpu.memory_space<semaphore_mem>>)
      } else {
      }
    } else {
    }
    %c0_i32_8 = arith.constant 0 : i32
    %c0_i32_9 = arith.constant 0 : i32
    %17 = tpu.memref_slice %arg2[%arg0, %c0_i32_8, %c0_i32_9] : memref<2x512x128xf32, #tpu.memory_space<any>> -> memref<1x512x128xf32, #tpu.memory_space<any>>
    %18 = tpu.memref_squeeze %17 : memref<1x512x128xf32, #tpu.memory_space<any>> -> memref<512x128xf32, #tpu.memory_space<any>>
    %c1_i32_10 = arith.constant 1 : i32
    %c0_i32_11 = arith.constant 0 : i32
    %19 = tpu.memref_slice %arg10[%9, %c1_i32_10, %c0_i32_11] : memref<2x514x128xf32, #tpu.memory_space<vmem>> -> memref<1x512x128xf32, #tpu.memory_space<vmem>>
    %20 = tpu.memref_squeeze %19 : memref<1x512x128xf32, #tpu.memory_space<vmem>> -> memref<512x128xf32, #tpu.memory_space<vmem>>
    %21 = tpu.memref_slice %arg12[%9] : memref<2x!tpu.dma_semaphore, #tpu.memory_space<semaphore_mem>> -> memref<1x!tpu.dma_semaphore, #tpu.memory_space<semaphore_mem>>
    %22 = tpu.memref_squeeze %21 : memref<1x!tpu.dma_semaphore, #tpu.memory_space<semaphore_mem>> -> memref<!tpu.dma_semaphore, #tpu.memory_space<semaphore_mem>>
    tpu.wait_dma2 semaphore(%22 : memref<!tpu.dma_semaphore, #tpu.memory_space<semaphore_mem>>) src(%18 : memref<512x128xf32, #tpu.memory_space<any>>) dst(%20 : memref<512x128xf32, #tpu.memory_space<vmem>>)
    %c0_i32_12 = arith.constant 0 : i32
    %23 = arith.cmpi sgt, %arg1, %c0_i32_12 : i32
    %24 = arith.extui %23 : i1 to i32
    %c0_i32_13 = arith.constant 0 : i32
    %25 = arith.cmpi ne, %24, %c0_i32_13 : i32
    scf.if %25 {
      %c0_i32_45 = arith.constant 0 : i32
      %c0_i32_46 = arith.constant 0 : i32
      %c0_i32_47 = arith.constant 0 : i32
      %74 = tpu.memref_slice %arg2[%arg0, %c0_i32_46, %c0_i32_47] : memref<2x512x128xf32, #tpu.memory_space<any>> -> memref<1x1x128xf32, #tpu.memory_space<any>>
      %75 = tpu.memref_squeeze %74 : memref<1x1x128xf32, #tpu.memory_space<any>> -> memref<1x128xf32, #tpu.memory_space<any>>
      %c0_i32_48 = arith.constant 0 : i32
      %c0_i32_49 = arith.constant 0 : i32
      %76 = tpu.memref_slice %arg10[%9, %c0_i32_48, %c0_i32_49] : memref<2x514x128xf32, #tpu.memory_space<vmem>> -> memref<1x1x128xf32, #tpu.memory_space<vmem>>
      %77 = tpu.memref_squeeze %76 : memref<1x1x128xf32, #tpu.memory_space<vmem>> -> memref<1x128xf32, #tpu.memory_space<vmem>>
      %78 = tpu.memref_slice %arg13[%c0_i32_45, %9] : memref<2x2x!tpu.dma_semaphore, #tpu.memory_space<semaphore_mem>> -> memref<1x1x!tpu.dma_semaphore, #tpu.memory_space<semaphore_mem>>
      %79 = tpu.memref_squeeze %78 : memref<1x1x!tpu.dma_semaphore, #tpu.memory_space<semaphore_mem>> -> memref<!tpu.dma_semaphore, #tpu.memory_space<semaphore_mem>>
      tpu.wait_dma2 semaphore(%79 : memref<!tpu.dma_semaphore, #tpu.memory_space<semaphore_mem>>) src(%75 : memref<1x128xf32, #tpu.memory_space<any>>) dst(%77 : memref<1x128xf32, #tpu.memory_space<vmem>>)
    } else {
    }
    %c0_i32_14 = arith.constant 0 : i32
    %26 = arith.cmpi slt, %arg1, %c0_i32_14 : i32
    %27 = arith.extui %26 : i1 to i32
    %c0_i32_15 = arith.constant 0 : i32
    %28 = arith.cmpi ne, %27, %c0_i32_15 : i32
    scf.if %28 {
      %c1_i32_45 = arith.constant 1 : i32
      %c0_i32_46 = arith.constant 0 : i32
      %c0_i32_47 = arith.constant 0 : i32
      %74 = tpu.memref_slice %arg2[%arg0, %c0_i32_46, %c0_i32_47] : memref<2x512x128xf32, #tpu.memory_space<any>> -> memref<1x1x128xf32, #tpu.memory_space<any>>
      %75 = tpu.memref_squeeze %74 : memref<1x1x128xf32, #tpu.memory_space<any>> -> memref<1x128xf32, #tpu.memory_space<any>>
      %c513_i32 = arith.constant 513 : i32
      %c0_i32_48 = arith.constant 0 : i32
      %76 = tpu.memref_slice %arg10[%9, %c513_i32, %c0_i32_48] : memref<2x514x128xf32, #tpu.memory_space<vmem>> -> memref<1x1x128xf32, #tpu.memory_space<vmem>>
      %77 = tpu.memref_squeeze %76 : memref<1x1x128xf32, #tpu.memory_space<vmem>> -> memref<1x128xf32, #tpu.memory_space<vmem>>
      %78 = tpu.memref_slice %arg13[%c1_i32_45, %9] : memref<2x2x!tpu.dma_semaphore, #tpu.memory_space<semaphore_mem>> -> memref<1x1x!tpu.dma_semaphore, #tpu.memory_space<semaphore_mem>>
      %79 = tpu.memref_squeeze %78 : memref<1x1x!tpu.dma_semaphore, #tpu.memory_space<semaphore_mem>> -> memref<!tpu.dma_semaphore, #tpu.memory_space<semaphore_mem>>
      tpu.wait_dma2 semaphore(%79 : memref<!tpu.dma_semaphore, #tpu.memory_space<semaphore_mem>>) src(%75 : memref<1x128xf32, #tpu.memory_space<any>>) dst(%77 : memref<1x128xf32, #tpu.memory_space<vmem>>)
    } else {
    }
    %29 = arith.index_cast %9 : i32 to index
    %c0 = arith.constant 0 : index
    %c0_16 = arith.constant 0 : index
    %30 = vector.load %arg10[%29, %c0, %c0_16] : memref<2x514x128xf32, #tpu.memory_space<vmem>>, vector<1x514x128xf32>
    %31 = vector.shape_cast %30 : vector<1x514x128xf32> to vector<514x128xf32>
    %32 = arith.truncf %31 : vector<514x128xf32> to vector<514x128xbf16>
    %c0_17 = arith.constant 0 : index
    %c0_18 = arith.constant 0 : index
    %33 = vector.load %arg3[%c0_17, %c0_18] : memref<128x128xbf16, #tpu.memory_space<vmem>>, vector<128x128xbf16>
    %cst = arith.constant dense<0.000000e+00> : vector<514x128xf32>
    %34 = tpu.matmul %32, %33, %cst {dimension_numbers = #tpu.dot_dimension_numbers<[1], [0], [0], [1], [0, 0, 1, 1], [], []>} : vector<514x128xbf16>, vector<128x128xbf16>, vector<514x128xf32> -> vector<514x128xf32>
    %c0_19 = arith.constant 0 : index
    %c0_20 = arith.constant 0 : index
    %35 = vector.load %arg6[%c0_19, %c0_20] : memref<1x128xf32, #tpu.memory_space<vmem>>, vector<1x128xf32>
    %36 = vector.broadcast %35 : vector<1x128xf32> to vector<514x128xf32>
    %37 = arith.addf %34, %36 : vector<514x128xf32>
    %cst_21 = arith.constant 0.000000e+00 : f32
    %38 = vector.broadcast %cst_21 : f32 to vector<514x128xf32>
    %39 = arith.maximumf %37, %38 : vector<514x128xf32>
    %40 = arith.truncf %39 : vector<514x128xf32> to vector<514x128xbf16>
    %c0_22 = arith.constant 0 : index
    %c0_23 = arith.constant 0 : index
    %41 = vector.load %arg11[%c0_22, %c0_23] : memref<514x128xbf16, #tpu.memory_space<vmem>>, vector<514x128xbf16>
    tpu.vector_store %arg11[%c0_22, %c0_23], %40 {strides = array<i32>} : memref<514x128xbf16, #tpu.memory_space<vmem>>, vector<514x128xbf16>,
    %c0_i32_24 = arith.constant 0 : i32
    %42 = arith.cmpi eq, %arg1, %c0_i32_24 : i32
    %43 = arith.extui %42 : i1 to i32
    %c0_i32_25 = arith.constant 0 : i32
    %44 = arith.cmpi ne, %43, %c0_i32_25 : i32
    scf.if %44 {
      %cst_45 = arith.constant 0.000000e+00 : bf16
      %74 = vector.broadcast %cst_45 : bf16 to vector<1x128xbf16>
      %c0_46 = arith.constant 0 : index
      %c0_47 = arith.constant 0 : index
      %75 = vector.load %arg11[%c0_46, %c0_47] : memref<514x128xbf16, #tpu.memory_space<vmem>>, vector<1x128xbf16>
      tpu.vector_store %arg11[%c0_46, %c0_47], %74 {strides = array<i32>} : memref<514x128xbf16, #tpu.memory_space<vmem>>, vector<1x128xbf16>,
    } else {
    }
    %c0_i32_26 = arith.constant 0 : i32
    %45 = arith.cmpi eq, %arg1, %c0_i32_26 : i32
    %46 = arith.extui %45 : i1 to i32
    %c0_i32_27 = arith.constant 0 : i32
    %47 = arith.cmpi ne, %46, %c0_i32_27 : i32
    scf.if %47 {
      %cst_45 = arith.constant 0.000000e+00 : bf16
      %74 = vector.broadcast %cst_45 : bf16 to vector<1x128xbf16>
      %c513 = arith.constant 513 : index
      %c0_46 = arith.constant 0 : index
      %75 = vector.load %arg11[%c513, %c0_46] : memref<514x128xbf16, #tpu.memory_space<vmem>>, vector<1x128xbf16>
      tpu.vector_store %arg11[%c513, %c0_46], %74 {strides = array<i32>} : memref<514x128xbf16, #tpu.memory_space<vmem>>, vector<1x128xbf16>,
    } else {
    }
    %c0_28 = arith.constant 0 : index
    %c0_29 = arith.constant 0 : index
    %48 = vector.load %arg11[%c0_28, %c0_29] : memref<514x128xbf16, #tpu.memory_space<vmem>>, vector<514x128xbf16>
    %49 = vector.extract_strided_slice %48 {offsets = [0, 0], sizes = [512, 128], strides = [1, 1]} : vector<514x128xbf16> to vector<512x128xbf16>
    %50 = vector.extract_strided_slice %48 {offsets = [1, 0], sizes = [512, 128], strides = [1, 1]} : vector<514x128xbf16> to vector<512x128xbf16>
    %51 = vector.extract_strided_slice %48 {offsets = [2, 0], sizes = [512, 128], strides = [1, 1]} : vector<514x128xbf16> to vector<512x128xbf16>
    %52 = tpu.concatenate %49, %50, %51 in 1 : vector<512x128xbf16>, vector<512x128xbf16>, vector<512x128xbf16> -> vector<512x384xbf16>
    %c0_30 = arith.constant 0 : index
    %c0_31 = arith.constant 0 : index
    %53 = vector.load %arg4[%c0_30, %c0_31] : memref<384x128xbf16, #tpu.memory_space<vmem>>, vector<384x128xbf16>
    %cst_32 = arith.constant dense<0.000000e+00> : vector<512x128xf32>
    %54 = tpu.matmul %52, %53, %cst_32 {dimension_numbers = #tpu.dot_dimension_numbers<[1], [0], [0], [1], [0, 0, 1, 1], [], []>} : vector<512x384xbf16>, vector<384x128xbf16>, vector<512x128xf32> -> vector<512x128xf32>
    %c0_33 = arith.constant 0 : index
    %c0_34 = arith.constant 0 : index
    %55 = vector.load %arg7[%c0_33, %c0_34] : memref<1x128xf32, #tpu.memory_space<vmem>>, vector<1x128xf32>
    %56 = vector.broadcast %55 : vector<1x128xf32> to vector<512x128xf32>
    %57 = arith.addf %54, %56 : vector<512x128xf32>
    %cst_35 = arith.constant 0.000000e+00 : f32
    %58 = vector.broadcast %cst_35 : f32 to vector<512x128xf32>
    %59 = arith.maximumf %57, %58 : vector<512x128xf32>
    %60 = arith.truncf %59 : vector<512x128xf32> to vector<512x128xbf16>
    %c0_36 = arith.constant 0 : index
    %c0_37 = arith.constant 0 : index
    %61 = vector.load %arg5[%c0_36, %c0_37] : memref<128x128xbf16, #tpu.memory_space<vmem>>, vector<128x128xbf16>
    %cst_38 = arith.constant dense<0.000000e+00> : vector<512x128xf32>
    %62 = tpu.matmul %60, %61, %cst_38 {dimension_numbers = #tpu.dot_dimension_numbers<[1], [0], [0], [1], [0, 0, 1, 1], [], []>} : vector<512x128xbf16>, vector<128x128xbf16>, vector<512x128xf32> -> vector<512x128xf32>
    %63 = vector.extract_strided_slice %31 {offsets = [1, 0], sizes = [512, 128], strides = [1, 1]} : vector<514x128xf32> to vector<512x128xf32>
    %c0_39 = arith.constant 0 : index
    %c0_40 = arith.constant 0 : index
    %64 = vector.load %arg8[%c0_39, %c0_40] : memref<1x128xf32, #tpu.memory_space<vmem>>, vector<1x128xf32>
    %65 = vector.broadcast %64 : vector<1x128xf32> to vector<512x128xf32>
    %66 = arith.addf %62, %65 : vector<512x128xf32>
    %67 = arith.addf %66, %63 : vector<512x128xf32>
    %cst_41 = arith.constant 0.000000e+00 : f32
    %68 = vector.broadcast %cst_41 : f32 to vector<512x128xf32>
    %69 = arith.maximumf %67, %68 : vector<512x128xf32>
    %70 = arith.truncf %69 : vector<512x128xf32> to vector<512x128xbf16>
    %c0_42 = arith.constant 0 : index
    %c0_43 = arith.constant 0 : index
    %c0_44 = arith.constant 0 : index
    %71 = vector.load %arg9[%c0_42, %c0_43, %c0_44] : memref<1x512x128xbf16, #tpu.memory_space<vmem>>, vector<1x512x128xbf16>
    %72 = vector.shape_cast %71 : vector<1x512x128xbf16> to vector<512x128xbf16>
    %73 = vector.shape_cast %70 : vector<512x128xbf16> to vector<1x512x128xbf16>
    tpu.vector_store %arg9[%c0_42, %c0_43, %c0_44], %73 {strides = array<i32>} : memref<1x512x128xbf16, #tpu.memory_space<vmem>>, vector<1x512x128xbf16>,
    return
  }
  func.func @transform_1(%arg0: i32, %arg1: i32) -> (i32, i32) {
    %c0_i32 = arith.constant 0 : i32
    %c0_i32_0 = arith.constant 0 : i32
    %c0_i32_1 = arith.constant 0 : i32
    return %c0_i32, %c0_i32_0 : i32, i32
  }
  func.func @transform_2(%arg0: i32, %arg1: i32) -> (i32, i32) {
    %c0_i32 = arith.constant 0 : i32
    %c0_i32_0 = arith.constant 0 : i32
    %c0_i32_1 = arith.constant 0 : i32
    return %c0_i32, %c0_i32_0 : i32, i32
  }
  func.func @transform_3(%arg0: i32, %arg1: i32) -> (i32, i32) {
    %c0_i32 = arith.constant 0 : i32
    %c0_i32_0 = arith.constant 0 : i32
    %c0_i32_1 = arith.constant 0 : i32
    return %c0_i32, %c0_i32_0 : i32, i32
  }
  func.func @transform_4(%arg0: i32, %arg1: i32) -> (i32, i32) {
    %c0_i32 = arith.constant 0 : i32
    %c0_i32_0 = arith.constant 0 : i32
    %c0_i32_1 = arith.constant 0 : i32
    return %c0_i32, %c0_i32_0 : i32, i32
  }
  func.func @transform_5(%arg0: i32, %arg1: i32) -> (i32, i32) {
    %c0_i32 = arith.constant 0 : i32
    %c0_i32_0 = arith.constant 0 : i32
    %c0_i32_1 = arith.constant 0 : i32
    return %c0_i32, %c0_i32_0 : i32, i32
  }
  func.func @transform_6(%arg0: i32, %arg1: i32) -> (i32, i32) {
    %c0_i32 = arith.constant 0 : i32
    %c0_i32_0 = arith.constant 0 : i32
    %c0_i32_1 = arith.constant 0 : i32
    return %c0_i32, %c0_i32_0 : i32, i32
  }
  func.func @transform_7(%arg0: i32, %arg1: i32) -> (i32, i32, i32) {
    %c0_i32 = arith.constant 0 : i32
    %c0_i32_0 = arith.constant 0 : i32
    return %arg0, %arg1, %c0_i32 : i32, i32, i32
  }
}

</mosaic_0001>

<bundles_post_ra>
// kernel: tpu_custom_call.1
= control target key start
LH: loop header
LB: loop body
LE: loop exit
PB: predicated region body
PF: predicated region fallthrough
CT: control target
= control target key end

     0   :  { %s6777_s0 = inlined_call_operand.hbm [shape: f32[2,512,128], index: 0, kind: input, shape index: {}]   ;;  %s6778_s1 = inlined_call_operand.hbm [shape: bf16[128,128], index: 1, kind: input, shape index: {}]   ;;  %s6779_s2 = inlined_call_operand.hbm [shape: bf16[384,128], index: 2, kind: input, shape index: {}]   ;;  %s6780_s3 = inlined_call_operand.hbm [shape: bf16[128,128], index: 3, kind: input, shape index: {}]   ;;  %s6781_s4 = inlined_call_operand.vmem [shape: f32[1,128], index: 4, kind: input, shape index: {}]   ;;  %s6782_s5 = inlined_call_operand.vmem [shape: f32[1,128], index: 5, kind: input, shape index: {}]   ;;  %s6783_s6 = inlined_call_operand.vmem [shape: f32[1,128], index: 6, kind: input, shape index: {}]   ;;  %s6784_s7 = inlined_call_operand.hbm [shape: bf16[2,512,128], index: 7, kind: output, shape index: {}]  }
   0x1   :  { %6792 = sst [smem:[#allocation35_spill]] %s6779_s2 }
   0x2   :  { %12 = vsyncpa [#allocation7], 0 }
   0x3   :  { %13 = vsyncpa [#allocation10], 0 }
   0x4   :  { %14 = vsyncpa [#allocation8], 0 }
   0x5   :  { %16 = vsyncpa [#allocation8 + $0x1], 0  ;;  %s5822_s24 = smov 0   ;;  %s5824_s25 = smov 0  }
   0x6   :  { %s5826_s26 = smov 0   ;;  %s5828_s27 = smov 0  }
   0x7   :  { %s5830_s28 = smov 0   ;;  %s5832_s29 = smov 0  }
   0x8 LB: > { %6793 = sst [smem:[#allocation31_spill]] %s5756_s26  ;;  %s4134_s30 = sadd.s32 4294967295, %s5768_s29   ;;  %s5768_s29 = sphi %s5832_s29, %s22_s29   ;;  %s5764_s28 = sphi %s5830_s28, %s6813_s28   ;;  %s5760_s27 = sphi %s5828_s27, %s6812_s27   ;;  %s5756_s26 = sphi %s5826_s26, %s6811_s26   ;;  %s5752_s25 = sphi %s5824_s25, %s6815_s25   ;;  %s5748_s24 = sphi %s5822_s24, %s6814_s24  }
   0x9   : > { %6794 = sst [smem:[#allocation32_spill]] %s5764_s28  ;;  %s4135_s8 = sadd.s32 4294967294, %s5768_s29  }
   0xa   : > { %s34_s9 = sadd.s32 1, %s5764_s28  ;;  %s169_s10 = sadd.s32 1, %s5756_s26 }
   0xb   : > { %p36_p0 = scmp.ge.s32.totalorder %s34_s9, 2  ;;  %p179_p1 = scmp.ne.s32.totalorder %s5756_s26, %s5752_s25 }
   0xc   : > { %p180_p2 = scmp.eq.s32.totalorder %s4134_s30, 1  ;;  %p185_p3 = scmp.ne.s32.totalorder %s5752_s25, %s5748_s24 }
   0xd   : > { %s6817_s9 = smov (%p36_p0, %s34_s9), 0  ;;  %p186_p5 = scmp.eq.s32.totalorder %s4135_s8, 1 }
   0xe   : > { %6795 = sst [smem:[#allocation33_spill]] %s6817_s9  ;;  %p5862_p4 = por %p180_p2, %p179_p1 }
   0xf   : > { %s164_s12 = ssub.s32 %s5764_s28, %s6817_s9  ;;  %p4136_p6 = scmp.ge.s32.totalorder %s5768_s29, 1 }
  0x10   : > { %s6796_s11 = scalar_select %p5862_p4, 1, 0 }
  0x11   : > { %p167_p7 = scmp.eq.s32.totalorder %s164_s12, 0  ;;  %p5869_p8 = por %p186_p5, %p185_p3 }
  0x12   : > { %p193_p9 = scmp.lt.s32.totalorder %s5768_s29, 3  ;;  %p5881_p11 = scmp.eq.s32.totalorder %s4134_s30, 0 }
  0x13   : > { %s6797_s13 = scalar_select %p5869_p8, 1, 0 }
  0x14   : > { %s5875_s14 = scalar_select %p167_p7, %s5756_s26, %s169_s10  }
  0x15   : > { %p5877_p10 = pnand %p4136_p6, %p193_p9  ;;  %s5770_s17 = smov [#allocation9]  }
  0x16   : > { %6798 = sst [smem:[#allocation34_spill]] %s5875_s14  ;;  %s218_s18 = sshll.u32 %s5770_s17, 4  ;;  %s219_s18 = int_to_ptr.vmem [resolvable:$true] %s218_s18 }
  0x17   : > { %s6799_s15 = scalar_select %p5877_p10, 1, 0 }
  0x18   : > { %s6800_s16 = scalar_select %p5881_p11, 1, 0 }
  0x19   : > { %p5352_p12 = pneg %p5877_p10  ;;  %s5771_s20 = smov [#allocation6]  }
  0x1a   : > { %s205_s21 = sshll.u32 %s5771_s20, 4  ;;  %s6802_s2 = sld [smem:[#allocation35_spill]]  ;;  %s206_s21 = int_to_ptr.vmem [resolvable:$true] %s205_s21 }
  0x1b   : > { %p5889_p13 = pnand %p5881_p11, %p5352_p12 }
  0x1d   : > { %p5901_p1 = pneg %p5889_p13 }
  0x20   : > { %s5572_s30 = scalar_lea.hbm %s6802_s2, 3072 }
  0x21   : > { %p5573_p0 = scmp.ne.s32.totalorder %s6802_s2, %s5572_s30  ;;  %p5579_p5 = scmp.lt.u32.totalorder %s5572_s30, %s6802_s2 }
  0x23   : > { %p5575_p2 = pnand %p5901_p1, %p5573_p0 }
  0x25   : > { %p5576_p3 = pneg %p5575_p2 }
  0x27   : > { %p5581_p6 = pnand %p5579_p5, %p5576_p3 }
  0x29   : > { %5584 = shalt.err (!%p5581_p6)
}
  0x2a   : > { %s5585_s20 = scalar_lea.vmem %s219_s18, 3072  ;;  %p5593_p8 = scmp.lt.s32.totalorder %s219_s18, %s219_s18 }
  0x2b   : > { %p5586_p7 = scmp.ne.s32.totalorder %s219_s18, %s5585_s20  ;;  %p5594_p4 = scmp.lt.s32.totalorder %s5585_s20, %s5585_s20 }
  0x2d   : > { %p5588_p9 = pnand %p5586_p7, %p5901_p1  ;;  %p5595_p11 = por %p5594_p4, %p5593_p8 }
  0x2f   : > { %p5589_p12 = pneg %p5588_p9 }
  0x31   : > { %p5596_p10 = pnand %p5595_p11, %p5589_p12 }
  0x33   : > { %5599 = shalt.err (!%p5596_p10)
}
  0x34   : > { %s5772_s22 = smov 64   ;;  %s5773_s23 = smov 4  }
  0x35   : > { %5358 = dma.hbm_to_vmem [thread:$0]  (!%p5889_p13), %s6802_s2, 3072, %s219_s18, [#allocation10], %s5772_s22, %s5772_s22, %s5773_s23  }
  0x36   : > { %s5600_s17 = scalar_lea.hbm %s6778_s1, 1024 }
  0x37   : > { %p5601_p4 = scmp.ne.s32.totalorder %s6778_s1, %s5600_s17  ;;  %p5607_p11 = scmp.lt.u32.totalorder %s5600_s17, %s6778_s1 }
  0x39   : > { %p5603_p8 = pnand %p5601_p4, %p5901_p1 }
  0x3b   : > { %p5604_p10 = pneg %p5603_p8 }
  0x3d   : > { %p5609_p0 = pnand %p5607_p11, %p5604_p10 }
  0x3f   : > { %5612 = shalt.err (!%p5609_p0)
}
  0x40   : > { %s5613_s9 = scalar_lea.vmem %s206_s21, 1024  ;;  %p5621_p6 = scmp.lt.s32.totalorder %s206_s21, %s206_s21 }
  0x41   : > { %p5614_p2 = scmp.ne.s32.totalorder %s206_s21, %s5613_s9  ;;  %p5622_p7 = scmp.lt.s32.totalorder %s5613_s9, %s5613_s9 }
  0x43   : > { %p5616_p3 = pnand %p5614_p2, %p5901_p1  ;;  %p5623_p9 = por %p5622_p7, %p5621_p6 }
  0x45   : > { %p5617_p5 = pneg %p5616_p3 }
  0x47   : > { %p5624_p12 = pnand %p5623_p9, %p5617_p5 }
  0x49   : > { %5627 = shalt.err (!%p5624_p12)
}
  0x4a   : > { %5355 = dma.hbm_to_vmem [thread:$0]  (!%p5889_p13), %s6778_s1, 1024, %s206_s21, [#allocation7], %s5772_s22, %s5772_s22, %s5773_s23  }
  0x4b   : > { %s5774_s14 = smov [#allocation11]   ;;  %s5628_s10 = scalar_lea.hbm %s6780_s3, 1024 }
  0x4c   : > { %s231_s18 = sshll.u32 %s5774_s14, 4  ;;  %p5629_p4 = scmp.ne.s32.totalorder %s6780_s3, %s5628_s10  ;;  %s232_s18 = int_to_ptr.vmem [resolvable:$true] %s231_s18 }
  0x4d   : > { %p5635_p11 = scmp.lt.u32.totalorder %s5628_s10, %s6780_s3 }
  0x4e   : > { %p5631_p8 = pnand %p5629_p4, %p5901_p1 }
  0x50   : > { %p5632_p10 = pneg %p5631_p8 }
  0x52   : > { %p5637_p0 = pnand %p5635_p11, %p5632_p10 }
  0x54   : > { %5640 = shalt.err (!%p5637_p0)
}
  0x55   : > { %s5641_s21 = scalar_lea.vmem %s232_s18, 1024  ;;  %p5649_p6 = scmp.lt.s32.totalorder %s232_s18, %s232_s18 }
  0x56   : > { %p5642_p2 = scmp.ne.s32.totalorder %s232_s18, %s5641_s21  ;;  %p5650_p7 = scmp.lt.s32.totalorder %s5641_s21, %s5641_s21 }
  0x58   : > { %p5644_p3 = pnand %p5642_p2, %p5901_p1  ;;  %p5651_p9 = por %p5650_p7, %p5649_p6 }
  0x5a   : > { %p5645_p5 = pneg %p5644_p3 }
  0x5c   : > { %p5652_p12 = pnand %p5651_p9, %p5645_p5 }
  0x5e   : > { %5655 = shalt.err (!%p5652_p12)
}
  0x5f   : > { %5361 = dma.hbm_to_vmem [thread:$0]  (!%p5889_p13), %s6780_s3, 1024, %s232_s18, [#allocation10], %s5772_s22, %s5772_s22, %s5773_s23  }
  0x60   : > { %p6804_p4 = scmp.ne.s32.totalorder %s6799_s15, 0 }
  0x61   : > { %p6805_p1 = scmp.ne.s32.totalorder (!%p6804_p4), %s6800_s16, 0 }
  0x62   : > { %256 = sbr.rel (%p6804_p4) target bundleno = 1124 (0x464), region = 44 }
  0x69   : > { %5733 = dma.done.wait (%p6805_p1), [#allocation7], 1024  }
  0x6a   : > { %5735 = vsyncadd (%p6805_p1), [#allocation7], 4294966272 }
  0x6b   : > { %5737 = dma.done.wait (%p6805_p1), [#allocation10], 4096  }
  0x6c   : > { %5739 = vsyncadd (%p6805_p1), [#allocation10], 4294963200  ;;  %s286_s19 = sand.u32 1, %s5752_s25   ;;  %s4375_s12 = sshll.u32 %s5760_s27, 13 }
  0x6d   : > { %s4144_s15 = sshll.u32 %s286_s19, 8  ;;  %s311_s28 = scalar_lea.hbm %s6777_s0, %s4375_s12 }
  0x6e   : > { %s5775_s14 = smov [#allocation2]   ;;  %s5656_s8 = scalar_lea.hbm %s311_s28, 8192 }
  0x6f   : > { %s4019_s18 = scalar_lea.vmem %s5775_s14, 1  ;;  %p5657_p13 = scmp.ne.s32.totalorder %s311_s28, %s5656_s8 }
  0x70   : > { %s323_s30 = sshll.u32 %s4019_s18, 4  ;;  %s5658_s17 = scalar_lea.hbm %s6777_s0, 16384  ;;  %s324_s30 = int_to_ptr.vmem [resolvable:$true] %s323_s30 }
  0x71   : > { %p5659_p8 = scmp.lt.u32.totalorder %s311_s28, %s6777_s0  ;;  %p5660_p10 = scmp.lt.u32.totalorder %s5658_s17, %s5656_s8 }
  0x72   : > { %p5662_p0 = scmp.lt.u32.totalorder %s5656_s8, %s311_s28 }
  0x73   : > { %p5661_p11 = por %p5660_p10, %p5659_p8 }
  0x75   : > { %p5663_p2 = por %p5662_p0, %p5661_p11 }
  0x77   : > { %p5664_p3 = pnand %p5663_p2, %p5657_p13 }
  0x79   : > { %5667 = shalt.err (!%p5664_p3)  }
  0x7a   : > { %s5668_s21 = scalar_lea.vmem %s324_s30, 8192  ;;  %s5670_s2 = sshll.u32 %s5775_s14, 4  ;;  %s5671_s2 = int_to_ptr.vmem [resolvable:$false] %s5670_s2 }
  0x7b   : > { %p5669_p5 = scmp.ne.s32.totalorder %s324_s30, %s5668_s21  ;;  %s5672_s26 = scalar_lea.vmem %s5671_s2, 16640 }
  0x7c   : > { %p5673_p6 = scmp.lt.s32.totalorder %s324_s30, %s5671_s2  ;;  %p5674_p7 = scmp.lt.s32.totalorder %s5672_s26, %s5668_s21 }
  0x7e   : > { %p5675_p9 = por %p5674_p7, %p5673_p6 }
  0x80   : > { %p5676_p12 = pnand %p5675_p9, %p5669_p5 }
  0x82   : > { %5679 = shalt.err (!%p5676_p12)  }
  0x83   : > { %326 = dma.hbm_to_vmem [thread:$0]  %s311_s28, 8192, %s324_s30, [#allocation4] }
  0x84   : > { %s5985_s12 = scalar_lea.vmem [#allocation12], %s4144_s15 }
  0x85   : > { %5740 = dma.done.wait [#allocation4], 8192 }
  0x86   : > { %5741 = vsyncadd [#allocation4], 4294959104  ;;  %v5776_v0 = vmov 0.0   ;;  %vm5777_vm0 = vmmov 0   ;;  %v5432_v1 = vld [vmem:[#allocation6] sm:$0xff]   ;;  %v5433_v2 = vld [vmem:[#allocation6 + $0x8] sm:$0xff]  }
  0x87   : > { %5014 = vmatprep.subr.bf16.mxu0 %v5776_v0  ;;  %5030 = vmatprep.mubr.msk.bf16.mxu0 %vm5777_vm0, %v5776_v0  ;;  %v5434_v3 = vld [vmem:[#allocation6 + $0x10] sm:$0xff]   ;;  %v5435_v4 = vld [vmem:[#allocation6 + $0x18] sm:$0xff]   ;;  %v5436_v5 = vld [vmem:[#allocation6 + $0x20] sm:$0xff]   ;;  %v5778_v35 = vmov 0   ;;  %vm1323_vm1 = vcmask 1040384   ;;  %vm1887_vm5 = vcmask 1046528  }
  0x88   : > { %5015 = vmatpush3.bf16.msra.mxu0 %v5432_v1  ;;  %v5437_v6 = vld [vmem:[#allocation6 + $0x28] sm:$0xff]   ;;  %v5438_v7 = vld [vmem:[#allocation6 + $0x30] sm:$0xff]   ;;  %v5439_v8 = vld [vmem:[#allocation6 + $0x38] sm:$0xff]   ;;  %2184 = vmatprep.subr.bf16.mxu1 %v5778_v35  ;;  %vm1324_vm2 = vsmask.f32 256  ;;  %s4510_s17 = sshll.u32 %s5760_s27, 12 }
  0x89   : > { %5016 = vmatprep.subr.bf16.mxu0 %v5776_v0  ;;  %v464_v9 = vld [vmem:[#allocation2] sm:$0xff]  ;;  %v465_v10 = vld [vmem:[#allocation2 + $0x8] sm:$0xff]  ;;  %v5440_v11 = vld [vmem:[#allocation9 + $0x80] sm:$0xff]   ;;  %vm1594_vm4 = vsmask.f32 7424  ;;  %s3941_s20 = sshll.u32 %s5985_s12, 4  ;;  %s6723_s2 = scalar_lea.hbm %s6784_s7, %s4510_s17  ;;  %s6725_s20 = int_to_ptr.vmem [resolvable:$true] %s3941_s20 }
  0x8a   : > { %v529_v12 = vpack.c.bf16 %v465_v10, %v464_v9  ;;  %v466_v13 = vld [vmem:[#allocation2 + $0x10] sm:$0xff]  ;;  %v467_v14 = vld [vmem:[#allocation2 + $0x18] sm:$0xff]  ;;  %v468_v16 = vld [vmem:[#allocation2 + $0x20] sm:$0xff]  ;;  %vm1329_vm6 = vsmask.f32 7938  ;;  %s6731_s27 = scalar_lea.sflag [#allocation8], %s286_s19 }
  0x8b   : > { %v530_v15 = vpack.c.bf16 %v467_v14, %v466_v13  ;;  %v469_v17 = vld [vmem:[#allocation2 + $0x28] sm:$0xff]  ;;  %v5441_v19 = vld [vmem:[#allocation9 + $0x88] sm:$0xff]   ;;  %v470_v20 = vld [vmem:[#allocation2 + $0x30] sm:$0xff]  ;;  %s5680_s26 = scalar_lea.vmem %s6725_s20, 4096  ;;  %p6808_p1 = scmp.ne.s32.totalorder %s6796_s11, 0 }
  0x8c   : > { %5017 = vmatpush3.bf16.msra.mxu0 %v5433_v2  ;;  %v531_v18 = vpack.c.bf16 %v469_v17, %v468_v16  ;;  %v471_v21 = vld [vmem:[#allocation2 + $0x38] sm:$0xff]  ;;  %v472_v23 = vld [vmem:[#allocation2 + $0x40] sm:$0xff]  ;;  %v473_v24 = vld [vmem:[#allocation2 + $0x48] sm:$0xff]  ;;  %p5681_p4 = scmp.ne.s32.totalorder %s6725_s20, %s5680_s26  ;;  %s5779_s15 = smov [#allocation12]  }
  0x8d   : > { %5018 = vmatprep.subr.bf16.mxu0 %v5776_v0  ;;  %v532_v22 = vpack.c.bf16 %v471_v21, %v470_v20  ;;  %v533_v25 = vpack.c.bf16 %v473_v24, %v472_v23  ;;  %v474_v26 = vld [vmem:[#allocation2 + $0x50] sm:$0xff]  ;;  %v475_v27 = vld [vmem:[#allocation2 + $0x58] sm:$0xff]  ;;  %v476_v29 = vld [vmem:[#allocation2 + $0x60] sm:$0xff]  ;;  %s5684_s22 = sshll.u32 %s5779_s15, 4  ;;  %s5685_s22 = int_to_ptr.vmem [resolvable:$false] %s5684_s22 }
  0x8e   : > { %v534_v28 = vpack.c.bf16 %v475_v27, %v474_v26  ;;  %v477_v30 = vld [vmem:[#allocation2 + $0x68] sm:$0xff]  ;;  %v478_v33 = vld [vmem:[#allocation2 + $0x70] sm:$0xff]  ;;  %v479_v34 = vld [vmem:[#allocation2 + $0x78] sm:$0xff]  ;;  %p5682_p13 = pnand %p5681_p4, %p6808_p1  ;;  %s5686_s23 = scalar_lea.vmem %s5685_s22, 8192 }
  0x8f   : > { %v535_v31 = vpack.c.bf16 %v477_v30, %v476_v29  ;;  %v5442_v32 = vld [vmem:[#allocation9 + $0x90] sm:$0xff]   ;;  %v536_v36 = vpack.c.bf16 %v479_v34, %v478_v33  ;;  %v5443_v37 = vld [vmem:[#allocation9] sm:$0xff]   ;;  %v5444_v38 = vld [vmem:[#allocation9 + $0x8] sm:$0xff]   ;;  %p5687_p10 = scmp.lt.s32.totalorder %s6725_s20, %s5685_s22  ;;  %p5688_p11 = scmp.lt.s32.totalorder %s5686_s23, %s5680_s26 }
  0x90   : > { %5019 = vmatpush3.bf16.msra.mxu0 %v5434_v3  ;;  %2185 = vmatpush1.bf16.msra.mxu1 %v5443_v37  ;;  %v480_v39 = vld [vmem:[#allocation2 + $0x80] sm:$0xff]  ;;  %v481_v40 = vld [vmem:[#allocation2 + $0x88] sm:$0xff]  ;;  %v482_v44 = vld [vmem:[#allocation2 + $0x90] sm:$0xff]  ;;  %p5683_p8 = pneg %p5682_p13 }
  0x91   : > { %5020 = vmatprep.subr.bf16.mxu0 %v5776_v0  ;;  %2186 = vmatprep.subr.bf16.mxu1 %v5778_v35  ;;  %v537_v41 = vpack.c.bf16 %v481_v40, %v480_v39  ;;  %v5445_v42 = vld [vmem:[#allocation9 + $0x10] sm:$0xff]   ;;  %v5446_v43 = vld [vmem:[#allocation9 + $0x18] sm:$0xff]   ;;  %v483_v45 = vld [vmem:[#allocation2 + $0x98] sm:$0xff]  ;;  %p5689_p0 = por %p5688_p11, %p5687_p10 }
  0x92   : > { %v538_v46 = vpack.c.bf16 %v483_v45, %v482_v44  ;;  %v5447_v47 = vld [vmem:[#allocation9 + $0x20] sm:$0xff]   ;;  %v5448_v48 = vld [vmem:[#allocation9 + $0x28] sm:$0xff]   ;;  %v485_v50 = vld [vmem:[#allocation2 + $0xa8] sm:$0xff] }
  0x93   : > { %v484_v49 = vld [vmem:[#allocation2 + $0xa0] sm:$0xff]  ;;  %v486_v53 = vld [vmem:[#allocation2 + $0xb0] sm:$0xff]  ;;  %v487_v54 = vld [vmem:[#allocation2 + $0xb8] sm:$0xff]  ;;  %p5690_p2 = pnand %p5689_p0, %p5683_p8 }
  0x94   : > { %5021 = vmatpush3.bf16.msra.mxu0 %v5435_v4  ;;  %2187 = vmatpush1.bf16.msra.mxu1 %v5444_v38  ;;  %v539_v51 = vpack.c.bf16 %v485_v50, %v484_v49  ;;  %v5449_v52 = vld [vmem:[#allocation9 + $0x30] sm:$0xff]   ;;  %v5450_v55 = vld [vmem:[#allocation9 + $0x38] sm:$0xff]   ;;  %v540_v56 = vpack.c.bf16 %v487_v54, %v486_v53  ;;  %v5452_v57 = vld [vmem:[#allocation9 + $0x40] sm:$0xff]  }
  0x95   : > { %5022 = vmatprep.subr.bf16.mxu0 %v5776_v0  ;;  %2188 = vmatprep.subr.bf16.mxu1 %v5778_v35  ;;  %v488_v58 = vld [vmem:[#allocation2 + $0xc0] sm:$0xff]  ;;  %v489_v59 = vld [vmem:[#allocation2 + $0xc8] sm:$0xff]  ;;  %v490_v63 = vld [vmem:[#allocation2 + $0xd0] sm:$0xff] }
  0x96   : > { %v5453_v60 = vld [vmem:[#allocation9 + $0x48] sm:$0xff]   ;;  %v541_v61 = vpack.c.bf16 %v489_v59, %v488_v58  ;;  %v5454_v62 = vld [vmem:[#allocation9 + $0x50] sm:$0xff]   ;;  %v5455_v2 = vld [vmem:[#allocation9 + $0x58] sm:$0xff]  }
  0x97   : > { %v491_v1 = vld [vmem:[#allocation2 + $0xd8] sm:$0xff]  ;;  %v5451_v4 = vld [vmem:[#allocation9 + $0x98] sm:$0xff]   ;;  %v5458_v10 = vld [vmem:[#allocation9 + $0x70] sm:$0xff]  }
  0x98   : > { %5023 = vmatpush3.bf16.msra.mxu0 %v5436_v5  ;;  %2189 = vmatpush1.bf16.msra.mxu1 %v5445_v42  ;;  %v542_v3 = vpack.c.bf16 %v491_v1, %v490_v63  ;;  %v5456_v5 = vld [vmem:[#allocation9 + $0x60] sm:$0xff]   ;;  %v5459_v13 = vld [vmem:[#allocation9 + $0x78] sm:$0xff]   ;;  %v496_v16 = vld [vmem:[#allocation2 + $0x100] sm:$0xff] }
  0x99   : > { %5024 = vmatprep.subr.bf16.mxu0 %v5776_v0  ;;  %2190 = vmatprep.subr.bf16.mxu1 %v5778_v35  ;;  %v497_v17 = vld [vmem:[#allocation2 + $0x108] sm:$0xff]  ;;  %v498_v21 = vld [vmem:[#allocation2 + $0x110] sm:$0xff]  ;;  %v503_v29 = vld [vmem:[#allocation2 + $0x138] sm:$0xff] }
  0x9a   : > { %v5465_v20 = vld [vmem:[#allocation9 + $0xb0] sm:$0xff]   ;;  %v5467_v23 = vld [vmem:[#allocation9 + $0xb8] sm:$0xff]   ;;  %v519_v54 = vld [vmem:[#allocation2 + $0x1b8] sm:$0xff] }
  0x9b   : > { %v501_v26 = vld [vmem:[#allocation2 + $0x128] sm:$0xff]  ;;  %v506_v34 = vld [vmem:[#allocation2 + $0x150] sm:$0xff]  ;;  %v508_v37 = vld [vmem:[#allocation2 + $0x160] sm:$0xff] }
  0x9c   : > { %5025 = vmatpush3.bf16.msra.mxu0 %v5437_v6  ;;  %2191 = vmatpush1.bf16.msra.mxu1 %v5446_v43  ;;  %v492_v6 = vld [vmem:[#allocation2 + $0xe0] sm:$0xff]  ;;  %v509_v38 = vld [vmem:[#allocation2 + $0x168] sm:$0xff]  ;;  %v510_v40 = vld [vmem:[#allocation2 + $0x170] sm:$0xff] }
  0x9d   : > { %5026 = vmatprep.subr.bf16.mxu0 %v5776_v0  ;;  %2192 = vmatprep.subr.bf16.mxu1 %v5778_v35  ;;  %v551_v39 = vpack.c.bf16 %v509_v38, %v508_v37  ;;  %v512_v43 = vld [vmem:[#allocation2 + $0x180] sm:$0xff]  ;;  %v513_v44 = vld [vmem:[#allocation2 + $0x188] sm:$0xff]  ;;  %v518_v53 = vld [vmem:[#allocation2 + $0x1b0] sm:$0xff] }
  0x9e   : > { %v553_v45 = vpack.c.bf16 %v513_v44, %v512_v43  ;;  %v516_v49 = vld [vmem:[#allocation2 + $0x1a0] sm:$0xff]  ;;  %v517_v50 = vld [vmem:[#allocation2 + $0x1a8] sm:$0xff]  ;;  %v556_v58 = vpack.c.bf16 %v519_v54, %v518_v53  ;;  %vm1325_vm3 = vmand %vm1323_vm1, %vm1324_vm2 }
  0x9f   : > { %v520_v1 = vld [vmem:[#allocation2 + $0x1c0] sm:$0xff]  ;;  %vm6275_vm7 = vmand %vm1323_vm1, %vm1329_vm6 }
  0xa0   : > { %5027 = vmatpush3.bf16.msra.mxu0 %v5438_v7  ;;  %2193 = vmatpush1.bf16.msra.mxu1 %v5447_v47  ;;  %v493_v7 = vld [vmem:[#allocation2 + $0xe8] sm:$0xff]  ;;  %v515_v47 = vld [vmem:[#allocation2 + $0x198] sm:$0xff] }
  0xa1   : > { %5028 = vmatprep.subr.bf16.mxu0 %v5776_v0  ;;  %2194 = vmatprep.subr.bf16.mxu1 %v5778_v35  ;;  %v543_v9 = vpack.c.bf16 %v493_v7, %v492_v6 }
  0xa4   : > { %5029 = vmatpush3.bf16.msra.mxu0 %v5439_v8  ;;  %2195 = vmatpush1.bf16.msra.mxu1 %v5448_v48  ;;  %v5457_v8 = vld [vmem:[#allocation9 + $0x68] sm:$0xff]  }
  0xa5   : > { %5162 = vmatprep.subr.bf16.mxu0 %v5440_v11  ;;  %2196 = vmatprep.subr.bf16.mxu1 %v5778_v35 }
  0xa7   : > { %5031 = vmatmul.mubr.bf16.vlgmr.msra.gmra.mrb[0].mxu0 %v529_v12  ;;  %v495_v12 = vld [vmem:[#allocation2 + $0xf8] sm:$0xff] }
  0xa8   : > { %5034 = vmatprep.mubr.msk.bf16.mxu0 %vm5777_vm0, %v5776_v0  ;;  %5163 = vmatpush3.bf16.msra.mxu0 %v5440_v11  ;;  %v494_v11 = vld [vmem:[#allocation2 + $0xf0] sm:$0xff] }
  0xa9   : > { %5164 = vmatprep.subr.bf16.mxu0 %v5441_v19  ;;  %2197 = vmatpush1.bf16.msra.mxu1 %v5449_v52  ;;  %v544_v14 = vpack.c.bf16 %v495_v12, %v494_v11  ;;  %v6068_v52 = vld [vmem:[%s6781_s4] ss:$0 sm:$0xff] }
  0xaa   : > { %2198 = vmatprep.subr.bf16.mxu1 %v5778_v35 }
  0xac   : > { %5165 = vmatpush3.bf16.msra.mxu0 %v5441_v19  ;;  %v545_v19 = vpack.c.bf16 %v497_v17, %v496_v16 }
  0xad   : > { %5166 = vmatprep.subr.bf16.mxu0 %v5442_v32  ;;  %2199 = vmatpush1.bf16.msra.mxu1 %v5450_v55 }
  0xae   : > { %2200 = vmatprep.subr.bf16.mxu1 %v5778_v35 }
  0xaf   : > { %5035 = vmatmul.mubr.bf16.gmra.mrb[4].mxu0 %v530_v15  ;;  %v5462_v15 = vld [vmem:[#allocation9 + $0xa0] sm:$0xff]  }
  0xb0   : > { %5038 = vmatprep.mubr.msk.bf16.mxu0 %vm5777_vm0, %v5776_v0  ;;  %5167 = vmatpush3.bf16.msra.mxu0 %v5442_v32  ;;  %v505_v32 = vld [vmem:[#allocation2 + $0x148] sm:$0xff] }
  0xb1   : > { %2201 = vmatpush1.bf16.msra.mxu1 %v5452_v57  ;;  %5168 = vmatprep.subr.bf16.mxu0 %v5451_v4 }
  0xb2   : > { %2202 = vmatprep.subr.bf16.mxu1 %v5778_v35 }
  0xb4   : > { %5169 = vmatpush3.bf16.msra.mxu0 %v5451_v4 }
  0xb5   : > { %2203 = vmatpush1.bf16.msra.mxu1 %v5453_v60  ;;  %5170 = vmatprep.subr.bf16.mxu0 %v5462_v15 }
  0xb6   : > { %2204 = vmatprep.subr.bf16.mxu1 %v5778_v35 }
  0xb7   : > { %5039 = vmatmul.mubr.bf16.gmra.mrb[8].mxu0 %v531_v18  ;;  %v5464_v18 = vld [vmem:[#allocation9 + $0xa8] sm:$0xff]  }
  0xb8   : > { %5042 = vmatprep.mubr.msk.bf16.mxu0 %vm5777_vm0, %v5776_v0  ;;  %5171 = vmatpush3.bf16.msra.mxu0 %v5462_v15 }
  0xb9   : > { %2205 = vmatpush1.bf16.msra.mxu1 %v5454_v62  ;;  %5172 = vmatprep.subr.bf16.mxu0 %v5464_v18 }
  0xba   : > { %2206 = vmatprep.subr.bf16.mxu1 %v5778_v35 }
  0xbc   : > { %5173 = vmatpush3.bf16.msra.mxu0 %v5464_v18 }
  0xbd   : > { %2207 = vmatpush1.bf16.msra.mxu1 %v5455_v2  ;;  %5174 = vmatprep.subr.bf16.mxu0 %v5465_v20  ;;  %v521_v2 = vld [vmem:[#allocation2 + $0x1c8] sm:$0xff] }
  0xbe   : > { %2208 = vmatprep.subr.bf16.mxu1 %v5778_v35  ;;  %v557_v7 = vpack.c.bf16 %v521_v2, %v520_v1 }
  0xbf   : > { %5043 = vmatmul.mubr.bf16.gmra.mrb[12].mxu0 %v532_v22  ;;  %v499_v22 = vld [vmem:[#allocation2 + $0x118] sm:$0xff] }
  0xc0   : > { %5046 = vmatprep.mubr.msk.bf16.mxu0 %vm5777_vm0, %v5776_v0  ;;  %5175 = vmatpush3.bf16.msra.mxu0 %v5465_v20  ;;  %v546_v24 = vpack.c.bf16 %v499_v22, %v498_v21  ;;  %v6082_v22 = vld [vmem:[#allocation11] sm:$0xff]  }
  0xc1   : > { %2209 = vmatpush1.bf16.msra.mxu1 %v5456_v5  ;;  %5176 = vmatprep.subr.bf16.mxu0 %v5467_v23 }
  0xc2   : > { %2210 = vmatprep.subr.bf16.mxu1 %v5778_v35 }
  0xc4   : > { %5177 = vmatpush3.bf16.msra.mxu0 %v5467_v23 }
  0xc5   : > { %2211 = vmatpush1.bf16.msra.mxu1 %v5457_v8  ;;  %5242 = vmatprep.subr.bf16.mxu0 %v6082_v22 }
  0xc6   : > { %2212 = vmatprep.subr.bf16.mxu1 %v5778_v35 }
  0xc7   : > { %5047 = vmatmul.mubr.bf16.gmra.mrb[16].mxu0 %v533_v25  ;;  %v500_v25 = vld [vmem:[#allocation2 + $0x120] sm:$0xff] }
  0xc8   : > { %5050 = vmatprep.mubr.msk.bf16.mxu0 %vm5777_vm0, %v5776_v0  ;;  %v547_v27 = vpack.c.bf16 %v501_v26, %v500_v25 }
  0xc9   : > { %2213 = vmatpush1.bf16.msra.mxu1 %v5458_v10 }
  0xca   : > { %2214 = vmatprep.subr.bf16.mxu1 %v5778_v35  ;;  %v507_v35 = vld [vmem:[#allocation2 + $0x158] sm:$0xff] }
  0xcd   : > { %2215 = vmatpush1.bf16.msra.mxu1 %v5459_v13  ;;  %v522_v13 = vld [vmem:[#allocation2 + $0x1d0] sm:$0xff] }
  0xce   : > { %5322 = vmatprep.subr.bf16.mxu1 %v6082_v22 }
  0xcf   : > { %5051 = vmatmul.mubr.bf16.gmra.mrb[20].mxu0 %v534_v28  ;;  %v502_v28 = vld [vmem:[#allocation2 + $0x130] sm:$0xff] }
  0xd0   : > { %5054 = vmatprep.mubr.msk.bf16.mxu0 %vm5777_vm0, %v5776_v0  ;;  %v548_v30 = vpack.c.bf16 %v503_v29, %v502_v28  ;;  %v524_v28 = vld [vmem:[#allocation2 + $0x1e0] sm:$0xff]  ;;  %v525_v29 = vld [vmem:[#allocation2 + $0x1e8] sm:$0xff] }
  0xd7   : > { %5055 = vmatmul.mubr.bf16.gmra.mrb[24].mxu0 %v535_v31  ;;  %v504_v31 = vld [vmem:[#allocation2 + $0x140] sm:$0xff] }
  0xd8   : > { %5058 = vmatprep.mubr.msk.bf16.mxu0 %vm5777_vm0, %v5776_v0  ;;  %v549_v33 = vpack.c.bf16 %v505_v32, %v504_v31 }
  0xdf   : > { %5059 = vmatmul.mubr.bf16.gmra.mrb[28].mxu0 %v536_v36  ;;  %v550_v36 = vpack.c.bf16 %v507_v35, %v506_v34  ;;  %v559_v35 = vpack.c.bf16 %v525_v29, %v524_v28 }
  0xe0   : > { %5062 = vmatprep.mubr.msk.bf16.mxu0 %vm5777_vm0, %v5776_v0 }
  0xe7   : > { %5063 = vmatmul.mubr.bf16.gmra.mrb[32].mxu0 %v537_v41  ;;  %v511_v41 = vld [vmem:[#allocation2 + $0x178] sm:$0xff] }
  0xe8   : > { %5066 = vmatprep.mubr.msk.bf16.mxu0 %vm5777_vm0, %v5776_v0  ;;  %v552_v42 = vpack.c.bf16 %v511_v41, %v510_v40 }
  0xef   : > { %5067 = vmatmul.mubr.bf16.gmra.mrb[36].mxu0 %v538_v46  ;;  %v514_v46 = vld [vmem:[#allocation2 + $0x190] sm:$0xff] }
  0xf0   : > { %5070 = vmatprep.mubr.msk.bf16.mxu0 %vm5777_vm0, %v5776_v0  ;;  %v554_v48 = vpack.c.bf16 %v515_v47, %v514_v46  ;;  %v526_v46 = vld [vmem:[#allocation2 + $0x1f0] sm:$0xff]  ;;  %v527_v47 = vld [vmem:[#allocation2 + $0x1f8] sm:$0xff] }
  0xf7   : > { %5071 = vmatmul.mubr.bf16.gmra.mrb[40].mxu0 %v539_v51  ;;  %v555_v51 = vpack.c.bf16 %v517_v50, %v516_v49 }
  0xf8   : > { %5074 = vmatprep.mubr.msk.bf16.mxu0 %vm5777_vm0, %v5776_v0 }
  0xff   : > { %5075 = vmatmul.mubr.bf16.gmra.mrb[44].mxu0 %v540_v56 }
 0x100   : > { %5078 = vmatprep.mubr.msk.bf16.mxu0 %vm5777_vm0, %v5776_v0 }
 0x107   : > { %5079 = vmatmul.mubr.bf16.gmra.mrb[48].mxu0 %v541_v61 }
 0x108   : > { %5082 = vmatprep.mubr.msk.bf16.mxu0 %vm5777_vm0, %v5776_v0 }
 0x10f   : > { %5083 = vmatmul.mubr.bf16.gmra.mrb[52].mxu0 %v542_v3 }
 0x110   : > { %5086 = vmatprep.mubr.msk.bf16.mxu0 %vm5777_vm0, %v5776_v0 }
 0x117   : > { %5087 = vmatmul.mubr.bf16.gmra.mrb[56].mxu0 %v543_v9 }
 0x118   : > { %5090 = vmatprep.mubr.msk.bf16.mxu0 %vm5777_vm0, %v5776_v0 }
 0x11f   : > { %5091 = vmatmul.mubr.bf16.gmra.mrb[60].mxu0 %v544_v14  ;;  %v523_v14 = vld [vmem:[#allocation2 + $0x1d8] sm:$0xff] }
 0x120   : > { %5094 = vmatprep.mubr.msk.bf16.mxu0 %vm5777_vm0, %v5776_v0  ;;  %v558_v21 = vpack.c.bf16 %v523_v14, %v522_v13 }
 0x127   : > { %5095 = vmatmul.mubr.bf16.gmra.mrb[64].mxu0 %v545_v19 }
 0x128   : > { %5098 = vmatprep.mubr.msk.bf16.mxu0 %vm5777_vm0, %v5776_v0 }
 0x12f   : > { %5099 = vmatmul.mubr.bf16.gmra.mrb[68].mxu0 %v546_v24 }
 0x130   : > { %5102 = vmatprep.mubr.msk.bf16.mxu0 %vm5777_vm0, %v5776_v0 }
 0x137   : > { %5103 = vmatmul.mubr.bf16.gmra.mrb[72].mxu0 %v547_v27 }
 0x138   : > { %5106 = vmatprep.mubr.msk.bf16.mxu0 %vm5777_vm0, %v5776_v0 }
 0x13f   : > { %5107 = vmatmul.mubr.bf16.gmra.mrb[76].mxu0 %v548_v30 }
 0x140   : > { %5110 = vmatprep.mubr.msk.bf16.mxu0 %vm5777_vm0, %v5776_v0 }
 0x147   : > { %5111 = vmatmul.mubr.bf16.gmra.mrb[80].mxu0 %v549_v33 }
 0x148   : > { %5114 = vmatprep.mubr.msk.bf16.mxu0 %vm5777_vm0, %v5776_v0 }
 0x14f   : > { %5115 = vmatmul.mubr.bf16.gmra.mrb[84].mxu0 %v550_v36 }
 0x150   : > { %5118 = vmatprep.mubr.msk.bf16.mxu0 %vm5777_vm0, %v5776_v0 }
 0x157   : > { %5119 = vmatmul.mubr.bf16.gmra.mrb[88].mxu0 %v551_v39 }
 0x158   : > { %5122 = vmatprep.mubr.msk.bf16.mxu0 %vm5777_vm0, %v5776_v0 }
 0x15f   : > { %5123 = vmatmul.mubr.bf16.gmra.mrb[92].mxu0 %v552_v42 }
 0x160   : > { %5126 = vmatprep.mubr.msk.bf16.mxu0 %vm5777_vm0, %v5776_v0 }
 0x167   : > { %5127 = vmatmul.mubr.bf16.gmra.mrb[96].mxu0 %v553_v45 }
 0x168   : > { %5130 = vmatprep.mubr.msk.bf16.mxu0 %vm5777_vm0, %v5776_v0 }
 0x16f   : > { %5131 = vmatmul.mubr.bf16.gmra.mrb[100].mxu0 %v554_v48 }
 0x170   : > { %5134 = vmatprep.mubr.msk.bf16.mxu0 %vm5777_vm0, %v5776_v0 }
 0x177   : > { %5135 = vmatmul.mubr.bf16.gmra.mrb[104].mxu0 %v555_v51 }
 0x178   : > { %5138 = vmatprep.mubr.msk.bf16.mxu0 %vm5777_vm0, %v5776_v0 }
 0x17a   : > { %v667_v55 = vpop.f32.mrb[0].mxu0 }
 0x17b   : > { %v668_v56 = vadd.f32 %v6068_v52, %v667_v55  ;;  %v5032_v57 = vpop.f32.mrb[1].mxu0 }
 0x17c   : > { %v670_v59 = vpop.f32.mrb[2].mxu0  ;;  %v560_v57 = vpack.c.bf16 %v527_v47, %v526_v46 }
 0x17d   : > { %v671_v60 = vadd.f32 %v6068_v52, %v670_v59  ;;  %v5033_v61 = vpop.f32.mrb[3].mxu0  ;;  %v929_v62 = vmax.f32 %v668_v56, 0.0 }
 0x17f   : > { %v930_v63 = vmax.f32 %v671_v60, 0.0  ;;  %5139 = vmatmul.mubr.bf16.gmra.mrb[108].mxu0 %v556_v58 }
 0x180   : > { %5142 = vmatprep.mubr.msk.bf16.mxu0 %vm5777_vm0, %v5776_v0 }
 0x181   : > { %v4514_v3 = vpack.c.bf16 %v930_v63, %v929_v62 }
 0x182   : > { %v675_v4 = vpop.f32.mrb[4].mxu0 }
 0x183   : > { %4515 = vst [vmem:[#allocation3] sm:$0xff] %v4514_v3   ;;  %v676_v5 = vadd.f32 %v6068_v52, %v675_v4  ;;  %v5036_v6 = vpop.f32.mrb[5].mxu0 }
 0x184   : > { %v678_v8 = vpop.f32.mrb[6].mxu0 }
 0x185   : > { %v679_v9 = vadd.f32 %v6068_v52, %v678_v8  ;;  %v5037_v10 = vpop.f32.mrb[7].mxu0  ;;  %v931_v11 = vmax.f32 %v676_v5, 0.0  ;;  %v528_v5 = vld [vmem:[#allocation2 + $0x200] sm:$0x3] }
 0x187   : > { %v932_v12 = vmax.f32 %v679_v9, 0.0  ;;  %5143 = vmatmul.mubr.bf16.gmra.mrb[112].mxu0 %v557_v7 }
 0x188   : > { %5146 = vmatprep.mubr.msk.bf16.mxu0 %vm5777_vm0, %v5776_v0 }
 0x189   : > { %v4519_v15 = vpack.c.bf16 %v932_v12, %v931_v11  ;;  %v561_v11 = vpack.c.bf16 %v528_v5, %v528_v5 }
 0x18a   : > { %v1326_v16 = vld [vmem:[#allocation3] sm:$0x1]  ;;  %v683_v17 = vpop.f32.mrb[8].mxu0 }
 0x18b   : > { %v1327_v18 = vsel %vm1325_vm3, 0, %v1326_v16  ;;  %4831 = vst [vmem:[#allocation3 + $0x8] sm:$0xff] %v4519_v15   ;;  %v684_v19 = vadd.f32 %v6068_v52, %v683_v17  ;;  %v5040_v20 = vpop.f32.mrb[9].mxu0 }
 0x18c   : > { %1328 = vst [vmem:[#allocation3] sm:$0x1] %v1327_v18  ;;  %v686_v23 = vpop.f32.mrb[10].mxu0 }
 0x18d   : > { %v687_v24 = vadd.f32 %v6068_v52, %v686_v23  ;;  %v5041_v25 = vpop.f32.mrb[11].mxu0  ;;  %v933_v26 = vmax.f32 %v684_v19, 0.0 }
 0x18f   : > { %v934_v27 = vmax.f32 %v687_v24, 0.0  ;;  %5147 = vmatmul.mubr.bf16.gmra.mrb[116].mxu0 %v558_v21 }
 0x190   : > { %5150 = vmatprep.mubr.msk.bf16.mxu0 %vm5777_vm0, %v5776_v0 }
 0x191   : > { %v4524_v30 = vpack.c.bf16 %v934_v27, %v933_v26 }
 0x192   : > { %v691_v31 = vpop.f32.mrb[12].mxu0  ;;  %v6089_v32 = vld [vmem:[#allocation3 + $0x8] sm:$0xff]  }
 0x193   : > { %4832 = vst [vmem:[#allocation3 + $0x10] sm:$0xff] %v4524_v30   ;;  %v692_v33 = vadd.f32 %v6068_v52, %v691_v31  ;;  %v5044_v34 = vpop.f32.mrb[13].mxu0  ;;  %v6092_v36 = vld [vmem:[#allocation3] sm:$0xff]   ;;  %v1603_v41 = vshll.u32 %v6089_v32, 16  ;;  %v1607_v59 = vshrl.u32 %v6089_v32, 16  ;;  %v1889_v13 = vrot.slane %v6089_v32, 1 }
 0x194   : > { %v694_v37 = vpop.f32.mrb[14].mxu0  ;;  %v1598_v40 = vshll.u32 %v6092_v36, 16  ;;  %v1596_v44 = vshrl.u32 %v6092_v36, 16  ;;  %v1888_v12 = vrot.slane %v6092_v36, 1 }
 0x195   : > { %v695_v38 = vadd.f32 %v6068_v52, %v694_v37  ;;  %v5045_v39 = vpop.f32.mrb[15].mxu0  ;;  %v935_v42 = vmax.f32 %v692_v33, 0.0  ;;  %v1605_v50 = vrot.slane %v1603_v41, 1 }
 0x196   : > { %v1600_v45 = vrot.slane %v1598_v40, 1  ;;  %v1890_v23 = vsel %vm1887_vm5, %v1888_v12, %v1889_v13 }
 0x197   : > { %v936_v43 = vmax.f32 %v695_v38, 0.0  ;;  %5151 = vmatmul.mubr.bf16.gmra.mrb[120].mxu0 %v559_v35  ;;  %v1609_v63 = vor.u32 %v1607_v59, %v1605_v50 }
 0x198   : > { %5154 = vmatprep.mubr.msk.bf16.mxu0 %vm5777_vm0, %v5776_v0  ;;  %v1601_v49 = vor.u32 %v1600_v45, %v1596_v44 }
 0x199   : > { %v4529_v48 = vpack.c.bf16 %v936_v43, %v935_v42 }
 0x19a   : > { %v699_v51 = vpop.f32.mrb[16].mxu0  ;;  %v6100_v53 = vld [vmem:[#allocation3 + $0x10] sm:$0xff]   ;;  %v1606_v56 = vsel %vm1594_vm4, %v1601_v49, %v1605_v50 }
 0x19b   : > { %4833 = vst [vmem:[#allocation3 + $0x18] sm:$0xff] %v4529_v48   ;;  %v700_v54 = vadd.f32 %v6068_v52, %v699_v51  ;;  %v5048_v55 = vpop.f32.mrb[17].mxu0  ;;  %2216 = vmatprep.mubr.bf16.mxu1 %v1606_v56  ;;  %v1611_v60 = vshll.u32 %v6100_v53, 16  ;;  %v1615_v15 = vshrl.u32 %v6100_v53, 16  ;;  %v1891_v26 = vrot.slane %v6100_v53, 1 }
 0x19c   : > { %v702_v58 = vpop.f32.mrb[18].mxu0  ;;  %2217 = vmatmul.mubr.bf16.vlgmr.msra.gmra.mrb[0].mxu1 %v6092_v36 }
 0x19d   : > { %v703_v61 = vadd.f32 %v6068_v52, %v702_v58  ;;  %v5049_v62 = vpop.f32.mrb[19].mxu0  ;;  %v1613_v1 = vrot.slane %v1611_v60, 1  ;;  %5330 = vmatpush3.bf16.msra.mxu1 %v6082_v22  ;;  %v937_v2 = vmax.f32 %v700_v54, 0.0  ;;  %v1892_v38 = vsel %vm1887_vm5, %v1889_v13, %v1891_v26 }
 0x19f   : > { %v938_v3 = vmax.f32 %v703_v61, 0.0  ;;  %5155 = vmatmul.mubr.bf16.gmra.mrb[124].mxu0 %v560_v57  ;;  %v1614_v4 = vsel %vm1594_vm4, %v1609_v63, %v1613_v1  ;;  %v1617_v18 = vor.u32 %v1615_v15, %v1613_v1 }
 0x1a0   : > { %5158 = vmatprep.mubr.msk.bf16.mxu0 %vm5777_vm0, %v5776_v0  ;;  %2224 = vmatprep.mubr.bf16.mxu1 %v1614_v4 }
 0x1a1   : > { %v4534_v6 = vpack.c.bf16 %v938_v3, %v937_v2 }
 0x1a2   : > { %v707_v7 = vpop.f32.mrb[20].mxu0  ;;  %v6112_v8 = vld [vmem:[#allocation3 + $0x18] sm:$0xff]  }
 0x1a3   : > { %4834 = vst [vmem:[#allocation3 + $0x20] sm:$0xff] %v4534_v6   ;;  %v708_v9 = vadd.f32 %v6068_v52, %v707_v7  ;;  %v5052_v10 = vpop.f32.mrb[21].mxu0  ;;  %v1619_v0 = vshll.u32 %v6112_v8, 16  ;;  %v1893_v31 = vrot.slane %v6112_v8, 1  ;;  %v1623_v34 = vshrl.u32 %v6112_v8, 16 }
 0x1a4   : > { %v710_v14 = vpop.f32.mrb[22].mxu0  ;;  %2225 = vmatmul.mubr.bf16.gmra.mrb[4].mxu1 %v6089_v32  ;;  %v5484_v32 = vld [vmem:[#allocation11 + $0x8] sm:$0xff]  }
 0x1a5   : > { %v711_v16 = vadd.f32 %v6068_v52, %v710_v14  ;;  %v5053_v17 = vpop.f32.mrb[23].mxu0  ;;  %v1621_v19 = vrot.slane %v1619_v0, 1  ;;  %v939_v20 = vmax.f32 %v708_v9, 0.0  ;;  %5323 = vmatprep.subr.bf16.mxu1 %v5484_v32  ;;  %v1894_v43 = vsel %vm1887_vm5, %v1891_v26, %v1893_v31 }
 0x1a6   : > { %5331 = vmatpush3.bf16.msra.mxu1 %v5484_v32 }
 0x1a7   : > { %v940_v21 = vmax.f32 %v711_v16, 0.0  ;;  %5159 = vmatmul.mubr.bf16.gmra.mrb[128].mxu0 %v561_v11  ;;  %v1622_v24 = vsel %vm1594_vm4, %v1617_v18, %v1621_v19  ;;  %v1625_v39 = vor.u32 %v1623_v34, %v1621_v19 }
 0x1a8   : > { %5178 = vmatprep.mubr.bf16.mxu0 %v1890_v23  ;;  %2232 = vmatprep.mubr.bf16.mxu1 %v1622_v24 }
 0x1a9   : > { %v4539_v25 = vpack.c.bf16 %v940_v21, %v939_v20 }
 0x1aa   : > { %v715_v27 = vpop.f32.mrb[24].mxu0  ;;  %v5468_v28 = vld [vmem:[#allocation3 + $0x20] sm:$0xff]  }
 0x1ab   : > { %4835 = vst [vmem:[#allocation3 + $0x28] sm:$0xff] %v4539_v25   ;;  %v716_v29 = vadd.f32 %v6068_v52, %v715_v27  ;;  %v5056_v30 = vpop.f32.mrb[25].mxu0  ;;  %v1627_v35 = vshll.u32 %v5468_v28, 16  ;;  %v1895_v46 = vrot.slane %v5468_v28, 1  ;;  %v1631_v54 = vshrl.u32 %v5468_v28, 16 }
 0x1ac   : > { %v718_v33 = vpop.f32.mrb[26].mxu0  ;;  %2233 = vmatmul.mubr.bf16.gmra.mrb[8].mxu1 %v6100_v53 }
 0x1ad   : > { %v719_v36 = vadd.f32 %v6068_v52, %v718_v33  ;;  %v5057_v37 = vpop.f32.mrb[27].mxu0  ;;  %v1629_v40 = vrot.slane %v1627_v35, 1  ;;  %v941_v41 = vmax.f32 %v716_v29, 0.0 }
 0x1af   : > { %v942_v42 = vmax.f32 %v719_v36, 0.0  ;;  %5179 = vmatmul.mubr.bf16.vlgmr.msra.gmra.mrb[132].mxu0 %v1892_v38  ;;  %v1630_v44 = vsel %vm1594_vm4, %v1625_v39, %v1629_v40  ;;  %v1633_v59 = vor.u32 %v1631_v54, %v1629_v40  ;;  %v5489_v40 = vld [vmem:[#allocation11 + $0x10] sm:$0xff]  }
 0x1b0   : > { %5182 = vmatprep.mubr.bf16.mxu0 %v1894_v43  ;;  %5243 = vmatpush3.bf16.msra.mxu0 %v6082_v22  ;;  %v1896_v22 = vsel %vm1887_vm5, %v1893_v31, %v1895_v46 }
 0x1b1   : > { %v4544_v45 = vpack.c.bf16 %v942_v42, %v941_v41  ;;  %2240 = vmatprep.mubr.bf16.mxu1 %v1630_v44  ;;  %5244 = vmatprep.subr.bf16.mxu0 %v5484_v32 }
 0x1b2   : > { %v723_v47 = vpop.f32.mrb[28].mxu0  ;;  %v5469_v48 = vld [vmem:[#allocation3 + $0x28] sm:$0xff]   ;;  %5324 = vmatprep.subr.bf16.mxu1 %v5489_v40 }
 0x1b3   : > { %4836 = vst [vmem:[#allocation3 + $0x30] sm:$0xff] %v4544_v45   ;;  %v724_v49 = vadd.f32 %v6068_v52, %v723_v47  ;;  %v5060_v50 = vpop.f32.mrb[29].mxu0  ;;  %v1897_v53 = vrot.slane %v5469_v48, 1  ;;  %v1635_v55 = vshll.u32 %v5469_v48, 16  ;;  %5332 = vmatpush3.bf16.msra.mxu1 %v5489_v40 }
 0x1b4   : > { %v726_v51 = vpop.f32.mrb[30].mxu0  ;;  %5245 = vmatpush3.bf16.msra.mxu0 %v5484_v32  ;;  %2241 = vmatmul.mubr.bf16.gmra.mrb[12].mxu1 %v6112_v8  ;;  %v1639_v8 = vshrl.u32 %v5469_v48, 16 }
 0x1b5   : > { %v727_v56 = vadd.f32 %v6068_v52, %v726_v51  ;;  %v5061_v57 = vpop.f32.mrb[31].mxu0  ;;  %v1898_v58 = vsel %vm1887_vm5, %v1895_v46, %v1897_v53  ;;  %v1637_v60 = vrot.slane %v1635_v55, 1  ;;  %v943_v61 = vmax.f32 %v724_v49, 0.0  ;;  %5246 = vmatprep.subr.bf16.mxu0 %v5489_v40 }
 0x1b7   : > { %v944_v62 = vmax.f32 %v727_v56, 0.0  ;;  %5183 = vmatmul.mubr.bf16.gmra.mrb[136].mxu0 %v1896_v22  ;;  %v1638_v63 = vsel %vm1594_vm4, %v1633_v59, %v1637_v60  ;;  %v1641_v13 = vor.u32 %v1639_v8, %v1637_v60 }
 0x1b8   : > { %5186 = vmatprep.mubr.bf16.mxu0 %v1898_v58  ;;  %2248 = vmatprep.mubr.bf16.mxu1 %v1638_v63 }
 0x1b9   : > { %v4549_v1 = vpack.c.bf16 %v944_v62, %v943_v61  ;;  %5247 = vmatpush3.bf16.msra.mxu0 %v5489_v40 }
 0x1ba   : > { %v731_v2 = vpop.f32.mrb[32].mxu0  ;;  %v5470_v3 = vld [vmem:[#allocation3 + $0x30] sm:$0xff]  }
 0x1bb   : > { %4837 = vst [vmem:[#allocation3 + $0x38] sm:$0xff] %v4549_v1   ;;  %v732_v4 = vadd.f32 %v6068_v52, %v731_v2  ;;  %v5064_v5 = vpop.f32.mrb[33].mxu0  ;;  %v1899_v7 = vrot.slane %v5470_v3, 1  ;;  %v1643_v9 = vshll.u32 %v5470_v3, 16  ;;  %v1647_v25 = vshrl.u32 %v5470_v3, 16 }
 0x1bc   : > { %v734_v6 = vpop.f32.mrb[34].mxu0  ;;  %2249 = vmatmul.mubr.bf16.gmra.mrb[16].mxu1 %v5468_v28 }
 0x1bd   : > { %v735_v10 = vadd.f32 %v6068_v52, %v734_v6  ;;  %v5065_v11 = vpop.f32.mrb[35].mxu0  ;;  %v1900_v12 = vsel %vm1887_vm5, %v1897_v53, %v1899_v7  ;;  %v1645_v14 = vrot.slane %v1643_v9, 1  ;;  %v945_v15 = vmax.f32 %v732_v4, 0.0 }
 0x1bf   : > { %v946_v0 = vmax.f32 %v735_v10, 0.0  ;;  %5187 = vmatmul.mubr.bf16.gmra.mrb[140].mxu0 %v1900_v12  ;;  %v1646_v16 = vsel %vm1594_vm4, %v1641_v13, %v1645_v14  ;;  %v1649_v30 = vor.u32 %v1647_v25, %v1645_v14 }
 0x1c0   : > { %2256 = vmatprep.mubr.bf16.mxu1 %v1646_v16 }
 0x1c1   : > { %v4554_v17 = vpack.c.bf16 %v946_v0, %v945_v15 }
 0x1c2   : > { %v739_v18 = vpop.f32.mrb[36].mxu0  ;;  %v5471_v19 = vld [vmem:[#allocation3 + $0x38] sm:$0xff]  }
 0x1c3   : > { %4838 = vst [vmem:[#allocation3 + $0x40] sm:$0xff] %v4554_v17   ;;  %v740_v20 = vadd.f32 %v6068_v52, %v739_v18  ;;  %v5068_v21 = vpop.f32.mrb[37].mxu0  ;;  %v1901_v24 = vrot.slane %v5471_v19, 1  ;;  %v1651_v26 = vshll.u32 %v5471_v19, 16  ;;  %v1655_v43 = vshrl.u32 %v5471_v19, 16 }
 0x1c4   : > { %v742_v23 = vpop.f32.mrb[38].mxu0  ;;  %2257 = vmatmul.mubr.bf16.gmra.mrb[20].mxu1 %v5469_v48 }
 0x1c5   : > { %v743_v27 = vadd.f32 %v6068_v52, %v742_v23  ;;  %v5069_v28 = vpop.f32.mrb[39].mxu0  ;;  %v1902_v29 = vsel %vm1887_vm5, %v1899_v7, %v1901_v24  ;;  %v1653_v31 = vrot.slane %v1651_v26, 1  ;;  %v947_v32 = vmax.f32 %v740_v20, 0.0 }
 0x1c6   : > { %5190 = vmatprep.mubr.bf16.mxu0 %v1902_v29 }
 0x1c7   : > { %v948_v33 = vmax.f32 %v743_v27, 0.0  ;;  %v1654_v34 = vsel %vm1594_vm4, %v1649_v30, %v1653_v31  ;;  %v1657_v48 = vor.u32 %v1655_v43, %v1653_v31 }
 0x1c8   : > { %2264 = vmatprep.mubr.bf16.mxu1 %v1654_v34 }
 0x1c9   : > { %v4559_v35 = vpack.c.bf16 %v948_v33, %v947_v32 }
 0x1ca   : > { %v747_v36 = vpop.f32.mrb[40].mxu0  ;;  %v5472_v37 = vld [vmem:[#allocation3 + $0x40] sm:$0xff]  }
 0x1cb   : > { %4839 = vst [vmem:[#allocation3 + $0x48] sm:$0xff] %v4559_v35   ;;  %v748_v38 = vadd.f32 %v6068_v52, %v747_v36  ;;  %v5072_v39 = vpop.f32.mrb[41].mxu0  ;;  %v1903_v42 = vrot.slane %v5472_v37, 1  ;;  %v1659_v44 = vshll.u32 %v5472_v37, 16  ;;  %v1663_v60 = vshrl.u32 %v5472_v37, 16 }
 0x1cc   : > { %v750_v41 = vpop.f32.mrb[42].mxu0  ;;  %2265 = vmatmul.mubr.bf16.gmra.mrb[24].mxu1 %v5470_v3 }
 0x1cd   : > { %v751_v45 = vadd.f32 %v6068_v52, %v750_v41  ;;  %v5073_v46 = vpop.f32.mrb[43].mxu0  ;;  %v1904_v47 = vsel %vm1887_vm5, %v1901_v24, %v1903_v42  ;;  %v1661_v49 = vrot.slane %v1659_v44, 1  ;;  %v949_v50 = vmax.f32 %v748_v38, 0.0 }
 0x1ce   : > { %5191 = vmatmul.mubr.bf16.gmra.mrb[144].mxu0 %v1904_v47  ;;  %v5494_v46 = vld [vmem:[#allocation11 + $0x18] sm:$0xff]  }
 0x1cf   : > { %v950_v51 = vmax.f32 %v751_v45, 0.0  ;;  %v1662_v53 = vsel %vm1594_vm4, %v1657_v48, %v1661_v49  ;;  %v1665_v2 = vor.u32 %v1663_v60, %v1661_v49  ;;  %5325 = vmatprep.subr.bf16.mxu1 %v5494_v46  ;;  %5248 = vmatprep.subr.bf16.mxu0 %v5494_v46 }
 0x1d0   : > { %2272 = vmatprep.mubr.bf16.mxu1 %v1662_v53  ;;  %5333 = vmatpush3.bf16.msra.mxu1 %v5494_v46 }
 0x1d1   : > { %v4564_v54 = vpack.c.bf16 %v950_v51, %v949_v50  ;;  %5249 = vmatpush3.bf16.msra.mxu0 %v5494_v46 }
 0x1d2   : > { %v755_v55 = vpop.f32.mrb[44].mxu0  ;;  %v5473_v56 = vld [vmem:[#allocation3 + $0x48] sm:$0xff]  }
 0x1d3   : > { %4840 = vst [vmem:[#allocation3 + $0x50] sm:$0xff] %v4564_v54   ;;  %v756_v57 = vadd.f32 %v6068_v52, %v755_v55  ;;  %v5076_v22 = vpop.f32.mrb[45].mxu0  ;;  %v1905_v59 = vrot.slane %v5473_v56, 1  ;;  %v1667_v61 = vshll.u32 %v5473_v56, 16  ;;  %v1671_v14 = vshrl.u32 %v5473_v56, 16 }
 0x1d4   : > { %v758_v58 = vpop.f32.mrb[46].mxu0  ;;  %2273 = vmatmul.mubr.bf16.gmra.mrb[28].mxu1 %v5471_v19 }
 0x1d5   : > { %v759_v62 = vadd.f32 %v6068_v52, %v758_v58  ;;  %v5077_v63 = vpop.f32.mrb[47].mxu0  ;;  %v1906_v1 = vsel %vm1887_vm5, %v1903_v42, %v1905_v59  ;;  %v1669_v3 = vrot.slane %v1667_v61, 1  ;;  %v951_v4 = vmax.f32 %v756_v57, 0.0 }
 0x1d6   : > { %5194 = vmatprep.mubr.bf16.mxu0 %v1906_v1 }
 0x1d7   : > { %v952_v5 = vmax.f32 %v759_v62, 0.0  ;;  %v1670_v6 = vsel %vm1594_vm4, %v1665_v2, %v1669_v3  ;;  %v1673_v18 = vor.u32 %v1671_v14, %v1669_v3 }
 0x1d8   : > { %2280 = vmatprep.mubr.bf16.mxu1 %v1670_v6 }
 0x1d9   : > { %v4569_v7 = vpack.c.bf16 %v952_v5, %v951_v4 }
 0x1da   : > { %v763_v8 = vpop.f32.mrb[48].mxu0  ;;  %v5474_v9 = vld [vmem:[#allocation3 + $0x50] sm:$0xff]  }
 0x1db   : > { %4841 = vst [vmem:[#allocation3 + $0x58] sm:$0xff] %v4569_v7   ;;  %v764_v10 = vadd.f32 %v6068_v52, %v763_v8  ;;  %v5080_v11 = vpop.f32.mrb[49].mxu0  ;;  %v1907_v13 = vrot.slane %v5474_v9, 1  ;;  %v1675_v15 = vshll.u32 %v5474_v9, 16  ;;  %v1679_v31 = vshrl.u32 %v5474_v9, 16 }
 0x1dc   : > { %v766_v12 = vpop.f32.mrb[50].mxu0  ;;  %2281 = vmatmul.mubr.bf16.gmra.mrb[32].mxu1 %v5472_v37 }
 0x1dd   : > { %v767_v0 = vadd.f32 %v6068_v52, %v766_v12  ;;  %v5081_v16 = vpop.f32.mrb[51].mxu0  ;;  %v1908_v17 = vsel %vm1887_vm5, %v1905_v59, %v1907_v13  ;;  %v1677_v19 = vrot.slane %v1675_v15, 1  ;;  %v953_v20 = vmax.f32 %v764_v10, 0.0 }
 0x1de   : > { %5195 = vmatmul.mubr.bf16.gmra.mrb[148].mxu0 %v1908_v17 }
 0x1df   : > { %v954_v21 = vmax.f32 %v767_v0, 0.0  ;;  %v1678_v23 = vsel %vm1594_vm4, %v1673_v18, %v1677_v19  ;;  %v1681_v36 = vor.u32 %v1679_v31, %v1677_v19 }
 0x1e0   : > { %2288 = vmatprep.mubr.bf16.mxu1 %v1678_v23 }
 0x1e1   : > { %v4574_v24 = vpack.c.bf16 %v954_v21, %v953_v20 }
 0x1e2   : > { %v771_v25 = vpop.f32.mrb[52].mxu0  ;;  %v5475_v26 = vld [vmem:[#allocation3 + $0x58] sm:$0xff]  }
 0x1e3   : > { %4842 = vst [vmem:[#allocation3 + $0x60] sm:$0xff] %v4574_v24   ;;  %v772_v27 = vadd.f32 %v6068_v52, %v771_v25  ;;  %v5084_v28 = vpop.f32.mrb[53].mxu0  ;;  %v1909_v30 = vrot.slane %v5475_v26, 1  ;;  %v1683_v32 = vshll.u32 %v5475_v26, 16  ;;  %v1687_v49 = vshrl.u32 %v5475_v26, 16 }
 0x1e4   : > { %v774_v29 = vpop.f32.mrb[54].mxu0  ;;  %2289 = vmatmul.mubr.bf16.gmra.mrb[36].mxu1 %v5473_v56 }
 0x1e5   : > { %v775_v33 = vadd.f32 %v6068_v52, %v774_v29  ;;  %v5085_v34 = vpop.f32.mrb[55].mxu0  ;;  %v1910_v35 = vsel %vm1887_vm5, %v1907_v13, %v1909_v30  ;;  %v1685_v37 = vrot.slane %v1683_v32, 1  ;;  %v955_v38 = vmax.f32 %v772_v27, 0.0 }
 0x1e6   : > { %5198 = vmatprep.mubr.bf16.mxu0 %v1910_v35 }
 0x1e7   : > { %v956_v39 = vmax.f32 %v775_v33, 0.0  ;;  %v1686_v40 = vsel %vm1594_vm4, %v1681_v36, %v1685_v37  ;;  %v1689_v55 = vor.u32 %v1687_v49, %v1685_v37 }
 0x1e8   : > { %2296 = vmatprep.mubr.bf16.mxu1 %v1686_v40 }
 0x1e9   : > { %v4579_v41 = vpack.c.bf16 %v956_v39, %v955_v38 }
 0x1ea   : > { %v779_v42 = vpop.f32.mrb[56].mxu0  ;;  %v5476_v43 = vld [vmem:[#allocation3 + $0x60] sm:$0xff]  }
 0x1eb   : > { %4843 = vst [vmem:[#allocation3 + $0x68] sm:$0xff] %v4579_v41   ;;  %v780_v44 = vadd.f32 %v6068_v52, %v779_v42  ;;  %v5088_v45 = vpop.f32.mrb[57].mxu0  ;;  %v1911_v48 = vrot.slane %v5476_v43, 1  ;;  %v1691_v50 = vshll.u32 %v5476_v43, 16  ;;  %v1695_v3 = vshrl.u32 %v5476_v43, 16 }
 0x1ec   : > { %v782_v47 = vpop.f32.mrb[58].mxu0  ;;  %2297 = vmatmul.mubr.bf16.gmra.mrb[40].mxu1 %v5474_v9 }
 0x1ed   : > { %v783_v51 = vadd.f32 %v6068_v52, %v782_v47  ;;  %v5089_v53 = vpop.f32.mrb[59].mxu0  ;;  %v1912_v54 = vsel %vm1887_vm5, %v1909_v30, %v1911_v48  ;;  %v1693_v56 = vrot.slane %v1691_v50, 1  ;;  %v957_v57 = vmax.f32 %v780_v44, 0.0 }
 0x1ee   : > { %5199 = vmatmul.mubr.bf16.gmra.mrb[152].mxu0 %v1912_v54  ;;  %v5499_v53 = vld [vmem:[#allocation11 + $0x20] sm:$0xff]  }
 0x1ef   : > { %v958_v22 = vmax.f32 %v783_v51, 0.0  ;;  %v1694_v58 = vsel %vm1594_vm4, %v1689_v55, %v1693_v56  ;;  %v1697_v8 = vor.u32 %v1695_v3, %v1693_v56  ;;  %5326 = vmatprep.subr.bf16.mxu1 %v5499_v53  ;;  %5250 = vmatprep.subr.bf16.mxu0 %v5499_v53 }
 0x1f0   : > { %2304 = vmatprep.mubr.bf16.mxu1 %v1694_v58  ;;  %5334 = vmatpush3.bf16.msra.mxu1 %v5499_v53 }
 0x1f1   : > { %v4584_v59 = vpack.c.bf16 %v958_v22, %v957_v57  ;;  %5251 = vmatpush3.bf16.msra.mxu0 %v5499_v53 }
 0x1f2   : > { %v787_v60 = vpop.f32.mrb[60].mxu0  ;;  %v5477_v61 = vld [vmem:[#allocation3 + $0x68] sm:$0xff]  }
 0x1f3   : > { %4844 = vst [vmem:[#allocation3 + $0x70] sm:$0xff] %v4584_v59   ;;  %v788_v62 = vadd.f32 %v6068_v52, %v787_v60  ;;  %v5092_v63 = vpop.f32.mrb[61].mxu0  ;;  %v1913_v2 = vrot.slane %v5477_v61, 1  ;;  %v1699_v4 = vshll.u32 %v5477_v61, 16  ;;  %v1703_v19 = vshrl.u32 %v5477_v61, 16 }
 0x1f4   : > { %v790_v1 = vpop.f32.mrb[62].mxu0  ;;  %2305 = vmatmul.mubr.bf16.gmra.mrb[44].mxu1 %v5475_v26 }
 0x1f5   : > { %v791_v5 = vadd.f32 %v6068_v52, %v790_v1  ;;  %v5093_v6 = vpop.f32.mrb[63].mxu0  ;;  %v1914_v7 = vsel %vm1887_vm5, %v1911_v48, %v1913_v2  ;;  %v1701_v9 = vrot.slane %v1699_v4, 1  ;;  %v959_v10 = vmax.f32 %v788_v62, 0.0 }
 0x1f6   : > { %5202 = vmatprep.mubr.bf16.mxu0 %v1914_v7  ;;  %v5501_v7 = vld [vmem:[#allocation11 + $0x28] sm:$0xff]  }
 0x1f7   : > { %v960_v11 = vmax.f32 %v791_v5, 0.0  ;;  %v1702_v12 = vsel %vm1594_vm4, %v1697_v8, %v1701_v9  ;;  %v1705_v25 = vor.u32 %v1703_v19, %v1701_v9  ;;  %5252 = vmatprep.subr.bf16.mxu0 %v5501_v7  ;;  %5327 = vmatprep.subr.bf16.mxu1 %v5501_v7 }
 0x1f8   : > { %2312 = vmatprep.mubr.bf16.mxu1 %v1702_v12  ;;  %5253 = vmatpush3.bf16.msra.mxu0 %v5501_v7 }
 0x1f9   : > { %v4589_v13 = vpack.c.bf16 %v960_v11, %v959_v10  ;;  %5335 = vmatpush3.bf16.msra.mxu1 %v5501_v7 }
 0x1fa   : > { %v795_v14 = vpop.f32.mrb[64].mxu0  ;;  %v5478_v15 = vld [vmem:[#allocation3 + $0x70] sm:$0xff]  }
 0x1fb   : > { %4845 = vst [vmem:[#allocation3 + $0x78] sm:$0xff] %v4589_v13   ;;  %v796_v0 = vadd.f32 %v6068_v52, %v795_v14  ;;  %v5096_v16 = vpop.f32.mrb[65].mxu0  ;;  %v1915_v18 = vrot.slane %v5478_v15, 1  ;;  %v1707_v20 = vshll.u32 %v5478_v15, 16  ;;  %v1711_v37 = vshrl.u32 %v5478_v15, 16 }
 0x1fc   : > { %v798_v17 = vpop.f32.mrb[66].mxu0  ;;  %2313 = vmatmul.mubr.bf16.gmra.mrb[48].mxu1 %v5476_v43  ;;  %v5503_v16 = vld [vmem:[#allocation11 + $0x30] sm:$0xff]  }
 0x1fd   : > { %v799_v21 = vadd.f32 %v6068_v52, %v798_v17  ;;  %v5097_v23 = vpop.f32.mrb[67].mxu0  ;;  %v1916_v24 = vsel %vm1887_vm5, %v1913_v2, %v1915_v18  ;;  %v1709_v26 = vrot.slane %v1707_v20, 1  ;;  %v961_v27 = vmax.f32 %v796_v0, 0.0  ;;  %5254 = vmatprep.subr.bf16.mxu0 %v5503_v16  ;;  %5328 = vmatprep.subr.bf16.mxu1 %v5503_v16 }
 0x1fe   : > { %5203 = vmatmul.mubr.bf16.gmra.mrb[156].mxu0 %v1916_v24  ;;  %5336 = vmatpush3.bf16.msra.mxu1 %v5503_v16 }
 0x1ff   : > { %v962_v28 = vmax.f32 %v799_v21, 0.0  ;;  %v1710_v29 = vsel %vm1594_vm4, %v1705_v25, %v1709_v26  ;;  %v1713_v42 = vor.u32 %v1711_v37, %v1709_v26  ;;  %5255 = vmatpush3.bf16.msra.mxu0 %v5503_v16  ;;  %v5504_v26 = vld [vmem:[#allocation11 + $0x38] sm:$0xff]  }
 0x200   : > { %2320 = vmatprep.mubr.bf16.mxu1 %v1710_v29  ;;  %5256 = vmatprep.subr.bf16.mxu0 %v5504_v26 }
 0x201   : > { %v4594_v30 = vpack.c.bf16 %v962_v28, %v961_v27  ;;  %5329 = vmatprep.subr.bf16.mxu1 %v5504_v26 }
 0x202   : > { %v803_v31 = vpop.f32.mrb[68].mxu0  ;;  %v5480_v32 = vld [vmem:[#allocation3 + $0x78] sm:$0xff]   ;;  %5337 = vmatpush3.bf16.msra.mxu1 %v5504_v26 }
 0x203   : > { %4846 = vst [vmem:[#allocation3 + $0x80] sm:$0xff] %v4594_v30   ;;  %v804_v33 = vadd.f32 %v6068_v52, %v803_v31  ;;  %v5100_v34 = vpop.f32.mrb[69].mxu0  ;;  %v1917_v36 = vrot.slane %v5480_v32, 1  ;;  %v1715_v38 = vshll.u32 %v5480_v32, 16  ;;  %v1719_v56 = vshrl.u32 %v5480_v32, 16  ;;  %5257 = vmatpush3.bf16.msra.mxu0 %v5504_v26 }
 0x204   : > { %v806_v35 = vpop.f32.mrb[70].mxu0  ;;  %2321 = vmatmul.mubr.bf16.gmra.mrb[52].mxu1 %v5477_v61 }
 0x205   : > { %v807_v39 = vadd.f32 %v6068_v52, %v806_v35  ;;  %v5101_v40 = vpop.f32.mrb[71].mxu0  ;;  %v1918_v41 = vsel %vm1887_vm5, %v1915_v18, %v1917_v36  ;;  %v1717_v43 = vrot.slane %v1715_v38, 1  ;;  %v963_v44 = vmax.f32 %v804_v33, 0.0 }
 0x206   : > { %5206 = vmatprep.mubr.bf16.mxu0 %v1918_v41  ;;  %v6205_v41 = vld [vmem:[%s6781_s4] ss:$0 sm:$0xff] }
 0x207   : > { %v964_v45 = vmax.f32 %v807_v39, 0.0  ;;  %v1718_v46 = vsel %vm1594_vm4, %v1713_v42, %v1717_v43  ;;  %v1721_v60 = vor.u32 %v1719_v56, %v1717_v43 }
 0x208   : > { %2328 = vmatprep.mubr.bf16.mxu1 %v1718_v46 }
 0x209   : > { %v4599_v47 = vpack.c.bf16 %v964_v45, %v963_v44 }
 0x20a   : > { %v811_v48 = vpop.f32.mrb[72].mxu0  ;;  %v6179_v49 = vld [vmem:[#allocation3 + $0x80] sm:$0xff]  }
 0x20b   : > { %4847 = vst [vmem:[#allocation3 + $0x88] sm:$0xff] %v4599_v47   ;;  %v812_v50 = vadd.f32 %v6068_v52, %v811_v48  ;;  %v5104_v51 = vpop.f32.mrb[73].mxu0  ;;  %v1919_v55 = vrot.slane %v6179_v49, 1  ;;  %v1723_v57 = vshll.u32 %v6179_v49, 16  ;;  %v1727_v10 = vshrl.u32 %v6179_v49, 16 }
 0x20c   : > { %v814_v54 = vpop.f32.mrb[74].mxu0  ;;  %2329 = vmatmul.mubr.bf16.gmra.mrb[56].mxu1 %v5478_v15 }
 0x20d   : > { %v815_v22 = vadd.f32 %v6068_v52, %v814_v54  ;;  %v5105_v58 = vpop.f32.mrb[75].mxu0  ;;  %v1920_v59 = vsel %vm1887_vm5, %v1917_v36, %v1919_v55  ;;  %v1725_v61 = vrot.slane %v1723_v57, 1  ;;  %v965_v62 = vmax.f32 %v812_v50, 0.0 }
 0x20e   : > { %5207 = vmatmul.mubr.bf16.gmra.mrb[160].mxu0 %v1920_v59 }
 0x20f   : > { %v966_v63 = vmax.f32 %v815_v22, 0.0  ;;  %v1726_v1 = vsel %vm1594_vm4, %v1721_v60, %v1725_v61  ;;  %v1729_v15 = vor.u32 %v1727_v10, %v1725_v61 }
 0x210   : > { %2336 = vmatprep.mubr.bf16.mxu1 %v1726_v1 }
 0x211   : > { %v4604_v2 = vpack.c.bf16 %v966_v63, %v965_v62 }
 0x212   : > { %v819_v3 = vpop.f32.mrb[76].mxu0  ;;  %v6187_v4 = vld [vmem:[#allocation3 + $0x88] sm:$0xff]  }
 0x213   : > { %4848 = vst [vmem:[#allocation3 + $0x90] sm:$0xff] %v4604_v2   ;;  %v820_v5 = vadd.f32 %v6068_v52, %v819_v3  ;;  %v5108_v6 = vpop.f32.mrb[77].mxu0  ;;  %v1921_v9 = vrot.slane %v6187_v4, 1  ;;  %v1731_v11 = vshll.u32 %v6187_v4, 16  ;;  %v1735_v29 = vshrl.u32 %v6187_v4, 16 }
 0x214   : > { %v822_v8 = vpop.f32.mrb[78].mxu0  ;;  %2337 = vmatmul.mubr.bf16.gmra.mrb[60].mxu1 %v5480_v32 }
 0x215   : > { %v823_v12 = vadd.f32 %v6068_v52, %v822_v8  ;;  %v5109_v13 = vpop.f32.mrb[79].mxu0  ;;  %v1922_v14 = vsel %vm1887_vm5, %v1919_v55, %v1921_v9  ;;  %v1733_v0 = vrot.slane %v1731_v11, 1  ;;  %v967_v17 = vmax.f32 %v820_v5, 0.0 }
 0x216   : > { %5210 = vmatprep.mubr.bf16.mxu0 %v1922_v14 }
 0x217   : > { %v968_v18 = vmax.f32 %v823_v12, 0.0  ;;  %v1734_v19 = vsel %vm1594_vm4, %v1729_v15, %v1733_v0  ;;  %v1737_v34 = vor.u32 %v1735_v29, %v1733_v0 }
 0x218   : > { %2344 = vmatprep.mubr.bf16.mxu1 %v1734_v19 }
 0x219   : > { %v4609_v20 = vpack.c.bf16 %v968_v18, %v967_v17 }
 0x21a   : > { %v827_v21 = vpop.f32.mrb[80].mxu0  ;;  %v5483_v23 = vld [vmem:[#allocation3 + $0x90] sm:$0xff]  }
 0x21b   : > { %4849 = vst [vmem:[#allocation3 + $0x98] sm:$0xff] %v4609_v20   ;;  %v828_v24 = vadd.f32 %v6068_v52, %v827_v21  ;;  %v5112_v25 = vpop.f32.mrb[81].mxu0  ;;  %v1923_v28 = vrot.slane %v5483_v23, 1  ;;  %v1739_v30 = vshll.u32 %v5483_v23, 16  ;;  %v1743_v46 = vshrl.u32 %v5483_v23, 16 }
 0x21c   : > { %v830_v27 = vpop.f32.mrb[82].mxu0  ;;  %2345 = vmatmul.mubr.bf16.gmra.mrb[64].mxu1 %v6179_v49 }
 0x21d   : > { %v831_v31 = vadd.f32 %v6068_v52, %v830_v27  ;;  %v5113_v32 = vpop.f32.mrb[83].mxu0  ;;  %v1924_v33 = vsel %vm1887_vm5, %v1921_v9, %v1923_v28  ;;  %v1741_v35 = vrot.slane %v1739_v30, 1  ;;  %v969_v36 = vmax.f32 %v828_v24, 0.0 }
 0x21e   : > { %5211 = vmatmul.mubr.bf16.gmra.mrb[164].mxu0 %v1924_v33 }
 0x21f   : > { %v970_v37 = vmax.f32 %v831_v31, 0.0  ;;  %v1742_v38 = vsel %vm1594_vm4, %v1737_v34, %v1741_v35  ;;  %v1745_v51 = vor.u32 %v1743_v46, %v1741_v35 }
 0x220   : > { %2352 = vmatprep.mubr.bf16.mxu1 %v1742_v38 }
 0x221   : > { %v4614_v39 = vpack.c.bf16 %v970_v37, %v969_v36 }
 0x222   : > { %v835_v40 = vpop.f32.mrb[84].mxu0  ;;  %v5485_v52 = vld [vmem:[#allocation3 + $0x98] sm:$0xff]  }
 0x223   : > { %4850 = vst [vmem:[#allocation3 + $0xa0] sm:$0xff] %v4614_v39   ;;  %v836_v42 = vadd.f32 %v6205_v41, %v835_v40  ;;  %v5116_v43 = vpop.f32.mrb[85].mxu0  ;;  %v1925_v45 = vrot.slane %v5485_v52, 1  ;;  %v1747_v47 = vshll.u32 %v5485_v52, 16  ;;  %v1751_v63 = vshrl.u32 %v5485_v52, 16 }
 0x224   : > { %v838_v44 = vpop.f32.mrb[86].mxu0  ;;  %2353 = vmatmul.mubr.bf16.gmra.mrb[68].mxu1 %v6187_v4 }
 0x225   : > { %v839_v48 = vadd.f32 %v6205_v41, %v838_v44  ;;  %v5117_v49 = vpop.f32.mrb[87].mxu0  ;;  %v1926_v50 = vsel %vm1887_vm5, %v1923_v28, %v1925_v45  ;;  %v1749_v53 = vrot.slane %v1747_v47, 1  ;;  %v971_v54 = vmax.f32 %v836_v42, 0.0 }
 0x226   : > { %5214 = vmatprep.mubr.bf16.mxu0 %v1926_v50 }
 0x227   : > { %v972_v55 = vmax.f32 %v839_v48, 0.0  ;;  %v1750_v56 = vsel %vm1594_vm4, %v1745_v51, %v1749_v53  ;;  %v1753_v5 = vor.u32 %v1751_v63, %v1749_v53 }
 0x228   : > { %2360 = vmatprep.mubr.bf16.mxu1 %v1750_v56 }
 0x229   : > { %v4619_v57 = vpack.c.bf16 %v972_v55, %v971_v54 }
 0x22a   : > { %v843_v22 = vpop.f32.mrb[88].mxu0  ;;  %v5486_v58 = vld [vmem:[#allocation3 + $0xa0] sm:$0xff]  }
 0x22b   : > { %4851 = vst [vmem:[#allocation3 + $0xa8] sm:$0xff] %v4619_v57   ;;  %v844_v59 = vadd.f32 %v6205_v41, %v843_v22  ;;  %v5120_v60 = vpop.f32.mrb[89].mxu0  ;;  %v1927_v62 = vrot.slane %v5486_v58, 1  ;;  %v1755_v1 = vshll.u32 %v5486_v58, 16  ;;  %v1759_v16 = vshrl.u32 %v5486_v58, 16 }
 0x22c   : > { %v846_v61 = vpop.f32.mrb[90].mxu0  ;;  %2361 = vmatmul.mubr.bf16.gmra.mrb[72].mxu1 %v5483_v23 }
 0x22d   : > { %v847_v2 = vadd.f32 %v6205_v41, %v846_v61  ;;  %v5121_v3 = vpop.f32.mrb[91].mxu0  ;;  %v1928_v4 = vsel %vm1887_vm5, %v1925_v45, %v1927_v62  ;;  %v1757_v6 = vrot.slane %v1755_v1, 1  ;;  %v973_v7 = vmax.f32 %v844_v59, 0.0 }
 0x22e   : > { %5215 = vmatmul.mubr.bf16.gmra.mrb[168].mxu0 %v1928_v4 }
 0x22f   : > { %v974_v8 = vmax.f32 %v847_v2, 0.0  ;;  %v1758_v9 = vsel %vm1594_vm4, %v1753_v5, %v1757_v6  ;;  %v1761_v21 = vor.u32 %v1759_v16, %v1757_v6 }
 0x230   : > { %2368 = vmatprep.mubr.bf16.mxu1 %v1758_v9 }
 0x231   : > { %v4624_v10 = vpack.c.bf16 %v974_v8, %v973_v7 }
 0x232   : > { %v851_v11 = vpop.f32.mrb[92].mxu0  ;;  %v5487_v12 = vld [vmem:[#allocation3 + $0xa8] sm:$0xff]  }
 0x233   : > { %4852 = vst [vmem:[#allocation3 + $0xb0] sm:$0xff] %v4624_v10   ;;  %v852_v13 = vadd.f32 %v6205_v41, %v851_v11  ;;  %v5124_v14 = vpop.f32.mrb[93].mxu0  ;;  %v1929_v0 = vrot.slane %v5487_v12, 1  ;;  %v1763_v17 = vshll.u32 %v5487_v12, 16  ;;  %v1767_v34 = vshrl.u32 %v5487_v12, 16 }
 0x234   : > { %v854_v15 = vpop.f32.mrb[94].mxu0  ;;  %2369 = vmatmul.mubr.bf16.gmra.mrb[76].mxu1 %v5485_v52 }
 0x235   : > { %v855_v18 = vadd.f32 %v6205_v41, %v854_v15  ;;  %v5125_v19 = vpop.f32.mrb[95].mxu0  ;;  %v1930_v20 = vsel %vm1887_vm5, %v1927_v62, %v1929_v0  ;;  %v1765_v23 = vrot.slane %v1763_v17, 1  ;;  %v975_v24 = vmax.f32 %v852_v13, 0.0 }
 0x236   : > { %5218 = vmatprep.mubr.bf16.mxu0 %v1930_v20 }
 0x237   : > { %v976_v25 = vmax.f32 %v855_v18, 0.0  ;;  %v1766_v26 = vsel %vm1594_vm4, %v1761_v21, %v1765_v23  ;;  %v1769_v39 = vor.u32 %v1767_v34, %v1765_v23 }
 0x238   : > { %2376 = vmatprep.mubr.bf16.mxu1 %v1766_v26 }
 0x239   : > { %v4629_v27 = vpack.c.bf16 %v976_v25, %v975_v24 }
 0x23a   : > { %v859_v28 = vpop.f32.mrb[96].mxu0  ;;  %v5488_v29 = vld [vmem:[#allocation3 + $0xb0] sm:$0xff]  }
 0x23b   : > { %4853 = vst [vmem:[#allocation3 + $0xb8] sm:$0xff] %v4629_v27   ;;  %v860_v30 = vadd.f32 %v6205_v41, %v859_v28  ;;  %v5128_v31 = vpop.f32.mrb[97].mxu0  ;;  %v1931_v33 = vrot.slane %v5488_v29, 1  ;;  %v1771_v35 = vshll.u32 %v5488_v29, 16  ;;  %v1775_v51 = vshrl.u32 %v5488_v29, 16 }
 0x23c   : > { %v862_v32 = vpop.f32.mrb[98].mxu0  ;;  %2377 = vmatmul.mubr.bf16.gmra.mrb[80].mxu1 %v5486_v58 }
 0x23d   : > { %v863_v36 = vadd.f32 %v6205_v41, %v862_v32  ;;  %v5129_v37 = vpop.f32.mrb[99].mxu0  ;;  %v1932_v38 = vsel %vm1887_vm5, %v1929_v0, %v1931_v33  ;;  %v1773_v40 = vrot.slane %v1771_v35, 1  ;;  %v977_v52 = vmax.f32 %v860_v30, 0.0 }
 0x23e   : > { %5219 = vmatmul.mubr.bf16.gmra.mrb[172].mxu0 %v1932_v38 }
 0x23f   : > { %v978_v42 = vmax.f32 %v863_v36, 0.0  ;;  %v1774_v43 = vsel %vm1594_vm4, %v1769_v39, %v1773_v40  ;;  %v1777_v57 = vor.u32 %v1775_v51, %v1773_v40 }
 0x240   : > { %2384 = vmatprep.mubr.bf16.mxu1 %v1774_v43 }
 0x241   : > { %v4634_v44 = vpack.c.bf16 %v978_v42, %v977_v52 }
 0x242   : > { %v867_v45 = vpop.f32.mrb[100].mxu0  ;;  %v5490_v46 = vld [vmem:[#allocation3 + $0xb8] sm:$0xff]  }
 0x243   : > { %4854 = vst [vmem:[#allocation3 + $0xc0] sm:$0xff] %v4634_v44   ;;  %v868_v47 = vadd.f32 %v6205_v41, %v867_v45  ;;  %v5132_v48 = vpop.f32.mrb[101].mxu0  ;;  %v1933_v50 = vrot.slane %v5490_v46, 1  ;;  %v1779_v53 = vshll.u32 %v5490_v46, 16  ;;  %v1783_v5 = vshrl.u32 %v5490_v46, 16 }
 0x244   : > { %v870_v49 = vpop.f32.mrb[102].mxu0  ;;  %2385 = vmatmul.mubr.bf16.gmra.mrb[84].mxu1 %v5487_v12 }
 0x245   : > { %v871_v54 = vadd.f32 %v6205_v41, %v870_v49  ;;  %v5133_v55 = vpop.f32.mrb[103].mxu0  ;;  %v1934_v56 = vsel %vm1887_vm5, %v1931_v33, %v1933_v50  ;;  %v1781_v22 = vrot.slane %v1779_v53, 1  ;;  %v979_v58 = vmax.f32 %v868_v47, 0.0 }
 0x246   : > { %5222 = vmatprep.mubr.bf16.mxu0 %v1934_v56 }
 0x247   : > { %v980_v59 = vmax.f32 %v871_v54, 0.0  ;;  %v1782_v60 = vsel %vm1594_vm4, %v1777_v57, %v1781_v22  ;;  %v1785_v10 = vor.u32 %v1783_v5, %v1781_v22 }
 0x248   : > { %2392 = vmatprep.mubr.bf16.mxu1 %v1782_v60 }
 0x249   : > { %v4639_v61 = vpack.c.bf16 %v980_v59, %v979_v58 }
 0x24a   : > { %v875_v62 = vpop.f32.mrb[104].mxu0  ;;  %v5491_v63 = vld [vmem:[#allocation3 + $0xc0] sm:$0xff]  }
 0x24b   : > { %4855 = vst [vmem:[#allocation3 + $0xc8] sm:$0xff] %v4639_v61   ;;  %v876_v1 = vadd.f32 %v6205_v41, %v875_v62  ;;  %v5136_v2 = vpop.f32.mrb[105].mxu0  ;;  %v1935_v4 = vrot.slane %v5491_v63, 1  ;;  %v1787_v6 = vshll.u32 %v5491_v63, 16  ;;  %v1791_v21 = vshrl.u32 %v5491_v63, 16 }
 0x24c   : > { %v878_v3 = vpop.f32.mrb[106].mxu0  ;;  %2393 = vmatmul.mubr.bf16.gmra.mrb[88].mxu1 %v5488_v29 }
 0x24d   : > { %v879_v7 = vadd.f32 %v6205_v41, %v878_v3  ;;  %v5137_v8 = vpop.f32.mrb[107].mxu0  ;;  %v1936_v9 = vsel %vm1887_vm5, %v1933_v50, %v1935_v4  ;;  %v1789_v11 = vrot.slane %v1787_v6, 1  ;;  %v981_v12 = vmax.f32 %v876_v1, 0.0 }
 0x24e   : > { %5223 = vmatmul.mubr.bf16.gmra.mrb[176].mxu0 %v1936_v9 }
 0x24f   : > { %v982_v13 = vmax.f32 %v879_v7, 0.0  ;;  %v1790_v14 = vsel %vm1594_vm4, %v1785_v10, %v1789_v11  ;;  %v1793_v27 = vor.u32 %v1791_v21, %v1789_v11 }
 0x250   : > { %2400 = vmatprep.mubr.bf16.mxu1 %v1790_v14 }
 0x251   : > { %v4644_v15 = vpack.c.bf16 %v982_v13, %v981_v12 }
 0x252   : > { %v883_v0 = vpop.f32.mrb[108].mxu0  ;;  %v5492_v16 = vld [vmem:[#allocation3 + $0xc8] sm:$0xff]  }
 0x253   : > { %4856 = vst [vmem:[#allocation3 + $0xd0] sm:$0xff] %v4644_v15   ;;  %v884_v17 = vadd.f32 %v6205_v41, %v883_v0  ;;  %v5140_v18 = vpop.f32.mrb[109].mxu0  ;;  %v1937_v20 = vrot.slane %v5492_v16, 1  ;;  %v1795_v23 = vshll.u32 %v5492_v16, 16  ;;  %v1799_v39 = vshrl.u32 %v5492_v16, 16 }
 0x254   : > { %v886_v19 = vpop.f32.mrb[110].mxu0  ;;  %2401 = vmatmul.mubr.bf16.gmra.mrb[92].mxu1 %v5490_v46 }
 0x255   : > { %v887_v24 = vadd.f32 %v6205_v41, %v886_v19  ;;  %v5141_v25 = vpop.f32.mrb[111].mxu0  ;;  %v1938_v26 = vsel %vm1887_vm5, %v1935_v4, %v1937_v20  ;;  %v1797_v28 = vrot.slane %v1795_v23, 1  ;;  %v983_v29 = vmax.f32 %v884_v17, 0.0 }
 0x256   : > { %5226 = vmatprep.mubr.bf16.mxu0 %v1938_v26 }
 0x257   : > { %v984_v30 = vmax.f32 %v887_v24, 0.0  ;;  %v1798_v31 = vsel %vm1594_vm4, %v1793_v27, %v1797_v28  ;;  %v1801_v44 = vor.u32 %v1799_v39, %v1797_v28 }
 0x258   : > { %2408 = vmatprep.mubr.bf16.mxu1 %v1798_v31 }
 0x259   : > { %v4649_v32 = vpack.c.bf16 %v984_v30, %v983_v29 }
 0x25a   : > { %v891_v33 = vpop.f32.mrb[112].mxu0  ;;  %v5493_v34 = vld [vmem:[#allocation3 + $0xd0] sm:$0xff]  }
 0x25b   : > { %4857 = vst [vmem:[#allocation3 + $0xd8] sm:$0xff] %v4649_v32   ;;  %v892_v35 = vadd.f32 %v6205_v41, %v891_v33  ;;  %v5144_v36 = vpop.f32.mrb[113].mxu0  ;;  %v1939_v38 = vrot.slane %v5493_v34, 1  ;;  %v1803_v40 = vshll.u32 %v5493_v34, 16  ;;  %v1807_v57 = vshrl.u32 %v5493_v34, 16 }
 0x25c   : > { %v894_v37 = vpop.f32.mrb[114].mxu0  ;;  %2409 = vmatmul.mubr.bf16.gmra.mrb[96].mxu1 %v5491_v63 }
 0x25d   : > { %v895_v52 = vadd.f32 %v6205_v41, %v894_v37  ;;  %v5145_v42 = vpop.f32.mrb[115].mxu0  ;;  %v1940_v43 = vsel %vm1887_vm5, %v1937_v20, %v1939_v38  ;;  %v1805_v45 = vrot.slane %v1803_v40, 1  ;;  %v985_v46 = vmax.f32 %v892_v35, 0.0 }
 0x25e   : > { %5227 = vmatmul.mubr.bf16.gmra.mrb[180].mxu0 %v1940_v43 }
 0x25f   : > { %v986_v47 = vmax.f32 %v895_v52, 0.0  ;;  %v1806_v48 = vsel %vm1594_vm4, %v1801_v44, %v1805_v45  ;;  %v1809_v61 = vor.u32 %v1807_v57, %v1805_v45  ;;  %v6260_v57 = vld [vmem:[%s6782_s5] ss:$0 sm:$0xff] }
 0x260   : > { %2416 = vmatprep.mubr.bf16.mxu1 %v1806_v48 }
 0x261   : > { %v4654_v49 = vpack.c.bf16 %v986_v47, %v985_v46 }
 0x262   : > { %v899_v50 = vpop.f32.mrb[116].mxu0  ;;  %v5495_v51 = vld [vmem:[#allocation3 + $0xd8] sm:$0xff]  }
 0x263   : > { %4858 = vst [vmem:[#allocation3 + $0xe0] sm:$0xff] %v4654_v49   ;;  %v900_v53 = vadd.f32 %v6205_v41, %v899_v50  ;;  %v5148_v54 = vpop.f32.mrb[117].mxu0  ;;  %v1941_v56 = vrot.slane %v5495_v51, 1  ;;  %v1811_v22 = vshll.u32 %v5495_v51, 16  ;;  %v1815_v10 = vshrl.u32 %v5495_v51, 16 }
 0x264   : > { %v902_v55 = vpop.f32.mrb[118].mxu0  ;;  %2417 = vmatmul.mubr.bf16.gmra.mrb[100].mxu1 %v5492_v16 }
 0x265   : > { %v903_v58 = vadd.f32 %v6205_v41, %v902_v55  ;;  %v5149_v59 = vpop.f32.mrb[119].mxu0  ;;  %v1942_v60 = vsel %vm1887_vm5, %v1939_v38, %v1941_v56  ;;  %v1813_v62 = vrot.slane %v1811_v22, 1  ;;  %v987_v63 = vmax.f32 %v900_v53, 0.0 }
 0x266   : > { %5230 = vmatprep.mubr.bf16.mxu0 %v1942_v60 }
 0x267   : > { %v988_v1 = vmax.f32 %v903_v58, 0.0  ;;  %v1814_v2 = vsel %vm1594_vm4, %v1809_v61, %v1813_v62  ;;  %v1817_v15 = vor.u32 %v1815_v10, %v1813_v62 }
 0x268   : > { %2424 = vmatprep.mubr.bf16.mxu1 %v1814_v2 }
 0x269   : > { %v4659_v3 = vpack.c.bf16 %v988_v1, %v987_v63 }
 0x26a   : > { %v907_v4 = vpop.f32.mrb[120].mxu0  ;;  %v5496_v5 = vld [vmem:[#allocation3 + $0xe0] sm:$0xff]  }
 0x26b   : > { %4859 = vst [vmem:[#allocation3 + $0xe8] sm:$0xff] %v4659_v3   ;;  %v908_v6 = vadd.f32 %v6205_v41, %v907_v4  ;;  %v5152_v7 = vpop.f32.mrb[121].mxu0  ;;  %v1943_v9 = vrot.slane %v5496_v5, 1  ;;  %v1819_v11 = vshll.u32 %v5496_v5, 16  ;;  %v1823_v30 = vshrl.u32 %v5496_v5, 16 }
 0x26c   : > { %v910_v8 = vpop.f32.mrb[122].mxu0  ;;  %2425 = vmatmul.mubr.bf16.gmra.mrb[104].mxu1 %v5493_v34 }
 0x26d   : > { %v911_v12 = vadd.f32 %v6205_v41, %v910_v8  ;;  %v5153_v13 = vpop.f32.mrb[123].mxu0  ;;  %v1944_v14 = vsel %vm1887_vm5, %v1941_v56, %v1943_v9  ;;  %v1821_v0 = vrot.slane %v1819_v11, 1  ;;  %v989_v16 = vmax.f32 %v908_v6, 0.0 }
 0x26e   : > { %5231 = vmatmul.mubr.bf16.gmra.mrb[184].mxu0 %v1944_v14 }
 0x26f   : > { %v990_v17 = vmax.f32 %v911_v12, 0.0  ;;  %v2218_v18 = vpop.f32.mrb[0].mxu1  ;;  %v1822_v19 = vsel %vm1594_vm4, %v1817_v15, %v1821_v0  ;;  %v1825_v35 = vor.u32 %v1823_v30, %v1821_v0 }
 0x270   : > { %v2220_v21 = vpop.f32.mrb[1].mxu1  ;;  %2432 = vmatprep.mubr.bf16.mxu1 %v1822_v19  ;;  %v2219_v1 = vadd.f32 %v6260_v57, %v2218_v18 }
 0x271   : > { %v4664_v20 = vpack.c.bf16 %v990_v17, %v989_v16  ;;  %v2221_v24 = vpop.f32.mrb[2].mxu1 }
 0x272   : > { %v915_v23 = vpop.f32.mrb[124].mxu0  ;;  %v2223_v27 = vpop.f32.mrb[3].mxu1  ;;  %v5497_v28 = vld [vmem:[#allocation3 + $0xe8] sm:$0xff]  }
 0x273   : > { %4860 = vst [vmem:[#allocation3 + $0xf0] sm:$0xff] %v4664_v20   ;;  %v916_v25 = vadd.f32 %v6205_v41, %v915_v23  ;;  %v5156_v26 = vpop.f32.mrb[125].mxu0  ;;  %v1945_v33 = vrot.slane %v5497_v28, 1  ;;  %v1827_v34 = vshll.u32 %v5497_v28, 16  ;;  %v1831_v55 = vshrl.u32 %v5497_v28, 16 }
 0x274   : > { %v918_v29 = vpop.f32.mrb[126].mxu0  ;;  %2433 = vmatmul.mubr.bf16.gmra.mrb[108].mxu1 %v5495_v51 }
 0x275   : > { %v919_v31 = vadd.f32 %v6205_v41, %v918_v29  ;;  %v5157_v32 = vpop.f32.mrb[127].mxu0  ;;  %v991_v36 = vmax.f32 %v916_v25, 0.0  ;;  %v1946_v38 = vsel %vm1887_vm5, %v1943_v9, %v1945_v33  ;;  %v1829_v39 = vrot.slane %v1827_v34, 1 }
 0x276   : > { %5234 = vmatprep.mubr.bf16.mxu0 %v1946_v38  ;;  %v2222_v9 = vadd.f32 %v6260_v57, %v2221_v24 }
 0x277   : > { %v992_v37 = vmax.f32 %v919_v31, 0.0  ;;  %v2226_v40 = vpop.f32.mrb[4].mxu1  ;;  %v1830_v43 = vsel %vm1594_vm4, %v1825_v35, %v1829_v39  ;;  %v1833_v58 = vor.u32 %v1831_v55, %v1829_v39 }
 0x278   : > { %v2228_v42 = vpop.f32.mrb[5].mxu1  ;;  %2440 = vmatprep.mubr.bf16.mxu1 %v1830_v43  ;;  %v2227_v61 = vadd.f32 %v6260_v57, %v2226_v40 }
 0x279   : > { %v4669_v52 = vpack.c.bf16 %v992_v37, %v991_v36  ;;  %v2229_v45 = vpop.f32.mrb[6].mxu1 }
 0x27a   : > { %v923_v44 = vpop.f32.mrb[128].mxu0  ;;  %v2231_v48 = vpop.f32.mrb[7].mxu1  ;;  %v6253_v49 = vld [vmem:[#allocation3 + $0xf0] sm:$0xff]   ;;  %v2230_v4 = vadd.f32 %v6260_v57, %v2229_v45 }
 0x27b   : > { %4861 = vst [vmem:[#allocation3 + $0xf8] sm:$0xff] %v4669_v52   ;;  %v924_v46 = vadd.f32 %v6205_v41, %v923_v44  ;;  %v5160_v47 = vpop.f32.mrb[129].mxu0  ;;  %v1947_v54 = vrot.slane %v6253_v49, 1  ;;  %v1835_v56 = vshll.u32 %v6253_v49, 16  ;;  %v1839_v12 = vshrl.u32 %v6253_v49, 16 }
 0x27c   : > { %v926_v50 = vpop.f32.mrb[130].mxu0  ;;  %2441 = vmatmul.mubr.bf16.gmra.mrb[112].mxu1 %v5496_v5 }
 0x27d   : > { %v993_v51 = vmax.f32 %v924_v46, 0.0  ;;  %v5161_v53 = vpop.f32.mrb[131].mxu0  ;;  %v1948_v41 = vsel %vm1887_vm5, %v1945_v33, %v1947_v54  ;;  %v1837_v59 = vrot.slane %v1835_v56, 1 }
 0x27e   : > { %5235 = vmatmul.mubr.bf16.gmra.mrb[188].mxu0 %v1948_v41 }
 0x27f   : > { %v4445_v22 = vpack.c.bf16 %v993_v51, %v993_v51  ;;  %v2234_v60 = vpop.f32.mrb[8].mxu1  ;;  %v1838_v63 = vsel %vm1594_vm4, %v1833_v58, %v1837_v59  ;;  %v1841_v18 = vor.u32 %v1839_v12, %v1837_v59 }
 0x280   : > { %v2236_v62 = vpop.f32.mrb[9].mxu1  ;;  %2448 = vmatprep.mubr.bf16.mxu1 %v1838_v63  ;;  %v2235_v33 = vadd.f32 %v6260_v57, %v2234_v60 }
 0x281   : > { %1319 = vst [vmem:[#allocation3 + $0x100] sm:$0x1] %v4445_v22  ;;  %v2237_v3 = vpop.f32.mrb[10].mxu1 }
 0x282   : > { %v5180_v2 = vpop.f32.mrb[132].mxu0  ;;  %v2239_v7 = vpop.f32.mrb[11].mxu1  ;;  %v6267_v8 = vld [vmem:[#allocation3 + $0xf8] sm:$0xff]   ;;  %v2238_v52 = vadd.f32 %v6260_v57, %v2237_v3 }
 0x283   : > { %v2516_v5 = vadd.f32 %v5180_v2, %v2227_v61  ;;  %v2507_v6 = vpop.f32.mrb[133].mxu0  ;;  %v1949_v15 = vrot.slane %v6267_v8, 1  ;;  %v1843_v0 = vshll.u32 %v6267_v8, 16 }
 0x284   : > { %v2508_v10 = vadd.f32 %v2507_v6, %v2219_v1  ;;  %v5181_v11 = vpop.f32.mrb[134].mxu0  ;;  %2449 = vmatmul.mubr.bf16.gmra.mrb[116].mxu1 %v5497_v28 }
 0x285   : > { %v2519_v13 = vadd.f32 %v5181_v11, %v2230_v4  ;;  %v2510_v14 = vpop.f32.mrb[135].mxu0  ;;  %v2764_v19 = vmax.f32 %v2516_v5, 0.0  ;;  %v1950_v21 = vsel %vm1887_vm5, %v1947_v54, %v1949_v15  ;;  %v1845_v23 = vrot.slane %v1843_v0, 1 }
 0x286   : > { %v2511_v17 = vadd.f32 %v2510_v14, %v2222_v9  ;;  %v2762_v25 = vmax.f32 %v2508_v10, 0.0  ;;  %5238 = vmatprep.mubr.bf16.mxu0 %v1950_v21 }
 0x287   : > { %v2765_v20 = vmax.f32 %v2519_v13, 0.0  ;;  %v2242_v27 = vpop.f32.mrb[12].mxu1  ;;  %v1846_v32 = vsel %vm1594_vm4, %v1841_v18, %v1845_v23 }
 0x288   : > { %v1331_v24 = vld [vmem:[#allocation3 + $0x100] sm:$0x1]  ;;  %v2763_v26 = vmax.f32 %v2511_v17, 0.0  ;;  %v2243_v30 = vadd.f32 %v6260_v57, %v2242_v27  ;;  %v2244_v31 = vpop.f32.mrb[13].mxu1  ;;  %2456 = vmatprep.mubr.bf16.mxu1 %v1846_v32 }
 0x289   : > { %v1332_v28 = vsel %vm6275_vm7, 0, %v1331_v24  ;;  %v6282_v29 = vpack.c.bf16 %v2765_v20, %v2764_v19  ;;  %v2245_v36 = vpop.f32.mrb[14].mxu1 }
 0x28a   : > { %1333 = vst [vmem:[#allocation3 + $0x100] sm:$0x1] %v1332_v28  ;;  %v2826_v34 = vpack.c.bf16 %v2763_v26, %v2762_v25  ;;  %v5184_v35 = vpop.f32.mrb[136].mxu0  ;;  %v2246_v38 = vadd.f32 %v6260_v57, %v2245_v36  ;;  %v2247_v40 = vpop.f32.mrb[15].mxu1 }
 0x28b   : > { %v2532_v37 = vadd.f32 %v5184_v35, %v2243_v30  ;;  %v2523_v39 = vpop.f32.mrb[137].mxu0 }
 0x28c   : > { %v2524_v42 = vadd.f32 %v2523_v39, %v2235_v33  ;;  %v5185_v43 = vpop.f32.mrb[138].mxu0  ;;  %2457 = vmatmul.mubr.bf16.gmra.mrb[120].mxu1 %v6253_v49  ;;  %v1847_v49 = vshrl.u32 %v6267_v8, 16 }
 0x28d   : > { %v2535_v44 = vadd.f32 %v5185_v43, %v2246_v38  ;;  %v2526_v45 = vpop.f32.mrb[139].mxu0  ;;  %v2768_v47 = vmax.f32 %v2532_v37, 0.0 }
 0x28e   : > { %v2527_v46 = vadd.f32 %v2526_v45, %v2238_v52  ;;  %v2766_v50 = vmax.f32 %v2524_v42, 0.0  ;;  %v1849_v6 = vor.u32 %v1847_v49, %v1845_v23 }
 0x28f   : > { %v2769_v48 = vmax.f32 %v2535_v44, 0.0  ;;  %v2250_v53 = vpop.f32.mrb[16].mxu1 }
 0x290   : > { %v2767_v51 = vmax.f32 %v2527_v46, 0.0  ;;  %v2251_v55 = vadd.f32 %v6260_v57, %v2250_v53  ;;  %v2252_v56 = vpop.f32.mrb[17].mxu1 }
 0x291   : > { %v2829_v54 = vpack.c.bf16 %v2769_v48, %v2768_v47  ;;  %v5502_v22 = vld [vmem:[#allocation3 + $0x100] ss:$0 sps:$4 sm:$0x11]   ;;  %v2253_v58 = vpop.f32.mrb[18].mxu1 }
 0x292   : > { %v2828_v41 = vpack.c.bf16 %v2767_v51, %v2766_v50  ;;  %v5188_v59 = vpop.f32.mrb[140].mxu0  ;;  %v2254_v60 = vadd.f32 %v6260_v57, %v2253_v58  ;;  %v2255_v61 = vpop.f32.mrb[19].mxu1  ;;  %v1951_v63 = vrot.slane %v5502_v22, 1  ;;  %v1851_v1 = vshll.u32 %v5502_v22, 16 }
 0x293   : > { %v2539_v62 = vpop.f32.mrb[141].mxu0 }
 0x294   : > { %v2540_v2 = vadd.f32 %v2539_v62, %v2251_v55  ;;  %v5189_v3 = vpop.f32.mrb[142].mxu0  ;;  %v1952_v5 = vsel %vm1887_vm5, %v1949_v15, %v1951_v63  ;;  %v1853_v7 = vrot.slane %v1851_v1, 1 }
 0x295   : > { %v2542_v4 = vpop.f32.mrb[143].mxu0  ;;  %5239 = vmatmul.mubr.bf16.gmra.mrb[192].mxu0 %v1952_v5 }
 0x296   : > { %v2543_v9 = vadd.f32 %v2542_v4, %v2254_v60  ;;  %5258 = vmatprep.mubr.bf16.mxu0 %v2826_v34  ;;  %v1854_v10 = vsel %vm1594_vm4, %v1849_v6, %v1853_v7  ;;  %v2770_v11 = vmax.f32 %v2540_v2, 0.0 }
 0x297   : > { %v2258_v13 = vpop.f32.mrb[20].mxu1  ;;  %2464 = vmatprep.mubr.bf16.mxu1 %v1854_v10 }
 0x298   : > { %v2771_v12 = vmax.f32 %v2543_v9, 0.0  ;;  %v2259_v14 = vadd.f32 %v6260_v57, %v2258_v13  ;;  %v2260_v0 = vpop.f32.mrb[21].mxu1  ;;  %2465 = vmatmul.mubr.bf16.gmra.mrb[124].mxu1 %v6267_v8 }
 0x299   : > { %v2261_v17 = vpop.f32.mrb[22].mxu1  ;;  %5262 = vmatprep.mubr.bf16.mxu1 %v2828_v41 }
 0x29a   : > { %v2830_v16 = vpack.c.bf16 %v2771_v12, %v2770_v11  ;;  %v2548_v15 = vadd.f32 %v5188_v59, %v2259_v14  ;;  %v2262_v18 = vadd.f32 %v6260_v57, %v2261_v17  ;;  %v2263_v19 = vpop.f32.mrb[23].mxu1 }
 0x29c   : > { %v2551_v20 = vadd.f32 %v5189_v3, %v2262_v18  ;;  %v2772_v21 = vmax.f32 %v2548_v15, 0.0 }
 0x29d   : > { %5259 = vmatmul.mubr.bf16.vlgmr.msra.gmra.mrb[196].mxu0 %v6282_v29 }
 0x29e   : > { %v2773_v23 = vmax.f32 %v2551_v20, 0.0 }
 0x29f   : > { %v2266_v24 = vpop.f32.mrb[24].mxu1 }
 0x2a0   : > { %v2267_v25 = vadd.f32 %v6260_v57, %v2266_v24  ;;  %v2268_v26 = vpop.f32.mrb[25].mxu1  ;;  %5263 = vmatmul.mubr.bf16.vlgmr.msra.gmra.mrb[128].mxu1 %v2829_v54  ;;  %v2831_v27 = vpack.c.bf16 %v2773_v23, %v2772_v21 }
 0x2a1   : > { %v2269_v28 = vpop.f32.mrb[26].mxu1  ;;  %v5192_v8 = vpop.f32.mrb[144].mxu0  ;;  %5266 = vmatprep.mubr.bf16.mxu1 %v2830_v16 }
 0x2a2   : > { %v2270_v30 = vadd.f32 %v6260_v57, %v2269_v28  ;;  %v2271_v31 = vpop.f32.mrb[27].mxu1  ;;  %v2555_v32 = vpop.f32.mrb[145].mxu0 }
 0x2a3   : > { %v2556_v33 = vadd.f32 %v2555_v32, %v2267_v25  ;;  %v5193_v34 = vpop.f32.mrb[146].mxu0 }
 0x2a4   : > { %v2558_v35 = vpop.f32.mrb[147].mxu0 }
 0x2a5   : > { %v2559_v36 = vadd.f32 %v2558_v35, %v2270_v30  ;;  %v2774_v29 = vmax.f32 %v2556_v33, 0.0 }
 0x2a7   : > { %v2775_v37 = vmax.f32 %v2559_v36, 0.0  ;;  %v2274_v38 = vpop.f32.mrb[28].mxu1 }
 0x2a8   : > { %v2275_v39 = vadd.f32 %v6260_v57, %v2274_v38  ;;  %v2276_v40 = vpop.f32.mrb[29].mxu1  ;;  %5267 = vmatmul.mubr.bf16.gmra.mrb[132].mxu1 %v2831_v27 }
 0x2a9   : > { %v2832_v52 = vpack.c.bf16 %v2775_v37, %v2774_v29  ;;  %v2277_v42 = vpop.f32.mrb[30].mxu1 }
 0x2aa   : > { %v2564_v43 = vadd.f32 %v5192_v8, %v2275_v39  ;;  %v2278_v44 = vadd.f32 %v6260_v57, %v2277_v42  ;;  %v2279_v45 = vpop.f32.mrb[31].mxu1 }
 0x2ab   : > { %5270 = vmatprep.mubr.bf16.mxu1 %v2832_v52 }
 0x2ac   : > { %v2567_v46 = vadd.f32 %v5193_v34, %v2278_v44  ;;  %v2776_v47 = vmax.f32 %v2564_v43, 0.0 }
 0x2ae   : > { %v2777_v48 = vmax.f32 %v2567_v46, 0.0 }
 0x2af   : > { %v2282_v50 = vpop.f32.mrb[32].mxu1 }
 0x2b0   : > { %v2283_v51 = vadd.f32 %v6260_v57, %v2282_v50  ;;  %v2284_v53 = vpop.f32.mrb[33].mxu1  ;;  %v2833_v54 = vpack.c.bf16 %v2777_v48, %v2776_v47 }
 0x2b1   : > { %v2285_v55 = vpop.f32.mrb[34].mxu1  ;;  %v5196_v56 = vpop.f32.mrb[148].mxu0 }
 0x2b2   : > { %v2286_v22 = vadd.f32 %v6260_v57, %v2285_v55  ;;  %v2287_v41 = vpop.f32.mrb[35].mxu1  ;;  %v2571_v58 = vpop.f32.mrb[149].mxu0  ;;  %5271 = vmatmul.mubr.bf16.gmra.mrb[136].mxu1 %v2833_v54 }
 0x2b3   : > { %v2572_v59 = vadd.f32 %v2571_v58, %v2283_v51  ;;  %v5197_v60 = vpop.f32.mrb[150].mxu0 }
 0x2b4   : > { %v2574_v61 = vpop.f32.mrb[151].mxu0 }
 0x2b5   : > { %v2575_v62 = vadd.f32 %v2574_v61, %v2286_v22  ;;  %v2778_v63 = vmax.f32 %v2572_v59, 0.0 }
 0x2b7   : > { %v2779_v49 = vmax.f32 %v2575_v62, 0.0  ;;  %v2290_v1 = vpop.f32.mrb[36].mxu1 }
 0x2b8   : > { %v2291_v2 = vadd.f32 %v6260_v57, %v2290_v1  ;;  %v2292_v3 = vpop.f32.mrb[37].mxu1 }
 0x2b9   : > { %v2834_v4 = vpack.c.bf16 %v2779_v49, %v2778_v63  ;;  %v2293_v5 = vpop.f32.mrb[38].mxu1 }
 0x2ba   : > { %v2580_v6 = vadd.f32 %v5196_v56, %v2291_v2  ;;  %v2294_v7 = vadd.f32 %v6260_v57, %v2293_v5  ;;  %v2295_v9 = vpop.f32.mrb[39].mxu1 }
 0x2bb   : > { %5274 = vmatprep.mubr.bf16.mxu1 %v2834_v4 }
 0x2bc   : > { %v2583_v10 = vadd.f32 %v5197_v60, %v2294_v7  ;;  %v2780_v11 = vmax.f32 %v2580_v6, 0.0 }
 0x2be   : > { %v2781_v12 = vmax.f32 %v2583_v10, 0.0 }
 0x2bf   : > { %v2298_v13 = vpop.f32.mrb[40].mxu1 }
 0x2c0   : > { %v2299_v14 = vadd.f32 %v6260_v57, %v2298_v13  ;;  %v2300_v0 = vpop.f32.mrb[41].mxu1  ;;  %v2835_v16 = vpack.c.bf16 %v2781_v12, %v2780_v11 }
 0x2c1   : > { %v2301_v17 = vpop.f32.mrb[42].mxu1  ;;  %v5200_v15 = vpop.f32.mrb[152].mxu0 }
 0x2c2   : > { %v2302_v18 = vadd.f32 %v6260_v57, %v2301_v17  ;;  %v2303_v19 = vpop.f32.mrb[43].mxu1  ;;  %v2587_v20 = vpop.f32.mrb[153].mxu0  ;;  %5275 = vmatmul.mubr.bf16.gmra.mrb[140].mxu1 %v2835_v16 }
 0x2c3   : > { %v2588_v21 = vadd.f32 %v2587_v20, %v2299_v14  ;;  %v5201_v23 = vpop.f32.mrb[154].mxu0 }
 0x2c4   : > { %v2590_v24 = vpop.f32.mrb[155].mxu0 }
 0x2c5   : > { %v2591_v25 = vadd.f32 %v2590_v24, %v2302_v18  ;;  %v2782_v26 = vmax.f32 %v2588_v21, 0.0 }
 0x2c7   : > { %v2783_v27 = vmax.f32 %v2591_v25, 0.0  ;;  %v2306_v28 = vpop.f32.mrb[44].mxu1 }
 0x2c8   : > { %v2307_v8 = vadd.f32 %v6260_v57, %v2306_v28  ;;  %v2308_v30 = vpop.f32.mrb[45].mxu1  ;;  %v5507_v28 = vld [vmem:[#allocation2 + $0x18] sm:$0xff] }
 0x2c9   : > { %v2836_v31 = vpack.c.bf16 %v2783_v27, %v2782_v26  ;;  %v2309_v32 = vpop.f32.mrb[46].mxu1  ;;  %v5506_v26 = vld [vmem:[#allocation2 + $0x10] sm:$0xff] }
 0x2ca   : > { %v2596_v33 = vadd.f32 %v5200_v15, %v2307_v8  ;;  %v2310_v34 = vadd.f32 %v6260_v57, %v2309_v32  ;;  %v2311_v35 = vpop.f32.mrb[47].mxu1  ;;  %v3287_v27 = vrot.slane %v5506_v26, 1  ;;  %v3289_v8 = vrot.slane %v5507_v28, 1 }
 0x2cb   : > { %5278 = vmatprep.mubr.bf16.mxu1 %v2836_v31 }
 0x2cc   : > { %v2599_v36 = vadd.f32 %v5201_v23, %v2310_v34  ;;  %v2784_v29 = vmax.f32 %v2596_v33, 0.0 }
 0x2ce   : > { %v2785_v37 = vmax.f32 %v2599_v36, 0.0  ;;  %v5508_v36 = vld [vmem:[#allocation2] sm:$0xff] }
 0x2cf   : > { %v2314_v38 = vpop.f32.mrb[48].mxu1 }
 0x2d0   : > { %v2315_v39 = vadd.f32 %v6260_v57, %v2314_v38  ;;  %v2316_v40 = vpop.f32.mrb[49].mxu1  ;;  %v2837_v52 = vpack.c.bf16 %v2785_v37, %v2784_v29  ;;  %v3284_v29 = vrot.slane %v5508_v36, 1  ;;  %v5509_v37 = vld [vmem:[#allocation2 + $0x8] sm:$0xff] }
 0x2d1   : > { %v2317_v42 = vpop.f32.mrb[50].mxu1  ;;  %v5204_v43 = vpop.f32.mrb[156].mxu0  ;;  %v3285_v38 = vrot.slane %v5509_v37, 1  ;;  %v5519_v37 = vld [vmem:[#allocation2 + $0x70] sm:$0xff] }
 0x2d2   : > { %v2318_v44 = vadd.f32 %v6260_v57, %v2317_v42  ;;  %v2319_v45 = vpop.f32.mrb[51].mxu1  ;;  %v2603_v46 = vpop.f32.mrb[157].mxu0  ;;  %5279 = vmatmul.mubr.bf16.gmra.mrb[144].mxu1 %v2837_v52  ;;  %v5510_v52 = vld [vmem:[#allocation2 + $0x20] sm:$0xff] }
 0x2d3   : > { %v2604_v47 = vadd.f32 %v2603_v46, %v2315_v39  ;;  %v5205_v48 = vpop.f32.mrb[158].mxu0  ;;  %v3291_v42 = vrot.slane %v5510_v52, 1  ;;  %v6322_v46 = vsel %vm1887_vm5, %v3287_v27, %v3289_v8 }
 0x2d4   : > { %v2606_v50 = vpop.f32.mrb[159].mxu0 }
 0x2d5   : > { %v2607_v51 = vadd.f32 %v2606_v50, %v2318_v44  ;;  %v2786_v53 = vmax.f32 %v2604_v47, 0.0  ;;  %v5511_v47 = vld [vmem:[#allocation2 + $0x30] sm:$0xff]  ;;  %v5512_v50 = vld [vmem:[#allocation2 + $0x38] sm:$0xff] }
 0x2d7   : > { %v2787_v54 = vmax.f32 %v2607_v51, 0.0  ;;  %v2322_v55 = vpop.f32.mrb[52].mxu1  ;;  %v3297_v51 = vrot.slane %v5512_v50, 1 }
 0x2d8   : > { %v2323_v56 = vadd.f32 %v6260_v57, %v2322_v55  ;;  %v2324_v22 = vpop.f32.mrb[53].mxu1  ;;  %v5513_v55 = vld [vmem:[#allocation2 + $0x28] sm:$0xff] }
 0x2d9   : > { %v2838_v41 = vpack.c.bf16 %v2787_v54, %v2786_v53  ;;  %v2325_v58 = vpop.f32.mrb[54].mxu1 }
 0x2da   : > { %v2612_v59 = vadd.f32 %v5204_v43, %v2323_v56  ;;  %v2326_v60 = vadd.f32 %v6260_v57, %v2325_v58  ;;  %v2327_v61 = vpop.f32.mrb[55].mxu1  ;;  %v3293_v56 = vrot.slane %v5513_v55, 1 }
 0x2db   : > { %5282 = vmatprep.mubr.bf16.mxu1 %v2838_v41  ;;  %v5514_v41 = vld [vmem:[#allocation2 + $0x40] sm:$0xff]  ;;  %v6328_v61 = vsel %vm1887_vm5, %v3289_v8, %v3291_v42 }
 0x2dc   : > { %v2615_v62 = vadd.f32 %v5205_v48, %v2326_v60  ;;  %v2788_v63 = vmax.f32 %v2612_v59, 0.0  ;;  %v3295_v48 = vrot.slane %v5511_v47, 1  ;;  %v3299_v58 = vrot.slane %v5514_v41, 1 }
 0x2dd   : > { %v6325_v60 = vsel %vm1887_vm5, %v3284_v29, %v3285_v38 }
 0x2de   : > { %v2789_v49 = vmax.f32 %v2615_v62, 0.0 }
 0x2df   : > { %v2330_v1 = vpop.f32.mrb[56].mxu1 }
 0x2e0   : > { %v2331_v2 = vadd.f32 %v6260_v57, %v2330_v1  ;;  %v2332_v3 = vpop.f32.mrb[57].mxu1  ;;  %v2839_v4 = vpack.c.bf16 %v2789_v49, %v2788_v63  ;;  %v6331_v1 = vsel %vm1887_vm5, %v3285_v38, %v3287_v27  ;;  %v3311_v38 = vrot.slane %v5519_v37, 1 }
 0x2e1   : > { %v2333_v5 = vpop.f32.mrb[58].mxu1  ;;  %v5208_v6 = vpop.f32.mrb[160].mxu0 }
 0x2e2   : > { %v2334_v7 = vadd.f32 %v6260_v57, %v2333_v5  ;;  %v2335_v9 = vpop.f32.mrb[59].mxu1  ;;  %v2619_v10 = vpop.f32.mrb[161].mxu0  ;;  %5283 = vmatmul.mubr.bf16.gmra.mrb[148].mxu1 %v2839_v4  ;;  %v6338_v5 = vsel %vm1887_vm5, %v3291_v42, %v3293_v56 }
 0x2e3   : > { %v2620_v11 = vadd.f32 %v2619_v10, %v2331_v2  ;;  %v5209_v12 = vpop.f32.mrb[162].mxu0  ;;  %v6334_v2 = vsel %vm1887_vm5, %v3295_v48, %v3297_v51  ;;  %v6341_v9 = vsel %vm1887_vm5, %v3297_v51, %v3299_v58 }
 0x2e4   : > { %v2622_v13 = vpop.f32.mrb[163].mxu0 }
 0x2e5   : > { %v2623_v14 = vadd.f32 %v2622_v13, %v2334_v7  ;;  %v2790_v0 = vmax.f32 %v2620_v11, 0.0  ;;  %v6345_v13 = vsel %vm1887_vm5, %v3293_v56, %v3295_v48  ;;  %v5522_v48 = vld [vmem:[#allocation2 + $0x80] sm:$0xff] }
 0x2e6   : > { %v3315_v50 = vrot.slane %v5522_v48, 1 }
 0x2e7   : > { %v2791_v16 = vmax.f32 %v2623_v14, 0.0  ;;  %v2338_v17 = vpop.f32.mrb[60].mxu1  ;;  %v5515_v14 = vld [vmem:[#allocation2 + $0x50] sm:$0xff] }
 0x2e8   : > { %v2339_v15 = vadd.f32 %v6260_v57, %v2338_v17  ;;  %v2340_v18 = vpop.f32.mrb[61].mxu1 }
 0x2e9   : > { %v2840_v19 = vpack.c.bf16 %v2791_v16, %v2790_v0  ;;  %v2341_v20 = vpop.f32.mrb[62].mxu1  ;;  %v3303_v0 = vrot.slane %v5515_v14, 1  ;;  %v5516_v16 = vld [vmem:[#allocation2 + $0x58] sm:$0xff] }
 0x2ea   : > { %v2628_v21 = vadd.f32 %v5208_v6, %v2339_v15  ;;  %v2342_v23 = vadd.f32 %v6260_v57, %v2341_v20  ;;  %v2343_v24 = vpop.f32.mrb[63].mxu1  ;;  %v3305_v17 = vrot.slane %v5516_v16, 1  ;;  %v5517_v15 = vld [vmem:[#allocation2 + $0x48] sm:$0xff]  ;;  %v5518_v20 = vld [vmem:[#allocation2 + $0x60] sm:$0xff] }
 0x2eb   : > { %5286 = vmatprep.mubr.bf16.mxu1 %v2840_v19  ;;  %v3301_v18 = vrot.slane %v5517_v15, 1  ;;  %v5523_v15 = vld [vmem:[#allocation2 + $0x90] sm:$0xff] }
 0x2ec   : > { %v2631_v25 = vadd.f32 %v5209_v12, %v2342_v23  ;;  %v2792_v30 = vmax.f32 %v2628_v21, 0.0  ;;  %v3307_v21 = vrot.slane %v5518_v20, 1  ;;  %v6348_v26 = vsel %vm1887_vm5, %v3303_v0, %v3305_v17 }
 0x2ed   : > { %v6359_v29 = vsel %vm1887_vm5, %v3301_v18, %v3303_v0 }
 0x2ee   : > { %v2793_v31 = vmax.f32 %v2631_v25, 0.0 }
 0x2ef   : > { %v2346_v32 = vpop.f32.mrb[64].mxu1 }
 0x2f0   : > { %v2347_v33 = vadd.f32 %v6260_v57, %v2346_v32  ;;  %v2348_v34 = vpop.f32.mrb[65].mxu1  ;;  %v2841_v35 = vpack.c.bf16 %v2793_v31, %v2792_v30  ;;  %v6352_v30 = vsel %vm1887_vm5, %v3299_v58, %v3301_v18  ;;  %v3319_v18 = vrot.slane %v5523_v15, 1 }
 0x2f1   : > { %v2349_v39 = vpop.f32.mrb[66].mxu1  ;;  %v5212_v40 = vpop.f32.mrb[164].mxu0 }
 0x2f2   : > { %v2350_v43 = vadd.f32 %v6260_v57, %v2349_v39  ;;  %v2351_v44 = vpop.f32.mrb[67].mxu1  ;;  %v2635_v45 = vpop.f32.mrb[165].mxu0  ;;  %5287 = vmatmul.mubr.bf16.gmra.mrb[152].mxu1 %v2841_v35  ;;  %v5520_v39 = vld [vmem:[#allocation2 + $0x78] sm:$0xff] }
 0x2f3   : > { %v2636_v53 = vadd.f32 %v2635_v45, %v2347_v33  ;;  %v5213_v54 = vpop.f32.mrb[166].mxu0  ;;  %v6355_v33 = vsel %vm1887_vm5, %v3305_v17, %v3307_v21  ;;  %v5521_v45 = vld [vmem:[#allocation2 + $0x68] sm:$0xff] }
 0x2f4   : > { %v2638_v22 = vpop.f32.mrb[167].mxu0  ;;  %v3309_v47 = vrot.slane %v5521_v45, 1 }
 0x2f5   : > { %v2639_v59 = vadd.f32 %v2638_v22, %v2350_v43  ;;  %v2794_v62 = vmax.f32 %v2636_v53, 0.0 }
 0x2f7   : > { %v2795_v63 = vmax.f32 %v2639_v59, 0.0  ;;  %v2354_v49 = vpop.f32.mrb[68].mxu1 }
 0x2f8   : > { %v2355_v3 = vadd.f32 %v6260_v57, %v2354_v49  ;;  %v2356_v4 = vpop.f32.mrb[69].mxu1  ;;  %v6367_v49 = vsel %vm1887_vm5, %v3307_v21, %v3309_v47 }
 0x2f9   : > { %v2842_v6 = vpack.c.bf16 %v2795_v63, %v2794_v62  ;;  %v2357_v7 = vpop.f32.mrb[70].mxu1 }
 0x2fa   : > { %v2644_v10 = vadd.f32 %v5212_v40, %v2355_v3  ;;  %v2358_v11 = vadd.f32 %v6260_v57, %v2357_v7  ;;  %v2359_v12 = vpop.f32.mrb[71].mxu1  ;;  %v3313_v40 = vrot.slane %v5520_v39, 1 }
 0x2fb   : > { %5290 = vmatprep.mubr.bf16.mxu1 %v2842_v6  ;;  %v6373_v6 = vsel %vm1887_vm5, %v3309_v47, %v3311_v38 }
 0x2fc   : > { %v2647_v19 = vadd.f32 %v5213_v54, %v2358_v11  ;;  %v2796_v23 = vmax.f32 %v2644_v10, 0.0  ;;  %v6362_v55 = vsel %vm1887_vm5, %v3311_v38, %v3313_v40  ;;  %v6370_v3 = vsel %vm1887_vm5, %v3313_v40, %v3315_v50 }
 0x2fe   : > { %v2797_v24 = vmax.f32 %v2647_v19, 0.0  ;;  %v5524_v19 = vld [vmem:[#allocation2 + $0x98] sm:$0xff] }
 0x2ff   : > { %v2362_v25 = vpop.f32.mrb[72].mxu1  ;;  %v3321_v20 = vrot.slane %v5524_v19, 1  ;;  %v5529_v19 = vld [vmem:[#allocation2 + $0xa8] sm:$0xff] }
 0x300   : > { %v2363_v27 = vadd.f32 %v6260_v57, %v2362_v25  ;;  %v2364_v28 = vpop.f32.mrb[73].mxu1  ;;  %v2843_v8 = vpack.c.bf16 %v2797_v24, %v2796_v23 }
 0x301   : > { %v2365_v31 = vpop.f32.mrb[74].mxu1  ;;  %v5216_v32 = vpop.f32.mrb[168].mxu0 }
 0x302   : > { %v2366_v34 = vadd.f32 %v6260_v57, %v2365_v31  ;;  %v2367_v35 = vpop.f32.mrb[75].mxu1  ;;  %v2651_v36 = vpop.f32.mrb[169].mxu0  ;;  %5291 = vmatmul.mubr.bf16.gmra.mrb[156].mxu1 %v2843_v8  ;;  %v5525_v31 = vld [vmem:[#allocation2 + $0x88] sm:$0xff] }
 0x303   : > { %v2652_v52 = vadd.f32 %v2651_v36, %v2363_v27  ;;  %v5217_v42 = vpop.f32.mrb[170].mxu0  ;;  %v5526_v35 = vld [vmem:[#allocation2 + $0xa0] sm:$0xff] }
 0x304   : > { %v2654_v43 = vpop.f32.mrb[171].mxu0  ;;  %v3323_v36 = vrot.slane %v5526_v35, 1 }
 0x305   : > { %v2655_v44 = vadd.f32 %v2654_v43, %v2366_v34  ;;  %v2798_v51 = vmax.f32 %v2652_v52, 0.0  ;;  %v6378_v34 = vsel %vm1887_vm5, %v3319_v18, %v3321_v20 }
 0x307   : > { %v2799_v53 = vmax.f32 %v2655_v44, 0.0  ;;  %v2370_v54 = vpop.f32.mrb[76].mxu1 }
 0x308   : > { %v2371_v56 = vadd.f32 %v6260_v57, %v2370_v54  ;;  %v2372_v22 = vpop.f32.mrb[77].mxu1 }
 0x309   : > { %v2844_v41 = vpack.c.bf16 %v2799_v53, %v2798_v51  ;;  %v2373_v58 = vpop.f32.mrb[78].mxu1  ;;  %v6386_v51 = vsel %vm1887_vm5, %v3321_v20, %v3323_v36  ;;  %v3325_v20 = vrot.slane %v5529_v19, 1 }
 0x30a   : > { %v2660_v59 = vadd.f32 %v5216_v32, %v2371_v56  ;;  %v2374_v62 = vadd.f32 %v6260_v57, %v2373_v58  ;;  %v2375_v63 = vpop.f32.mrb[79].mxu1  ;;  %v3317_v32 = vrot.slane %v5525_v31, 1 }
 0x30b   : > { %5294 = vmatprep.mubr.bf16.mxu1 %v2844_v41 }
 0x30c   : > { %v2663_v4 = vadd.f32 %v5217_v42, %v2374_v62  ;;  %v2800_v7 = vmax.f32 %v2660_v59, 0.0  ;;  %v6383_v48 = vsel %vm1887_vm5, %v3315_v50, %v3317_v32  ;;  %v6389_v54 = vsel %vm1887_vm5, %v3317_v32, %v3319_v18 }
 0x30e   : > { %v2801_v10 = vmax.f32 %v2663_v4, 0.0 }
 0x30f   : > { %v2378_v11 = vpop.f32.mrb[80].mxu1 }
 0x310   : > { %v2379_v12 = vadd.f32 %v6260_v57, %v2378_v11  ;;  %v2380_v14 = vpop.f32.mrb[81].mxu1  ;;  %v2845_v0 = vpack.c.bf16 %v2801_v10, %v2800_v7  ;;  %v5527_v7 = vld [vmem:[#allocation2 + $0xb0] sm:$0xff]  ;;  %v5528_v10 = vld [vmem:[#allocation2 + $0xb8] sm:$0xff] }
 0x311   : > { %v2381_v16 = vpop.f32.mrb[82].mxu1  ;;  %v5220_v17 = vpop.f32.mrb[172].mxu0  ;;  %v3327_v50 = vrot.slane %v5527_v7, 1  ;;  %v3329_v11 = vrot.slane %v5528_v10, 1 }
 0x312   : > { %v2382_v21 = vadd.f32 %v6260_v57, %v2381_v16  ;;  %v2383_v23 = vpop.f32.mrb[83].mxu1  ;;  %v2667_v24 = vpop.f32.mrb[173].mxu0  ;;  %5295 = vmatmul.mubr.bf16.gmra.mrb[160].mxu1 %v2845_v0 }
 0x313   : > { %v2668_v25 = vadd.f32 %v2667_v24, %v2379_v12  ;;  %v5221_v27 = vpop.f32.mrb[174].mxu0  ;;  %v5530_v23 = vld [vmem:[#allocation2 + $0xc0] sm:$0xff] }
 0x314   : > { %v2670_v28 = vpop.f32.mrb[175].mxu0  ;;  %v3331_v24 = vrot.slane %v5530_v23, 1 }
 0x315   : > { %v2671_v8 = vadd.f32 %v2670_v28, %v2382_v21  ;;  %v2802_v37 = vmax.f32 %v2668_v25, 0.0  ;;  %v6394_v21 = vsel %vm1887_vm5, %v3327_v50, %v3329_v11 }
 0x317   : > { %v2803_v38 = vmax.f32 %v2671_v8, 0.0  ;;  %v2386_v39 = vpop.f32.mrb[84].mxu1 }
 0x318   : > { %v2387_v40 = vadd.f32 %v6260_v57, %v2386_v39  ;;  %v2388_v52 = vpop.f32.mrb[85].mxu1 }
 0x319   : > { %v2846_v42 = vpack.c.bf16 %v2803_v38, %v2802_v37  ;;  %v2389_v43 = vpop.f32.mrb[86].mxu1  ;;  %v6402_v52 = vsel %vm1887_vm5, %v3329_v11, %v3331_v24 }
 0x31a   : > { %v2676_v44 = vadd.f32 %v5220_v17, %v2387_v40  ;;  %v2390_v45 = vadd.f32 %v6260_v57, %v2389_v43  ;;  %v2391_v47 = vpop.f32.mrb[87].mxu1  ;;  %v6399_v40 = vsel %vm1887_vm5, %v3323_v36, %v3325_v20  ;;  %v6405_v43 = vsel %vm1887_vm5, %v3325_v20, %v3327_v50 }
 0x31b   : > { %5298 = vmatprep.mubr.bf16.mxu1 %v2846_v42 }
 0x31c   : > { %v2679_v53 = vadd.f32 %v5221_v27, %v2390_v45  ;;  %v2804_v56 = vmax.f32 %v2676_v44, 0.0 }
 0x31e   : > { %v2805_v22 = vmax.f32 %v2679_v53, 0.0 }
 0x31f   : > { %v2394_v41 = vpop.f32.mrb[88].mxu1 }
 0x320   : > { %v2395_v58 = vadd.f32 %v6260_v57, %v2394_v41  ;;  %v2396_v59 = vpop.f32.mrb[89].mxu1  ;;  %v2847_v62 = vpack.c.bf16 %v2805_v22, %v2804_v56 }
 0x321   : > { %v2397_v63 = vpop.f32.mrb[90].mxu1  ;;  %v5224_v4 = vpop.f32.mrb[176].mxu0  ;;  %v5531_v59 = vld [vmem:[#allocation2 + $0xd0] sm:$0xff] }
 0x322   : > { %v2398_v12 = vadd.f32 %v6260_v57, %v2397_v63  ;;  %v2399_v14 = vpop.f32.mrb[91].mxu1  ;;  %v2683_v0 = vpop.f32.mrb[177].mxu0  ;;  %5299 = vmatmul.mubr.bf16.gmra.mrb[164].mxu1 %v2847_v62  ;;  %v3335_v36 = vrot.slane %v5531_v59, 1  ;;  %v5532_v62 = vld [vmem:[#allocation2 + $0xd8] sm:$0xff]  ;;  %v5535_v59 = vld [vmem:[#allocation2 + $0xf0] sm:$0xff] }
 0x323   : > { %v2684_v16 = vadd.f32 %v2683_v0, %v2395_v58  ;;  %v5225_v17 = vpop.f32.mrb[178].mxu0  ;;  %v3337_v63 = vrot.slane %v5532_v62, 1  ;;  %v5533_v0 = vld [vmem:[#allocation2 + $0xc8] sm:$0xff]  ;;  %v5536_v62 = vld [vmem:[#allocation2 + $0xf8] sm:$0xff] }
 0x324   : > { %v2686_v15 = vpop.f32.mrb[179].mxu0 }
 0x325   : > { %v2687_v18 = vadd.f32 %v2686_v15, %v2398_v12  ;;  %v2806_v25 = vmax.f32 %v2684_v16, 0.0  ;;  %v3333_v16 = vrot.slane %v5533_v0, 1  ;;  %v5534_v15 = vld [vmem:[#allocation2 + $0xe0] sm:$0xff] }
 0x327   : > { %v2807_v27 = vmax.f32 %v2687_v18, 0.0  ;;  %v2402_v28 = vpop.f32.mrb[92].mxu1  ;;  %v3339_v18 = vrot.slane %v5534_v15, 1  ;;  %v5538_v15 = vld [vmem:[#allocation2 + $0x100] sm:$0xff] }
 0x328   : > { %v2403_v8 = vadd.f32 %v6260_v57, %v2402_v28  ;;  %v2404_v31 = vpop.f32.mrb[93].mxu1 }
 0x329   : > { %v2848_v32 = vpack.c.bf16 %v2807_v27, %v2806_v25  ;;  %v2405_v35 = vpop.f32.mrb[94].mxu1 }
 0x32a   : > { %v2692_v37 = vadd.f32 %v5224_v4, %v2403_v8  ;;  %v2406_v38 = vadd.f32 %v6260_v57, %v2405_v35  ;;  %v2407_v39 = vpop.f32.mrb[95].mxu1 }
 0x32b   : > { %5302 = vmatprep.mubr.bf16.mxu1 %v2848_v32 }
 0x32c   : > { %v2695_v42 = vadd.f32 %v5225_v17, %v2406_v38  ;;  %v2808_v44 = vmax.f32 %v2692_v37, 0.0  ;;  %v6410_v17 = vsel %vm1887_vm5, %v3335_v36, %v3337_v63  ;;  %v6415_v37 = vsel %vm1887_vm5, %v3331_v24, %v3333_v16 }
 0x32d   : > { %v6418_v38 = vsel %vm1887_vm5, %v3337_v63, %v3339_v18  ;;  %v3343_v24 = vrot.slane %v5535_v59, 1 }
 0x32e   : > { %v2809_v45 = vmax.f32 %v2695_v42, 0.0  ;;  %v6421_v42 = vsel %vm1887_vm5, %v3333_v16, %v3335_v36 }
 0x32f   : > { %v2410_v47 = vpop.f32.mrb[96].mxu1 }
 0x330   : > { %v2411_v53 = vadd.f32 %v6260_v57, %v2410_v47  ;;  %v2412_v56 = vpop.f32.mrb[97].mxu1  ;;  %v2849_v22 = vpack.c.bf16 %v2809_v45, %v2808_v44 }
 0x331   : > { %v2413_v41 = vpop.f32.mrb[98].mxu1  ;;  %v5228_v58 = vpop.f32.mrb[180].mxu0 }
 0x332   : > { %v2414_v4 = vadd.f32 %v6260_v57, %v2413_v41  ;;  %v2415_v7 = vpop.f32.mrb[99].mxu1  ;;  %v2699_v10 = vpop.f32.mrb[181].mxu0  ;;  %5303 = vmatmul.mubr.bf16.gmra.mrb[168].mxu1 %v2849_v22 }
 0x333   : > { %v2700_v50 = vadd.f32 %v2699_v10, %v2411_v53  ;;  %v5229_v11 = vpop.f32.mrb[182].mxu0 }
 0x334   : > { %v2702_v12 = vpop.f32.mrb[183].mxu0 }
 0x335   : > { %v2703_v14 = vadd.f32 %v2702_v12, %v2414_v4  ;;  %v2810_v19 = vmax.f32 %v2700_v50, 0.0  ;;  %v3345_v4 = vrot.slane %v5536_v62, 1 }
 0x337   : > { %v2811_v20 = vmax.f32 %v2703_v14, 0.0  ;;  %v2418_v23 = vpop.f32.mrb[100].mxu1  ;;  %v5537_v14 = vld [vmem:[#allocation2 + $0xe8] sm:$0xff]  ;;  %v6426_v16 = vsel %vm1887_vm5, %v3343_v24, %v3345_v4 }
 0x338   : > { %v2419_v25 = vadd.f32 %v6260_v57, %v2418_v23  ;;  %v2420_v27 = vpop.f32.mrb[101].mxu1  ;;  %v3341_v0 = vrot.slane %v5537_v14, 1 }
 0x339   : > { %v2850_v28 = vpack.c.bf16 %v2811_v20, %v2810_v19  ;;  %v2421_v8 = vpop.f32.mrb[102].mxu1  ;;  %v3347_v19 = vrot.slane %v5538_v15, 1  ;;  %v5541_v15 = vld [vmem:[#allocation2 + $0x108] sm:$0xff] }
 0x33a   : > { %v2708_v31 = vadd.f32 %v5228_v58, %v2419_v25  ;;  %v2422_v32 = vadd.f32 %v6260_v57, %v2421_v8  ;;  %v2423_v35 = vpop.f32.mrb[103].mxu1 }
 0x33b   : > { %5306 = vmatprep.mubr.bf16.mxu1 %v2850_v28 }
 0x33c   : > { %v2711_v39 = vadd.f32 %v5229_v11, %v2422_v32  ;;  %v2812_v44 = vmax.f32 %v2708_v31, 0.0 }
 0x33e   : > { %v2813_v45 = vmax.f32 %v2711_v39, 0.0 }
 0x33f   : > { %v2426_v47 = vpop.f32.mrb[104].mxu1 }
 0x340   : > { %v2427_v53 = vadd.f32 %v6260_v57, %v2426_v47  ;;  %v2428_v56 = vpop.f32.mrb[105].mxu1  ;;  %v2851_v22 = vpack.c.bf16 %v2813_v45, %v2812_v44  ;;  %v6431_v44 = vsel %vm1887_vm5, %v3339_v18, %v3341_v0  ;;  %v6434_v45 = vsel %vm1887_vm5, %v3345_v4, %v3347_v19  ;;  %v5540_v18 = vld [vmem:[#allocation2 + $0x118] sm:$0xff] }
 0x341   : > { %v2429_v41 = vpop.f32.mrb[106].mxu1  ;;  %v5232_v58 = vpop.f32.mrb[184].mxu0 }
 0x342   : > { %v2430_v63 = vadd.f32 %v6260_v57, %v2429_v41  ;;  %v2431_v7 = vpop.f32.mrb[107].mxu1  ;;  %v2715_v10 = vpop.f32.mrb[185].mxu0  ;;  %5307 = vmatmul.mubr.bf16.gmra.mrb[172].mxu1 %v2851_v22 }
 0x343   : > { %v2716_v36 = vadd.f32 %v2715_v10, %v2427_v53  ;;  %v5233_v50 = vpop.f32.mrb[186].mxu0  ;;  %v6437_v53 = vsel %vm1887_vm5, %v3341_v0, %v3343_v24  ;;  %v5539_v7 = vld [vmem:[#allocation2 + $0x110] sm:$0xff] }
 0x344   : > { %v2718_v11 = vpop.f32.mrb[187].mxu0  ;;  %v3351_v10 = vrot.slane %v5539_v7, 1 }
 0x345   : > { %v2719_v12 = vadd.f32 %v2718_v11, %v2430_v63  ;;  %v2814_v20 = vmax.f32 %v2716_v36, 0.0  ;;  %v3353_v36 = vrot.slane %v5540_v18, 1 }
 0x347   : > { %v2815_v23 = vmax.f32 %v2719_v12, 0.0  ;;  %v2434_v25 = vpop.f32.mrb[108].mxu1 }
 0x348   : > { %v2435_v27 = vadd.f32 %v6260_v57, %v2434_v25  ;;  %v2436_v28 = vpop.f32.mrb[109].mxu1  ;;  %v6442_v25 = vsel %vm1887_vm5, %v3351_v10, %v3353_v36 }
 0x349   : > { %v2852_v8 = vpack.c.bf16 %v2815_v23, %v2814_v20  ;;  %v2437_v31 = vpop.f32.mrb[110].mxu1  ;;  %v3349_v20 = vrot.slane %v5541_v15, 1 }
 0x34a   : > { %v2724_v32 = vadd.f32 %v5232_v58, %v2435_v27  ;;  %v2438_v35 = vadd.f32 %v6260_v57, %v2437_v31  ;;  %v2439_v39 = vpop.f32.mrb[111].mxu1  ;;  %v5542_v27 = vld [vmem:[#allocation2 + $0x120] sm:$0xff] }
 0x34b   : > { %5310 = vmatprep.mubr.bf16.mxu1 %v2852_v8  ;;  %v3355_v28 = vrot.slane %v5542_v27, 1 }
 0x34c   : > { %v2727_v47 = vadd.f32 %v5233_v50, %v2438_v35  ;;  %v2816_v56 = vmax.f32 %v2724_v32, 0.0 }
 0x34e   : > { %v2817_v22 = vmax.f32 %v2727_v47, 0.0 }
 0x34f   : > { %v2442_v41 = vpop.f32.mrb[112].mxu1 }
 0x350   : > { %v2443_v59 = vadd.f32 %v6260_v57, %v2442_v41  ;;  %v2444_v58 = vpop.f32.mrb[113].mxu1  ;;  %v2853_v62 = vpack.c.bf16 %v2817_v22, %v2816_v56  ;;  %v5543_v41 = vld [vmem:[%s6782_s5] ss:$0 sm:$0xff] }
 0x351   : > { %v2445_v63 = vpop.f32.mrb[114].mxu1  ;;  %v5236_v4 = vpop.f32.mrb[188].mxu0 }
 0x352   : > { %v2446_v11 = vadd.f32 %v6260_v57, %v2445_v63  ;;  %v2447_v12 = vpop.f32.mrb[115].mxu1  ;;  %5311 = vmatmul.mubr.bf16.gmra.mrb[176].mxu1 %v2853_v62  ;;  %v2731_v50 = vpop.f32.mrb[189].mxu0  ;;  %v6449_v62 = vsel %vm1887_vm5, %v3347_v19, %v3349_v20  ;;  %v6452_v63 = vsel %vm1887_vm5, %v3353_v36, %v3355_v28 }
 0x353   : > { %v2732_v24 = vadd.f32 %v2731_v50, %v2443_v59  ;;  %v5237_v14 = vpop.f32.mrb[190].mxu0 }
 0x354   : > { %v2734_v0 = vpop.f32.mrb[191].mxu0 }
 0x355   : > { %v2735_v23 = vadd.f32 %v2734_v0, %v2446_v11  ;;  %v2818_v31 = vmax.f32 %v2732_v24, 0.0  ;;  %v5544_v0 = vld [vmem:[#allocation2 + $0x130] sm:$0xff] }
 0x356   : > { %v3359_v15 = vrot.slane %v5544_v0, 1 }
 0x357   : > { %v2450_v8 = vpop.f32.mrb[116].mxu1  ;;  %v2819_v32 = vmax.f32 %v2735_v23, 0.0  ;;  %v5545_v23 = vld [vmem:[#allocation2 + $0x138] sm:$0xff] }
 0x358   : > { %v2451_v35 = vadd.f32 %v6260_v57, %v2450_v8  ;;  %v2452_v39 = vpop.f32.mrb[117].mxu1  ;;  %v6455_v57 = vsel %vm1887_vm5, %v3349_v20, %v3351_v10  ;;  %v3361_v27 = vrot.slane %v5545_v23, 1  ;;  %v5546_v8 = vld [vmem:[#allocation2 + $0x128] sm:$0xff] }
 0x359   : > { %v2453_v47 = vpop.f32.mrb[118].mxu1  ;;  %v2854_v56 = vpack.c.bf16 %v2819_v32, %v2818_v31  ;;  %v3357_v36 = vrot.slane %v5546_v8, 1  ;;  %v6460_v31 = vld [vmem:[#allocation2 + $0x140] sm:$0xff] }
 0x35a   : > { %v2740_v22 = vadd.f32 %v5236_v4, %v2451_v35  ;;  %v2454_v59 = vadd.f32 %v5543_v41, %v2453_v47  ;;  %v2455_v58 = vpop.f32.mrb[119].mxu1  ;;  %v3363_v10 = vrot.slane %v6460_v31, 1  ;;  %v6477_v8 = vld [vmem:[%s6783_s6] ss:$0 sm:$0xff] }
 0x35b   : > { %5314 = vmatprep.mubr.bf16.mxu1 %v2854_v56 }
 0x35c   : > { %v2743_v7 = vadd.f32 %v5237_v14, %v2454_v59  ;;  %v2820_v18 = vmax.f32 %v2740_v22, 0.0  ;;  %v6458_v14 = vsel %vm1887_vm5, %v3359_v15, %v3361_v27  ;;  %v6464_v22 = vsel %vm1887_vm5, %v3355_v28, %v3357_v36 }
 0x35e   : > { %v2821_v11 = vmax.f32 %v2743_v7, 0.0  ;;  %v6469_v7 = vsel %vm1887_vm5, %v3361_v27, %v3363_v10 }
 0x35f   : > { %v2458_v4 = vpop.f32.mrb[120].mxu1 }
 0x360   : > { %v2460_v12 = vpop.f32.mrb[121].mxu1  ;;  %v2855_v50 = vpack.c.bf16 %v2821_v11, %v2820_v18  ;;  %v2459_v20 = vadd.f32 %v5543_v41, %v2458_v4  ;;  %v6472_v4 = vsel %vm1887_vm5, %v3357_v36, %v3359_v15 }
 0x361   : > { %v2461_v24 = vpop.f32.mrb[122].mxu1 }
 0x362   : > { %v2463_v19 = vpop.f32.mrb[123].mxu1  ;;  %5315 = vmatmul.mubr.bf16.gmra.mrb[180].mxu1 %v2855_v50  ;;  %v2462_v39 = vadd.f32 %v5543_v41, %v2461_v24 }
 0x368   : > { %v5240_v32 = vpop.f32.mrb[192].mxu0 }
 0x369   : > { %v2747_v35 = vpop.f32.mrb[193].mxu0 }
 0x36a   : > { %v2748_v47 = vadd.f32 %v2747_v35, %v2459_v20  ;;  %v5241_v56 = vpop.f32.mrb[194].mxu0 }
 0x36b   : > { %v2466_v59 = vpop.f32.mrb[124].mxu1  ;;  %v2750_v58 = vpop.f32.mrb[195].mxu0 }
 0x36c   : > { %v2467_v18 = vadd.f32 %v5543_v41, %v2466_v59  ;;  %v2751_v11 = vadd.f32 %v2750_v58, %v2462_v39  ;;  %v2468_v12 = vpop.f32.mrb[125].mxu1  ;;  %v2822_v24 = vmax.f32 %v2748_v47, 0.0 }
 0x36d   : > { %v2469_v50 = vpop.f32.mrb[126].mxu1 }
 0x36e   : > { %v2756_v0 = vadd.f32 %v5240_v32, %v2467_v18  ;;  %v2823_v23 = vmax.f32 %v2751_v11, 0.0  ;;  %v2470_v19 = vadd.f32 %v5543_v41, %v2469_v50  ;;  %v2471_v28 = vpop.f32.mrb[127].mxu1  ;;  %v5548_v32 = vld [vmem:[#allocation2 + $0x150] sm:$0xff]  ;;  %v5549_v18 = vld [vmem:[#allocation2 + $0x158] sm:$0xff] }
 0x36f   : > { %v3367_v41 = vrot.slane %v5548_v32, 1  ;;  %v3369_v11 = vrot.slane %v5549_v18, 1 }
 0x370   : > { %v2856_v20 = vpack.c.bf16 %v2823_v23, %v2822_v24  ;;  %v2759_v27 = vadd.f32 %v5241_v56, %v2470_v19  ;;  %v5260_v35 = vpop.f32.mrb[196].mxu0  ;;  %v2824_v58 = vmax.f32 %v2756_v0, 0.0 }
 0x371   : > { %v2972_v39 = vadd.f32 %v5260_v35, %v6477_v8  ;;  %v2963_v59 = vpop.f32.mrb[197].mxu0  ;;  %v5550_v35 = vld [vmem:[#allocation2 + $0x148] sm:$0xff] }
 0x372   : > { %v2825_v15 = vmax.f32 %v2759_v27, 0.0  ;;  %v2964_v36 = vadd.f32 %v6477_v8, %v2963_v59  ;;  %v5261_v47 = vpop.f32.mrb[198].mxu0  ;;  %5318 = vmatprep.mubr.bf16.mxu1 %v2856_v20  ;;  %v3365_v20 = vrot.slane %v5550_v35, 1  ;;  %v6486_v59 = vld [vmem:[#allocation2 + $0x160] sm:$0xff] }
 0x373   : > { %v3479_v12 = vadd.f32 %v6322_v46, %v2972_v39  ;;  %v2975_v50 = vadd.f32 %v5261_v47, %v6477_v8  ;;  %v2966_v24 = vpop.f32.mrb[199].mxu0  ;;  %v5264_v56 = vpop.f32.mrb[128].mxu1  ;;  %v3371_v32 = vrot.slane %v6486_v59, 1 }
 0x374   : > { %v3477_v23 = vadd.f32 %v6325_v60, %v2964_v36  ;;  %v2967_v19 = vadd.f32 %v6477_v8, %v2966_v24  ;;  %v2988_v0 = vadd.f32 %v5264_v56, %v6477_v8  ;;  %v2979_v28 = vpop.f32.mrb[129].mxu1  ;;  %v2857_v27 = vpack.c.bf16 %v2825_v15, %v2824_v58 }
 0x375   : > { %v3480_v46 = vadd.f32 %v6328_v61, %v2975_v50  ;;  %v2980_v39 = vadd.f32 %v6477_v8, %v2979_v28  ;;  %v5265_v47 = vpop.f32.mrb[130].mxu1  ;;  %v3543_v18 = vmax.f32 %v3479_v12, 0.0  ;;  %v6497_v61 = vsel %vm1887_vm5, %v3367_v41, %v3369_v11 }
 0x376   : > { %v3478_v60 = vadd.f32 %v6331_v1, %v2967_v19  ;;  %v3483_v36 = vadd.f32 %v6334_v2, %v2988_v0  ;;  %v2991_v24 = vadd.f32 %v5265_v47, %v6477_v8  ;;  %v2982_v58 = vpop.f32.mrb[131].mxu1  ;;  %5319 = vmatmul.mubr.bf16.gmra.mrb[184].mxu1 %v2857_v27  ;;  %v3541_v50 = vmax.f32 %v3477_v23, 0.0 }
 0x377   : > { %v3544_v15 = vmax.f32 %v3480_v46, 0.0  ;;  %v3481_v56 = vadd.f32 %v6338_v5, %v2980_v39  ;;  %v2983_v35 = vadd.f32 %v6477_v8, %v2982_v58  ;;  %v6504_v5 = vsel %vm1887_vm5, %v3363_v10, %v3365_v20 }
 0x378   : > { %v3542_v12 = vmax.f32 %v3478_v60, 0.0  ;;  %v3484_v1 = vadd.f32 %v6341_v9, %v2991_v24  ;;  %v3547_v28 = vmax.f32 %v3483_v36, 0.0  ;;  %v6510_v9 = vsel %vm1887_vm5, %v3369_v11, %v3371_v32 }
 0x379   : > { %v4679_v19 = vpack.c.bf16 %v3544_v15, %v3543_v18  ;;  %v3482_v2 = vadd.f32 %v6345_v13, %v2983_v35  ;;  %v3545_v46 = vmax.f32 %v3481_v56, 0.0  ;;  %v6515_v31 = vsel %vm1887_vm5, %v3365_v20, %v3367_v41  ;;  %v5552_v20 = vld [vmem:[#allocation2 + $0x170] sm:$0xff] }
 0x37a   : > { %v4674_v0 = vpack.c.bf16 %v3542_v12, %v3541_v50  ;;  %v3548_v27 = vmax.f32 %v3484_v1, 0.0  ;;  %v3375_v50 = vrot.slane %v5552_v20, 1  ;;  %v5553_v12 = vld [vmem:[#allocation2 + $0x178] sm:$0xff] }
 0x37b   : > { %4862 = vst [vmem:[%s5985_s12 + $0x8] sm:$0xff] %v4679_v19   ;;  %v3546_v39 = vmax.f32 %v3482_v2, 0.0  ;;  %v5268_v23 = vpop.f32.mrb[132].mxu1  ;;  %v3377_v1 = vrot.slane %v5553_v12, 1 }
 0x37c   : > { %4675 = vst [vmem:[%s5985_s12] sm:$0xff] %v4674_v0   ;;  %v4689_v13 = vpack.c.bf16 %v3548_v27, %v3547_v28  ;;  %v3004_v47 = vadd.f32 %v5268_v23, %v6477_v8  ;;  %v2995_v18 = vpop.f32.mrb[133].mxu1 }
 0x37d   : > { %v4684_v10 = vpack.c.bf16 %v3546_v39, %v3545_v46  ;;  %v2996_v60 = vadd.f32 %v6477_v8, %v2995_v18  ;;  %v5269_v36 = vpop.f32.mrb[134].mxu1 }
 0x37e   : > { %4864 = vst [vmem:[%s5985_s12 + $0x18] sm:$0xff] %v4689_v13   ;;  %v3487_v24 = vadd.f32 %v6348_v26, %v3004_v47  ;;  %v3007_v58 = vadd.f32 %v5269_v36, %v6477_v8  ;;  %v2998_v15 = vpop.f32.mrb[135].mxu1  ;;  %v5555_v13 = vld [vmem:[#allocation2 + $0x180] sm:$0xff] }
 0x37f   : > { %4863 = vst [vmem:[%s5985_s12 + $0x10] sm:$0xff] %v4684_v10   ;;  %v3485_v11 = vadd.f32 %v6352_v30, %v2996_v60  ;;  %v2999_v56 = vadd.f32 %v6477_v8, %v2998_v15  ;;  %v5554_v30 = vld [vmem:[#allocation2 + $0x168] sm:$0xff]  ;;  %v3379_v47 = vrot.slane %v5555_v13, 1 }
 0x380   : > { %v3488_v35 = vadd.f32 %v6355_v33, %v3007_v58  ;;  %v3551_v19 = vmax.f32 %v3487_v24, 0.0  ;;  %v3373_v39 = vrot.slane %v5554_v30, 1 }
 0x381   : > { %v3486_v41 = vadd.f32 %v6359_v29, %v2999_v56  ;;  %v3549_v2 = vmax.f32 %v3485_v11, 0.0  ;;  %v6529_v29 = vsel %vm1887_vm5, %v3375_v50, %v3377_v1 }
 0x382   : > { %v3552_v26 = vmax.f32 %v3488_v35, 0.0  ;;  %v6541_v56 = vsel %vm1887_vm5, %v3371_v32, %v3373_v39  ;;  %v6548_v12 = vsel %vm1887_vm5, %v3373_v39, %v3375_v50  ;;  %v5557_v32 = vld [vmem:[#allocation2 + $0x198] sm:$0xff]  ;;  %v5559_v50 = vld [vmem:[#allocation2 + $0x1a0] sm:$0xff] }
 0x383   : > { %v3550_v0 = vmax.f32 %v3486_v41, 0.0  ;;  %v3387_v39 = vrot.slane %v5559_v50, 1 }
 0x384   : > { %v4699_v28 = vpack.c.bf16 %v3552_v26, %v3551_v19 }
 0x385   : > { %v4694_v27 = vpack.c.bf16 %v3550_v0, %v3549_v2  ;;  %v5272_v46 = vpop.f32.mrb[136].mxu1  ;;  %v3385_v0 = vrot.slane %v5557_v32, 1 }
 0x386   : > { %4866 = vst [vmem:[%s5985_s12 + $0x28] sm:$0xff] %v4699_v28   ;;  %v3020_v23 = vadd.f32 %v5272_v46, %v6477_v8  ;;  %v3011_v33 = vpop.f32.mrb[137].mxu1 }
 0x387   : > { %4865 = vst [vmem:[%s5985_s12 + $0x20] sm:$0xff] %v4694_v27   ;;  %v3012_v18 = vadd.f32 %v6477_v8, %v3011_v33  ;;  %v5273_v10 = vpop.f32.mrb[138].mxu1 }
 0x388   : > { %v3491_v60 = vadd.f32 %v6362_v55, %v3020_v23  ;;  %v3023_v36 = vadd.f32 %v5273_v10, %v6477_v8  ;;  %v3014_v24 = vpop.f32.mrb[139].mxu1  ;;  %v6545_v55 = vsel %vm1887_vm5, %v3377_v1, %v3379_v47 }
 0x389   : > { %v3489_v58 = vadd.f32 %v6367_v49, %v3012_v18  ;;  %v3015_v15 = vadd.f32 %v6477_v8, %v3014_v24 }
 0x38a   : > { %v3492_v11 = vadd.f32 %v6370_v3, %v3023_v36  ;;  %v3555_v41 = vmax.f32 %v3491_v60, 0.0  ;;  %v5556_v3 = vld [vmem:[#allocation2 + $0x190] sm:$0xff] }
 0x38b   : > { %v3490_v35 = vadd.f32 %v6373_v6, %v3015_v15  ;;  %v3553_v49 = vmax.f32 %v3489_v58, 0.0  ;;  %v3383_v59 = vrot.slane %v5556_v3, 1  ;;  %v5558_v6 = vld [vmem:[#allocation2 + $0x188] sm:$0xff] }
 0x38c   : > { %v3556_v20 = vmax.f32 %v3492_v11, 0.0  ;;  %v3381_v27 = vrot.slane %v5558_v6, 1  ;;  %v6567_v11 = vsel %vm1887_vm5, %v3385_v0, %v3387_v39 }
 0x38d   : > { %v3554_v19 = vmax.f32 %v3490_v35, 0.0  ;;  %v6554_v30 = vsel %vm1887_vm5, %v3383_v59, %v3385_v0 }
 0x38e   : > { %v4709_v26 = vpack.c.bf16 %v3556_v20, %v3555_v41  ;;  %v6563_v58 = vsel %vm1887_vm5, %v3379_v47, %v3381_v27  ;;  %v6570_v41 = vsel %vm1887_vm5, %v3381_v27, %v3383_v59  ;;  %v5561_v47 = vld [vmem:[#allocation2 + $0x1b8] sm:$0xff]  ;;  %v5563_v59 = vld [vmem:[#allocation2 + $0x1c0] sm:$0xff] }
 0x38f   : > { %v4704_v2 = vpack.c.bf16 %v3554_v19, %v3553_v49  ;;  %v3395_v27 = vrot.slane %v5563_v59, 1 }
 0x390   : > { %4868 = vst [vmem:[%s5985_s12 + $0x38] sm:$0xff] %v4709_v26  }
 0x391   : > { %4867 = vst [vmem:[%s5985_s12 + $0x30] sm:$0xff] %v4704_v2   ;;  %v3393_v2 = vrot.slane %v5561_v47, 1 }
 0x395   : > { %v5276_v28 = vpop.f32.mrb[140].mxu1 }
 0x396   : > { %v3036_v1 = vadd.f32 %v5276_v28, %v6477_v8  ;;  %v3027_v46 = vpop.f32.mrb[141].mxu1 }
 0x397   : > { %v3028_v23 = vadd.f32 %v6477_v8, %v3027_v46  ;;  %v5277_v33 = vpop.f32.mrb[142].mxu1 }
 0x398   : > { %v3495_v13 = vadd.f32 %v6378_v34, %v3036_v1  ;;  %v3039_v18 = vadd.f32 %v5277_v33, %v6477_v8  ;;  %v3030_v10 = vpop.f32.mrb[143].mxu1 }
 0x399   : > { %v3493_v60 = vadd.f32 %v6383_v48, %v3028_v23  ;;  %v3031_v36 = vadd.f32 %v6477_v8, %v3030_v10 }
 0x39a   : > { %v3496_v24 = vadd.f32 %v6386_v51, %v3039_v18  ;;  %v3559_v34 = vmax.f32 %v3495_v13, 0.0  ;;  %v5560_v51 = vld [vmem:[#allocation2 + $0x1b0] sm:$0xff] }
 0x39b   : > { %v3494_v15 = vadd.f32 %v6389_v54, %v3031_v36  ;;  %v3557_v20 = vmax.f32 %v3493_v60, 0.0  ;;  %v3391_v26 = vrot.slane %v5560_v51, 1  ;;  %v5562_v54 = vld [vmem:[#allocation2 + $0x1a8] sm:$0xff] }
 0x39c   : > { %v3560_v35 = vmax.f32 %v3496_v24, 0.0  ;;  %v3389_v32 = vrot.slane %v5562_v54, 1  ;;  %v6589_v24 = vsel %vm1887_vm5, %v3393_v2, %v3395_v27 }
 0x39d   : > { %v3558_v49 = vmax.f32 %v3494_v15, 0.0  ;;  %v6576_v6 = vsel %vm1887_vm5, %v3391_v26, %v3393_v2 }
 0x39e   : > { %v4719_v48 = vpack.c.bf16 %v3560_v35, %v3559_v34  ;;  %v6585_v60 = vsel %vm1887_vm5, %v3387_v39, %v3389_v32  ;;  %v6592_v34 = vsel %vm1887_vm5, %v3389_v32, %v3391_v26  ;;  %v5565_v39 = vld [vmem:[#allocation2 + $0x1d8] sm:$0xff]  ;;  %v5567_v26 = vld [vmem:[#allocation2 + $0x1e0] sm:$0xff] }
 0x39f   : > { %v4714_v19 = vpack.c.bf16 %v3558_v49, %v3557_v20  ;;  %v3403_v32 = vrot.slane %v5567_v26, 1  ;;  %v5570_v26 = vld [vmem:[#allocation2 + $0x1e8] sm:$0xff] }
 0x3a0   : > { %4870 = vst [vmem:[%s5985_s12 + $0x48] sm:$0xff] %v4719_v48  }
 0x3a1   : > { %4869 = vst [vmem:[%s5985_s12 + $0x40] sm:$0xff] %v4714_v19   ;;  %v3401_v19 = vrot.slane %v5565_v39, 1 }
 0x3a5   : > { %v5280_v3 = vpop.f32.mrb[144].mxu1 }
 0x3a6   : > { %v3052_v0 = vadd.f32 %v5280_v3, %v6477_v8  ;;  %v3043_v28 = vpop.f32.mrb[145].mxu1 }
 0x3a7   : > { %v3044_v1 = vadd.f32 %v6477_v8, %v3043_v28  ;;  %v5281_v46 = vpop.f32.mrb[146].mxu1 }
 0x3a8   : > { %v3499_v50 = vadd.f32 %v6394_v21, %v3052_v0  ;;  %v3055_v23 = vadd.f32 %v5281_v46, %v6477_v8  ;;  %v3046_v33 = vpop.f32.mrb[147].mxu1 }
 0x3a9   : > { %v3497_v13 = vadd.f32 %v6399_v40, %v3044_v1  ;;  %v3047_v18 = vadd.f32 %v6477_v8, %v3046_v33 }
 0x3aa   : > { %v3500_v10 = vadd.f32 %v6402_v52, %v3055_v23  ;;  %v3563_v21 = vmax.f32 %v3499_v50, 0.0  ;;  %v5564_v52 = vld [vmem:[#allocation2 + $0x1d0] sm:$0xff] }
 0x3ab   : > { %v3498_v36 = vadd.f32 %v6405_v43, %v3047_v18  ;;  %v3561_v35 = vmax.f32 %v3497_v13, 0.0  ;;  %v3399_v48 = vrot.slane %v5564_v52, 1  ;;  %v5566_v43 = vld [vmem:[#allocation2 + $0x1c8] sm:$0xff] }
 0x3ac   : > { %v3564_v15 = vmax.f32 %v3500_v10, 0.0  ;;  %v3397_v47 = vrot.slane %v5566_v43, 1  ;;  %v6611_v10 = vsel %vm1887_vm5, %v3401_v19, %v3403_v32 }
 0x3ad   : > { %v3562_v20 = vmax.f32 %v3498_v36, 0.0  ;;  %v6598_v54 = vsel %vm1887_vm5, %v3399_v48, %v3401_v19 }
 0x3ae   : > { %v4729_v40 = vpack.c.bf16 %v3564_v15, %v3563_v21  ;;  %v6607_v13 = vsel %vm1887_vm5, %v3395_v27, %v3397_v47  ;;  %v6614_v21 = vsel %vm1887_vm5, %v3397_v47, %v3399_v48 }
 0x3af   : > { %v4724_v49 = vpack.c.bf16 %v3562_v20, %v3561_v35 }
 0x3b0   : > { %4872 = vst [vmem:[%s5985_s12 + $0x58] sm:$0xff] %v4729_v40   ;;  %v5568_v40 = vld [vmem:[#allocation2 + $0x1f0] sm:$0xff] }
 0x3b1   : > { %4871 = vst [vmem:[%s5985_s12 + $0x50] sm:$0xff] %v4724_v49   ;;  %v3407_v27 = vrot.slane %v5568_v40, 1  ;;  %v5569_v49 = vld [vmem:[#allocation2 + $0x1f8] sm:$0xff] }
 0x3b2   : > { %v3409_v52 = vrot.slane %v5569_v49, 1 }
 0x3b5   : > { %v5284_v51 = vpop.f32.mrb[148].mxu1 }
 0x3b6   : > { %v3068_v2 = vadd.f32 %v5284_v51, %v6477_v8  ;;  %v3059_v3 = vpop.f32.mrb[149].mxu1 }
 0x3b7   : > { %v3060_v0 = vadd.f32 %v6477_v8, %v3059_v3  ;;  %v5285_v28 = vpop.f32.mrb[150].mxu1 }
 0x3b8   : > { %v3503_v59 = vadd.f32 %v6410_v17, %v3068_v2  ;;  %v3071_v1 = vadd.f32 %v5285_v28, %v6477_v8  ;;  %v3062_v46 = vpop.f32.mrb[151].mxu1 }
 0x3b9   : > { %v3501_v50 = vadd.f32 %v6415_v37, %v3060_v0  ;;  %v3063_v23 = vadd.f32 %v6477_v8, %v3062_v46  ;;  %v3405_v0 = vrot.slane %v5570_v26, 1 }
 0x3ba   : > { %v3504_v33 = vadd.f32 %v6418_v38, %v3071_v1  ;;  %v3567_v17 = vmax.f32 %v3503_v59, 0.0  ;;  %v6626_v59 = vsel %vm1887_vm5, %v3407_v27, %v3409_v52  ;;  %v5571_v1 = vld [vmem:[#allocation2 + $0x200] sm:$0x3] }
 0x3bb   : > { %v3502_v18 = vadd.f32 %v6421_v42, %v3063_v23  ;;  %v3565_v15 = vmax.f32 %v3501_v50, 0.0  ;;  %v3411_v46 = vrot.slane %v5571_v1, 1 }
 0x3bc   : > { %v3568_v36 = vmax.f32 %v3504_v33, 0.0 }
 0x3bd   : > { %v3566_v35 = vmax.f32 %v3502_v18, 0.0 }
 0x3be   : > { %v4739_v37 = vpack.c.bf16 %v3568_v36, %v3567_v17  ;;  %v6630_v17 = vsel %vm1887_vm5, %v3403_v32, %v3405_v0 }
 0x3bf   : > { %v4734_v20 = vpack.c.bf16 %v3566_v35, %v3565_v15  ;;  %v6633_v15 = vsel %vm1887_vm5, %v3409_v52, %v3411_v46 }
 0x3c0   : > { %4874 = vst [vmem:[%s5985_s12 + $0x68] sm:$0xff] %v4739_v37  }
 0x3c1   : > { %4873 = vst [vmem:[%s5985_s12 + $0x60] sm:$0xff] %v4734_v20  }
 0x3c5   : > { %v5288_v38 = vpop.f32.mrb[152].mxu1 }
 0x3c6   : > { %v3084_v42 = vadd.f32 %v5288_v38, %v6477_v8  ;;  %v3075_v39 = vpop.f32.mrb[153].mxu1 }
 0x3c7   : > { %v3076_v19 = vadd.f32 %v6477_v8, %v3075_v39  ;;  %v5289_v51 = vpop.f32.mrb[154].mxu1 }
 0x3c8   : > { %v3507_v48 = vadd.f32 %v6426_v16, %v3084_v42  ;;  %v3087_v43 = vadd.f32 %v5289_v51, %v6477_v8  ;;  %v3078_v47 = vpop.f32.mrb[155].mxu1 }
 0x3c9   : > { %v3505_v2 = vadd.f32 %v6431_v44, %v3076_v19  ;;  %v3079_v3 = vadd.f32 %v6477_v8, %v3078_v47 }
 0x3ca   : > { %v3508_v28 = vadd.f32 %v6434_v45, %v3087_v43  ;;  %v3571_v50 = vmax.f32 %v3507_v48, 0.0  ;;  %v6637_v45 = vsel %vm1887_vm5, %v3405_v0, %v3407_v27 }
 0x3cb   : > { %v3506_v16 = vadd.f32 %v6437_v53, %v3079_v3  ;;  %v3569_v33 = vmax.f32 %v3505_v2, 0.0 }
 0x3cc   : > { %v3572_v23 = vmax.f32 %v3508_v28, 0.0 }
 0x3cd   : > { %v3570_v18 = vmax.f32 %v3506_v16, 0.0 }
 0x3ce   : > { %v4749_v44 = vpack.c.bf16 %v3572_v23, %v3571_v50 }
 0x3cf   : > { %v4744_v36 = vpack.c.bf16 %v3570_v18, %v3569_v33 }
 0x3d0   : > { %4876 = vst [vmem:[%s5985_s12 + $0x78] sm:$0xff] %v4749_v44  }
 0x3d1   : > { %4875 = vst [vmem:[%s5985_s12 + $0x70] sm:$0xff] %v4744_v36  }
 0x3d5   : > { %v5292_v35 = vpop.f32.mrb[156].mxu1 }
 0x3d6   : > { %v3100_v53 = vadd.f32 %v5292_v35, %v6477_v8  ;;  %v3091_v37 = vpop.f32.mrb[157].mxu1 }
 0x3d7   : > { %v3092_v20 = vadd.f32 %v6477_v8, %v3091_v37  ;;  %v5293_v38 = vpop.f32.mrb[158].mxu1 }
 0x3d8   : > { %v3511_v32 = vadd.f32 %v6442_v25, %v3100_v53  ;;  %v3103_v40 = vadd.f32 %v5293_v38, %v6477_v8  ;;  %v3094_v49 = vpop.f32.mrb[159].mxu1 }
 0x3d9   : > { %v3509_v52 = vadd.f32 %v6449_v62, %v3092_v20  ;;  %v3095_v27 = vadd.f32 %v6477_v8, %v3094_v49 }
 0x3da   : > { %v3512_v42 = vadd.f32 %v6452_v63, %v3103_v40  ;;  %v3575_v19 = vmax.f32 %v3511_v32, 0.0 }
 0x3db   : > { %v3510_v39 = vadd.f32 %v6455_v57, %v3095_v27  ;;  %v3573_v48 = vmax.f32 %v3509_v52, 0.0 }
 0x3dc   : > { %v3576_v51 = vmax.f32 %v3512_v42, 0.0 }
 0x3dd   : > { %v3574_v43 = vmax.f32 %v3510_v39, 0.0 }
 0x3de   : > { %v4759_v47 = vpack.c.bf16 %v3576_v51, %v3575_v19 }
 0x3df   : > { %v4754_v2 = vpack.c.bf16 %v3574_v43, %v3573_v48 }
 0x3e0   : > { %4878 = vst [vmem:[%s5985_s12 + $0x88] sm:$0xff] %v4759_v47  }
 0x3e1   : > { %4877 = vst [vmem:[%s5985_s12 + $0x80] sm:$0xff] %v4754_v2  }
 0x3e5   : > { %v5296_v25 = vpop.f32.mrb[160].mxu1 }
 0x3e6   : > { %v3116_v3 = vadd.f32 %v5296_v25, %v6477_v8  ;;  %v3107_v26 = vpop.f32.mrb[161].mxu1 }
 0x3e7   : > { %v3108_v62 = vadd.f32 %v6477_v8, %v3107_v26  ;;  %v5297_v0 = vpop.f32.mrb[162].mxu1 }
 0x3e8   : > { %v3515_v63 = vadd.f32 %v6458_v14, %v3116_v3  ;;  %v3119_v57 = vadd.f32 %v5297_v0, %v6477_v8  ;;  %v3110_v28 = vpop.f32.mrb[163].mxu1 }
 0x3e9   : > { %v3513_v1 = vadd.f32 %v6464_v22, %v3108_v62  ;;  %v3111_v46 = vadd.f32 %v6477_v8, %v3110_v28 }
 0x3ea   : > { %v3516_v16 = vadd.f32 %v6469_v7, %v3119_v57  ;;  %v3579_v23 = vmax.f32 %v3515_v63, 0.0 }
 0x3eb   : > { %v3514_v50 = vadd.f32 %v6472_v4, %v3111_v46  ;;  %v3577_v18 = vmax.f32 %v3513_v1, 0.0 }
 0x3ec   : > { %v3580_v33 = vmax.f32 %v3516_v16, 0.0 }
 0x3ed   : > { %v3578_v44 = vmax.f32 %v3514_v50, 0.0 }
 0x3ee   : > { %v4769_v36 = vpack.c.bf16 %v3580_v33, %v3579_v23 }
 0x3ef   : > { %v4764_v35 = vpack.c.bf16 %v3578_v44, %v3577_v18 }
 0x3f0   : > { %4880 = vst [vmem:[%s5985_s12 + $0x98] sm:$0xff] %v4769_v36  }
 0x3f1   : > { %4879 = vst [vmem:[%s5985_s12 + $0x90] sm:$0xff] %v4764_v35  }
 0x3f5   : > { %v5300_v14 = vpop.f32.mrb[164].mxu1 }
 0x3f6   : > { %v3132_v53 = vadd.f32 %v5300_v14, %v6477_v8  ;;  %v3123_v37 = vpop.f32.mrb[165].mxu1 }
 0x3f7   : > { %v3124_v22 = vadd.f32 %v6477_v8, %v3123_v37  ;;  %v5301_v20 = vpop.f32.mrb[166].mxu1 }
 0x3f8   : > { %v3519_v7 = vadd.f32 %v6497_v61, %v3132_v53  ;;  %v3135_v4 = vadd.f32 %v5301_v20, %v6477_v8  ;;  %v3126_v38 = vpop.f32.mrb[167].mxu1 }
 0x3f9   : > { %v3517_v32 = vadd.f32 %v6504_v5, %v3124_v22  ;;  %v3127_v40 = vadd.f32 %v6477_v8, %v3126_v38 }
 0x3fa   : > { %v3520_v49 = vadd.f32 %v6510_v9, %v3135_v4  ;;  %v3583_v27 = vmax.f32 %v3519_v7, 0.0 }
 0x3fb   : > { %v3518_v52 = vadd.f32 %v6515_v31, %v3127_v40  ;;  %v3581_v39 = vmax.f32 %v3517_v32, 0.0 }
 0x3fc   : > { %v3584_v42 = vmax.f32 %v3520_v49, 0.0 }
 0x3fd   : > { %v3582_v19 = vmax.f32 %v3518_v52, 0.0 }
 0x3fe   : > { %v4779_v51 = vpack.c.bf16 %v3584_v42, %v3583_v27 }
 0x3ff   : > { %v4774_v48 = vpack.c.bf16 %v3582_v19, %v3581_v39 }
 0x400   : > { %4882 = vst [vmem:[%s5985_s12 + $0xa8] sm:$0xff] %v4779_v51  }
 0x401   : > { %4881 = vst [vmem:[%s5985_s12 + $0xa0] sm:$0xff] %v4774_v48  }
 0x405   : > { %v5304_v61 = vpop.f32.mrb[168].mxu1 }
 0x406   : > { %v3148_v43 = vadd.f32 %v5304_v61, %v6477_v8  ;;  %v3139_v47 = vpop.f32.mrb[169].mxu1 }
 0x407   : > { %v3140_v5 = vadd.f32 %v6477_v8, %v3139_v47  ;;  %v5305_v2 = vpop.f32.mrb[170].mxu1 }
 0x408   : > { %v3523_v9 = vadd.f32 %v6529_v29, %v3148_v43  ;;  %v3151_v31 = vadd.f32 %v5305_v2, %v6477_v8  ;;  %v3142_v25 = vpop.f32.mrb[171].mxu1 }
 0x409   : > { %v3521_v3 = vadd.f32 %v6541_v56, %v3140_v5  ;;  %v3143_v26 = vadd.f32 %v6477_v8, %v3142_v25 }
 0x40a   : > { %v3524_v62 = vadd.f32 %v6545_v55, %v3151_v31  ;;  %v3587_v63 = vmax.f32 %v3523_v9, 0.0 }
 0x40b   : > { %v3522_v0 = vadd.f32 %v6548_v12, %v3143_v26  ;;  %v3585_v28 = vmax.f32 %v3521_v3, 0.0 }
 0x40c   : > { %v3588_v57 = vmax.f32 %v3524_v62, 0.0 }
 0x40d   : > { %v3586_v1 = vmax.f32 %v3522_v0, 0.0 }
 0x40e   : > { %v4789_v46 = vpack.c.bf16 %v3588_v57, %v3587_v63 }
 0x40f   : > { %v4784_v16 = vpack.c.bf16 %v3586_v1, %v3585_v28 }
 0x410   : > { %4884 = vst [vmem:[%s5985_s12 + $0xb8] sm:$0xff] %v4789_v46  }
 0x411   : > { %4883 = vst [vmem:[%s5985_s12 + $0xb0] sm:$0xff] %v4784_v16  }
 0x415   : > { %v5308_v29 = vpop.f32.mrb[172].mxu1 }
 0x416   : > { %v3164_v50 = vadd.f32 %v5308_v29, %v6477_v8  ;;  %v3155_v23 = vpop.f32.mrb[173].mxu1 }
 0x417   : > { %v3156_v56 = vadd.f32 %v6477_v8, %v3155_v23  ;;  %v5309_v33 = vpop.f32.mrb[174].mxu1 }
 0x418   : > { %v3527_v55 = vadd.f32 %v6554_v30, %v3164_v50  ;;  %v3167_v12 = vadd.f32 %v5309_v33, %v6477_v8  ;;  %v3158_v18 = vpop.f32.mrb[175].mxu1 }
 0x419   : > { %v3525_v44 = vadd.f32 %v6563_v58, %v3156_v56  ;;  %v3159_v36 = vadd.f32 %v6477_v8, %v3158_v18 }
 0x41a   : > { %v3528_v35 = vadd.f32 %v6567_v11, %v3167_v12  ;;  %v3591_v53 = vmax.f32 %v3527_v55, 0.0 }
 0x41b   : > { %v3526_v14 = vadd.f32 %v6570_v41, %v3159_v36  ;;  %v3589_v22 = vmax.f32 %v3525_v44, 0.0 }
 0x41c   : > { %v3592_v37 = vmax.f32 %v3528_v35, 0.0 }
 0x41d   : > { %v3590_v20 = vmax.f32 %v3526_v14, 0.0 }
 0x41e   : > { %v4799_v7 = vpack.c.bf16 %v3592_v37, %v3591_v53 }
 0x41f   : > { %v4794_v4 = vpack.c.bf16 %v3590_v20, %v3589_v22 }
 0x420   : > { %4886 = vst [vmem:[%s5985_s12 + $0xc8] sm:$0xff] %v4799_v7  }
 0x421   : > { %4885 = vst [vmem:[%s5985_s12 + $0xc0] sm:$0xff] %v4794_v4  }
 0x425   : > { %v5312_v30 = vpop.f32.mrb[176].mxu1 }
 0x426   : > { %v3180_v38 = vadd.f32 %v5312_v30, %v6477_v8  ;;  %v3171_v32 = vpop.f32.mrb[177].mxu1 }
 0x427   : > { %v3172_v58 = vadd.f32 %v6477_v8, %v3171_v32  ;;  %v5313_v40 = vpop.f32.mrb[178].mxu1 }
 0x428   : > { %v3531_v11 = vadd.f32 %v6576_v6, %v3180_v38  ;;  %v3183_v41 = vadd.f32 %v5313_v40, %v6477_v8  ;;  %v3174_v49 = vpop.f32.mrb[179].mxu1 }
 0x429   : > { %v3529_v52 = vadd.f32 %v6585_v60, %v3172_v58  ;;  %v3175_v27 = vadd.f32 %v6477_v8, %v3174_v49 }
 0x42a   : > { %v3532_v42 = vadd.f32 %v6589_v24, %v3183_v41  ;;  %v3595_v19 = vmax.f32 %v3531_v11, 0.0 }
 0x42b   : > { %v3530_v39 = vadd.f32 %v6592_v34, %v3175_v27  ;;  %v3593_v48 = vmax.f32 %v3529_v52, 0.0 }
 0x42c   : > { %v3596_v51 = vmax.f32 %v3532_v42, 0.0 }
 0x42d   : > { %v3594_v61 = vmax.f32 %v3530_v39, 0.0 }
 0x42e   : > { %v4809_v43 = vpack.c.bf16 %v3596_v51, %v3595_v19 }
 0x42f   : > { %v4804_v47 = vpack.c.bf16 %v3594_v61, %v3593_v48 }
 0x430   : > { %4888 = vst [vmem:[%s5985_s12 + $0xd8] sm:$0xff] %v4809_v43  }
 0x431   : > { %4887 = vst [vmem:[%s5985_s12 + $0xd0] sm:$0xff] %v4804_v47  }
 0x435   : > { %v5316_v6 = vpop.f32.mrb[180].mxu1 }
 0x436   : > { %v3196_v5 = vadd.f32 %v5316_v6, %v6477_v8  ;;  %v3187_v2 = vpop.f32.mrb[181].mxu1 }
 0x437   : > { %v3188_v60 = vadd.f32 %v6477_v8, %v3187_v2  ;;  %v5317_v9 = vpop.f32.mrb[182].mxu1 }
 0x438   : > { %v3535_v24 = vadd.f32 %v6598_v54, %v3196_v5  ;;  %v3199_v34 = vadd.f32 %v5317_v9, %v6477_v8  ;;  %v3190_v31 = vpop.f32.mrb[183].mxu1 }
 0x439   : > { %v3533_v25 = vadd.f32 %v6607_v13, %v3188_v60  ;;  %v3191_v3 = vadd.f32 %v6477_v8, %v3190_v31 }
 0x43a   : > { %v3536_v26 = vadd.f32 %v6611_v10, %v3199_v34  ;;  %v3599_v0 = vmax.f32 %v3535_v24, 0.0 }
 0x43b   : > { %v3534_v62 = vadd.f32 %v6614_v21, %v3191_v3  ;;  %v3597_v57 = vmax.f32 %v3533_v25, 0.0 }
 0x43c   : > { %v3600_v63 = vmax.f32 %v3536_v26, 0.0 }
 0x43d   : > { %v3598_v28 = vmax.f32 %v3534_v62, 0.0 }
 0x43e   : > { %v4819_v1 = vpack.c.bf16 %v3600_v63, %v3599_v0 }
 0x43f   : > { %v4814_v46 = vpack.c.bf16 %v3598_v28, %v3597_v57 }
 0x440   : > { %4890 = vst [vmem:[%s5985_s12 + $0xe8] sm:$0xff] %v4819_v1  }
 0x441   : > { %4889 = vst [vmem:[%s5985_s12 + $0xe0] sm:$0xff] %v4814_v46  }
 0x449   : > { %v5320_v54 = vpop.f32.mrb[184].mxu1 }
 0x44a   : > { %v3212_v16 = vadd.f32 %v5320_v54, %v6477_v8  ;;  %v3203_v13 = vpop.f32.mrb[185].mxu1 }
 0x44b   : > { %v3204_v29 = vadd.f32 %v6477_v8, %v3203_v13  ;;  %v5321_v50 = vpop.f32.mrb[186].mxu1 }
 0x44c   : > { %v3539_v10 = vadd.f32 %v6626_v59, %v3212_v16  ;;  %v3215_v21 = vadd.f32 %v5321_v50, %v6477_v8  ;;  %v3206_v23 = vpop.f32.mrb[187].mxu1 }
 0x44d   : > { %v3537_v56 = vadd.f32 %v6630_v17, %v3204_v29  ;;  %v3207_v33 = vadd.f32 %v6477_v8, %v3206_v23 }
 0x44e   : > { %v3540_v55 = vadd.f32 %v6633_v15, %v3215_v21  ;;  %v3603_v18 = vmax.f32 %v3539_v10, 0.0 }
 0x44f   : > { %v3538_v12 = vadd.f32 %v6637_v45, %v3207_v33  ;;  %v3601_v59 = vmax.f32 %v3537_v56, 0.0 }
 0x450   : > { %v3604_v44 = vmax.f32 %v3540_v55, 0.0 }
 0x451   : > { %v3602_v36 = vmax.f32 %v3538_v12, 0.0 }
 0x452   : > { %v4829_v35 = vpack.c.bf16 %v3604_v44, %v3603_v18 }
 0x453   : > { %v4824_v8 = vpack.c.bf16 %v3602_v36, %v3601_v59 }
 0x454   : > { %4892 = vst [vmem:[%s5985_s12 + $0xf8] sm:$0xff] %v4829_v35  }
 0x455   : > { %4891 = vst [vmem:[%s5985_s12 + $0xf0] sm:$0xff] %v4824_v8  }
 0x456   : > { %5693 = shalt.err (!%p5690_p2)
}
 0x457   : > { %s5694_s19 = scalar_lea.hbm %s6723_s2, 4096  ;;  %s5698_s14 = scalar_lea.hbm %s6784_s7, 8192 }
 0x458   : > { %p5695_p3 = scmp.ne.s32.totalorder %s6723_s2, %s5694_s19  ;;  %p5699_p7 = scmp.lt.u32.totalorder %s6723_s2, %s6784_s7 }
 0x459   : > { %p5700_p9 = scmp.lt.u32.totalorder %s5698_s14, %s5694_s19  ;;  %p5702_p4 = scmp.lt.u32.totalorder %s5694_s19, %s6723_s2 }
 0x45a   : > { %p5696_p5 = pnand %p5695_p3, %p6808_p1 }
 0x45b   : > { %p5701_p12 = por %p5700_p9, %p5699_p7 }
 0x45c   : > { %p5697_p6 = pneg %p5696_p5 }
 0x45d   : > { %p5703_p13 = por %p5702_p4, %p5701_p12 }
 0x45f   : > { %p5704_p8 = pnand %p5703_p13, %p5697_p6 }
 0x461   : > { %5707 = shalt.err (!%p5704_p8)
}
 0x462   : > { %s5780_s8 = smov 64   ;;  %s5781_s10 = smov 4  }
 0x463   : > { %5350 = dma.vmem_to_hbm [thread:$0]  (%p6808_p1), %s6725_s20, 4096, %s6723_s2, %s6731_s27, %s5780_s8, %s5780_s8, %s5781_s10  }
 0x464 PF: > { %p5372_p10 = scmp.ge.s32.totalorder %s5768_s29, 2  ;;  %s3956_s16 = sand.u32 1, %s5748_s24  }
 0x465   : > { %p6809_p11 = scmp.ne.s32.totalorder %s6797_s13, 0  ;;  %s3957_s17 = scalar_lea.sflag [#allocation8], %s3956_s16 }
 0x467   : > { %p5363_p0 = pnand %p5372_p10, %p6809_p11 }
 0x469   : > { %5743 = dma.done.wait (!%p5363_p0), %s3957_s17, 4096  }
 0x46a   : > { %5745 = vsyncadd (!%p5363_p0), %s3957_s17, 4294963200  ;;  %s22_s29 = sadd.s32 1, %s5768_s29   ;;  %s6810_s9 = sld [smem:[#allocation31_spill]] }
 0x46b   : > { %p19_p2 = scmp.ge.s32.totalorder %s22_s29, 4   ;;  %s6811_s26 = sld [smem:[#allocation34_spill]] }
 0x46c   : > { %s6812_s27 = sld [smem:[#allocation32_spill]]  ;;  %s6813_s28 = sld [smem:[#allocation33_spill]] }
 0x46d   : > { %s6814_s24 = smov %s5752_s25  ;;  %21 = sbr.rel (!%p19_p2) target bundleno = 8 (0x8), region = 175 }
 0x470   : > { %s6815_s25 = smov %s6810_s9 }
 0x474   :  { %3962 = vsyncpa [#allocation7], 1 }
 0x475   :  { %3964 = vsyncpa [#allocation7 + $0x1], 1 }
 0x476   :  { %3965 = vsyncpa [#allocation10], 1 }
 0x477   :  { %3966 = vsyncpa [#allocation8], 1 }
 0x478   :  { %3968 = vsyncpa [#allocation8 + $0x1], 1 }
 0x479   :  { %3969 = vsyncmov [#allocation4] }
 0x47c   :  { %s3970_s11 = vpop.sfrf %3969 }
 0x47d   :  { %p4369_p1 = scmp.ne.s32.totalorder %s3970_s11, 0 }
 0x47f   :  { %3974 = shalt.err (%p4369_p1)  }
 0x480   :  { %3976 = vsyncmov [#allocation4 + $0x1] }
 0x483   :  { %s3977_s13 = vpop.sfrf %3976 }
 0x484   :  { %p4370_p3 = scmp.ne.s32.totalorder %s3977_s13, 0 }
 0x486   :  { %3981 = shalt.err (%p4370_p3)  }
 0x487   :  { %3982 = vsyncmov [#allocation5] }
 0x48a   :  { %s3983_s20 = vpop.sfrf %3982 }
 0x48b   :  { %p4371_p5 = scmp.ne.s32.totalorder %s3983_s20, 0 }
 0x48d   :  { %3987 = shalt.err (%p4371_p5)  }
 0x48e   :  { %3989 = vsyncmov [#allocation5 + $0x1] }
 0x491   :  { %s3990_s29 = vpop.sfrf %3989 }
 0x492   :  { %p4372_p6 = scmp.ne.s32.totalorder %s3990_s29, 0 }
 0x494   :  { %3994 = shalt.err (%p4372_p6)  }
 0x495   :  { %3996 = vsyncmov [#allocation5 + $0x2] }
 0x498   :  { %s3997_s0 = vpop.sfrf %3996 }
 0x499   :  { %p4373_p7 = scmp.ne.s32.totalorder %s3997_s0, 0 }
 0x49b   :  { %4001 = shalt.err (%p4373_p7)  }
 0x49c   :  { %4003 = vsyncmov [#allocation5 + $0x3] }
 0x49f   :  { %s4004_s1 = vpop.sfrf %4003 }
 0x4a0   :  { %p4374_p9 = scmp.ne.s32.totalorder %s4004_s1, 0 }
 0x4a2   :  { %4008 = shalt.err (%p4374_p9)  }

</bundles_post_ra>
